<compile_context>
chip_gen: v6e
topology: v6e:2x2x1
jax: 0.10.0
libtpu: 0.0.40
codegen_flags: <defaults>
</compile_context>

<pallas_src>
import functools
import math

import jax
import jax.numpy as jnp
from jax import lax
from jax.experimental import pallas as pl
from jax.experimental.pallas import tpu as pltpu

LANE = 128
SUBLANE = 8

# PyTorch gate order is [i|f|g|o]; kernel uses [i|f|o|g] so the sigmoid gates
# are contiguous (lanes < 3H) and the tanh gate is last (lanes >= 3H).
_GATE_ORDER = (0, 1, 3, 2)


def _round_up(x, m):
    return ((x + m - 1) // m) * m


# ----------------------------------------------------------------------------
# Weight padding / packing helpers (wrapper-side, once).
# ----------------------------------------------------------------------------
def _pack_gate_matrix(w, H, stride, Gp):
    """(D, 4H) torch-order -> (D, Gp), gate k at cols [k*stride, k*stride+H)."""
    blocks = []
    for k in _GATE_ORDER:
        blk = w[:, k * H:(k + 1) * H]
        blocks.append(jnp.pad(blk, ((0, 0), (0, stride - H))))
    out = jnp.concatenate(blocks, axis=1)
    return jnp.pad(out, ((0, 0), (0, Gp - 4 * stride)))


def _pad_rows(w, Dp):
    return jnp.pad(w, ((0, Dp - w.shape[0]), (0, 0)))


# ----------------------------------------------------------------------------
# Fused Pallas kernel: the entire ChainLSTM forward.
# ----------------------------------------------------------------------------
def _make_chain_kernel(num_layers_list, T, Bp, Hp, Gp, H, packed, n_weight_refs):
    def kernel(*refs):
        x_ref = refs[0]
        w_refs = refs[1:1 + n_weight_refs]
        out_ref = refs[1 + n_weight_refs]
        gx_buf = refs[2 + n_weight_refs]          # (T, Bp, Gp) pre-projected gates

        # Flatten (T, Bp, D) -> (T*Bp, D) once; everything stays time-major.
        cur = x_ref[...].reshape(T * Bp, x_ref.shape[-1])     # f32

        if packed:
            # sigmoid for lanes < 3H (i, f, o), tanh for lanes >= 3H (g).
            lane = lax.broadcasted_iota(jnp.int32, (Bp, Gp), 1)
            sig_mask = lane < 3 * H

        wi = 0
        for nl in num_layers_list:                # models, in chain order
            for _l in range(nl):                  # LSTM layers of this model
                # Hoisted weight/bias loads (outside the recurrence).
                wih = w_refs[wi][...]             # (Dp, Gp)  bf16
                whh = w_refs[wi + 1][...]         # (Hp, Gp)  bf16
                bias = w_refs[wi + 2][...]        # (1,  Gp)  f32
                wi += 3

                # Input projection for ALL timesteps: one big bf16 MXU matmul.
                gx_buf[...] = (
                    jnp.dot(cur.astype(jnp.bfloat16), wih,
                            preferred_element_type=jnp.float32) + bias
                ).reshape(T, Bp, Gp)

                h = jnp.zeros((Bp, Hp), jnp.float32)
                c = jnp.zeros((Bp, Hp), jnp.float32)
                hs = []
                # Serial recurrence, fully unrolled (T static & small).
                for t in range(T):
                    gates = gx_buf[t] + jnp.dot(
                        h.astype(jnp.bfloat16), whh,
                        preferred_element_type=jnp.float32)
                    if packed:
                        # One sigmoid + one tanh over the packed 128-lane tile,
                        # then XLU rolls to align each gate with the h/c lanes.
                        act = jnp.where(sig_mask, jax.nn.sigmoid(gates),
                                        jnp.tanh(gates))
                        i_g = act                                   # lanes 0..H-1 = i
                        f_g = pltpu.roll(act, Gp - H, axis=1)       # f -> lanes 0..H-1
                        o_g = pltpu.roll(act, Gp - 2 * H, axis=1)   # o -> lanes 0..H-1
                        g_g = pltpu.roll(act, Gp - 3 * H, axis=1)   # g -> lanes 0..H-1
                    else:
                        i_g = jax.nn.sigmoid(gates[:, 0 * Hp:1 * Hp])
                        f_g = jax.nn.sigmoid(gates[:, 1 * Hp:2 * Hp])
                        o_g = jax.nn.sigmoid(gates[:, 2 * Hp:3 * Hp])
                        g_g = jnp.tanh(gates[:, 3 * Hp:4 * Hp])
                    # Padding lanes (>= H) of c/h pick up garbage; harmless:
                    # every downstream weight row beyond H is zero-padded.
                    c = f_g * c + i_g * g_g
                    h = o_g * jnp.tanh(c)
                    hs.append(h)
                # Build next layer's input directly from the live h_t values
                # (no hseq VMEM round-trip at small T).
                cur = jnp.concatenate(hs, axis=0)          # (T*Bp, Hp) f32

            # FC head of this model, fused (one big matmul on the whole slab).
            fc_w = w_refs[wi][...]                          # (Hp, Op) bf16
            fc_b = w_refs[wi + 1][...]                      # (1,  Op) f32
            wi += 2
            cur = jnp.dot(cur.astype(jnp.bfloat16), fc_w,
                          preferred_element_type=jnp.float32) + fc_b

        out_ref[...] = cur.reshape(T, Bp, out_ref.shape[-1]).astype(out_ref.dtype)

    return kernel


# ----------------------------------------------------------------------------
# Wrapper: pads/transposes once, builds packed bf16 weights, calls the kernel.
# ----------------------------------------------------------------------------
def chain_lstm_forward(x_btd, prev_params, chain_params):
    """Equivalent of ChainLSTM.forward: out = fc2(lstm2(fc1(lstm1(x))))."""
    models = [prev_params, chain_params]
    B, T, D_in = x_btd.shape
    H = models[0][0][0][1].shape[0]               # whh rows of first layer
    Hp = _round_up(H, LANE)
    Bp = _round_up(B, SUBLANE)
    Dp0 = _round_up(D_in, LANE)

    packed = (4 * H <= LANE)                      # pack all 4 gates in 1 lane tile
    if packed:
        Gp, stride = LANE, H
    else:
        Gp, stride = 4 * Hp, Hp

    # Time-major + pad batch (sublanes) and input features (lanes).
    # NOTE: padded batch rows accumulate bias garbage; they are stripped below
    # and nothing in the kernel reduces across batch rows.
    x = jnp.transpose(x_btd, (1, 0, 2))                        # (T, B, D)
    x = jnp.pad(x, ((0, 0), (0, Bp - B), (0, Dp0 - D_in)))     # (T, Bp, Dp0)

    # Build packed/padded weight list in kernel order (bf16 mats, f32 biases).
    flat_weights = []
    num_layers_list = []
    in_dim = Dp0
    for (layers, fc_w, fc_b) in models:
        num_layers_list.append(len(layers))
        d = in_dim
        for (wih, whh, b) in layers:
            flat_weights.append(
                _pad_rows(_pack_gate_matrix(wih, H, stride, Gp), d)
                .astype(jnp.bfloat16))
            flat_weights.append(
                _pad_rows(_pack_gate_matrix(whh, H, stride, Gp), Hp)
                .astype(jnp.bfloat16))
            flat_weights.append(_pack_gate_matrix(b, H, stride, Gp))   # f32
            d = Hp
        O = fc_w.shape[1]
        Op = _round_up(O, LANE)
        flat_weights.append(
            jnp.pad(fc_w, ((0, Hp - H), (0, Op - O))).astype(jnp.bfloat16))
        flat_weights.append(jnp.pad(fc_b, ((0, 0), (0, Op - O))))      # f32
        in_dim = Op

    O_out = models[-1][1].shape[1]
    Op_out = _round_up(O_out, LANE)

    n_w = len(flat_weights)
    kernel = _make_chain_kernel(tuple(num_layers_list), T, Bp, Hp, Gp, H,
                                packed, n_w)

    # Explicit VMEM budget with per-generation headroom (<= 85% of physical).
    def _nbytes(a):
        return int(a.size) * jnp.dtype(a.dtype).itemsize
    total_bytes = (_nbytes(x) + sum(_nbytes(w) for w in flat_weights)
                   + T * Bp * Op_out * 4      # output
                   + T * Bp * Gp * 4)         # gx scratch
    try:
        cap = int(getattr(pltpu.get_tpu_info(), "vmem_capacity_bytes",
                          64 * 1024 * 1024))
    except Exception:
        cap = 64 * 1024 * 1024
    vmem_limit = int(min(int(0.85 * cap),
                         max(8 * 1024 * 1024, 2 * total_bytes)))

    out_p = pl.pallas_call(
        kernel,
        out_shape=jax.ShapeDtypeStruct((T, Bp, Op_out), jnp.float32),
        in_specs=[pl.BlockSpec(memory_space=pltpu.MemorySpace.VMEM)] * (1 + n_w),
        out_specs=pl.BlockSpec(memory_space=pltpu.MemorySpace.VMEM),
        scratch_shapes=[pltpu.VMEM((T, Bp, Gp), jnp.float32)],   # gx scratch
        compiler_params=pltpu.CompilerParams(vmem_limit_bytes=vmem_limit),
    )(x, *flat_weights)

    # Back to batch-first, strip padding.
    out = jnp.transpose(out_p, (1, 0, 2))[:B, :, :O_out]
    return out


# ----------------------------------------------------------------------------
# Deterministic parameter construction (synthetic, PyTorch-like uniform init)
# Layout matches nn.LSTM: weights pre-transposed to (D, 4H)/(H, 4H), gate
# order [i|f|g|o], combined bias = bias_ih + bias_hh.
# ----------------------------------------------------------------------------
def init_lstm_model_params(key, input_size, hidden_size, output_size, num_layers):
    k = 1.0 / math.sqrt(hidden_size)
    layers = []
    d = input_size
    for _ in range(num_layers):
        key, k1, k2, k3, k4 = jax.random.split(key, 5)
        wih = jax.random.uniform(k1, (d, 4 * hidden_size), jnp.float32, -k, k)
        whh = jax.random.uniform(k2, (hidden_size, 4 * hidden_size), jnp.float32, -k, k)
        b_ih = jax.random.uniform(k3, (4 * hidden_size,), jnp.float32, -k, k)
        b_hh = jax.random.uniform(k4, (4 * hidden_size,), jnp.float32, -k, k)
        layers.append((wih, whh, (b_ih + b_hh).reshape(1, 4 * hidden_size)))
        d = hidden_size
    key, k5, k6 = jax.random.split(key, 3)
    fc_w = jax.random.uniform(k5, (hidden_size, output_size), jnp.float32, -k, k)
    fc_b = jax.random.uniform(k6, (1, output_size), jnp.float32, -k, k)
    return (layers, fc_w, fc_b)


# ----------------------------------------------------------------------------
# Pure-JAX f32 reference (for correctness check)
# ----------------------------------------------------------------------------
def _ref_lstm_model(x_btd, layers, fc_w, fc_b):
    y = jnp.transpose(x_btd, (1, 0, 2))
    for (wih, whh, b) in layers:
        H = whh.shape[0]
        B = y.shape[1]

        def step(carry, x_t):
            h, c = carry
            gates = x_t @ wih + h @ whh + b
            i = jax.nn.sigmoid(gates[:, 0:H])
            f = jax.nn.sigmoid(gates[:, H:2 * H])
            g = jnp.tanh(gates[:, 2 * H:3 * H])
            o = jax.nn.sigmoid(gates[:, 3 * H:4 * H])
            c_new = f * c + i * g
            h_new = o * jnp.tanh(c_new)
            return (h_new, c_new), h_new

        h0 = jnp.zeros((B, H), jnp.float32)
        (_, _), y = lax.scan(step, (h0, h0), y)
    h = jnp.transpose(y, (1, 0, 2))
    return h @ fc_w + fc_b


def _ref_chain(x, prev_params, chain_params):
    return _ref_lstm_model(_ref_lstm_model(x, *prev_params), *chain_params)


# ----------------------------------------------------------------------------
if __name__ == "__main__":
    # Shapes consistent with the module: batch_first LSTM input (B, T, D).
    B, T = 2, 8
    D_in, H = 4, 32
    D_mid = 16   # prev_model output_size == chain _lstm input_size
    D_out = 8
    num_layers = 2

    key = jax.random.PRNGKey(0)
    key, kx, kp, kc = jax.random.split(key, 4)
    x = jax.random.normal(kx, (B, T, D_in), jnp.float32)

    prev_params = init_lstm_model_params(kp, D_in, H, D_mid, num_layers)
    chain_params = init_lstm_model_params(kc, D_mid, H, D_out, num_layers)

    fwd = jax.jit(functools.partial(
        chain_lstm_forward, prev_params=prev_params, chain_params=chain_params))
    out = fwd(x)
    out = jax.block_until_ready(out)

    ref = _ref_chain(x, prev_params, chain_params)
    assert out.shape == (B, T, D_out), out.shape
    # bf16 matmul operands (f32 accumulation & gate math) -> loosened tolerance.
    assert jnp.allclose(out, ref, rtol=3e-2, atol=3e-2), \
        float(jnp.max(jnp.abs(out - ref)))

    print("KERNEL_OK")
</pallas_src>

<mosaic_0001>
module attributes {stable_mosaic.version = 11 : i64} {
  func.func @kernel(%arg0: memref<8x8x128xf32, #tpu.memory_space<vmem>>, %arg1: memref<128x128xbf16, #tpu.memory_space<vmem>>, %arg2: memref<128x128xbf16, #tpu.memory_space<vmem>>, %arg3: memref<1x128xf32, #tpu.memory_space<vmem>>, %arg4: memref<128x128xbf16, #tpu.memory_space<vmem>>, %arg5: memref<128x128xbf16, #tpu.memory_space<vmem>>, %arg6: memref<1x128xf32, #tpu.memory_space<vmem>>, %arg7: memref<128x128xbf16, #tpu.memory_space<vmem>>, %arg8: memref<1x128xf32, #tpu.memory_space<vmem>>, %arg9: memref<128x128xbf16, #tpu.memory_space<vmem>>, %arg10: memref<128x128xbf16, #tpu.memory_space<vmem>>, %arg11: memref<1x128xf32, #tpu.memory_space<vmem>>, %arg12: memref<128x128xbf16, #tpu.memory_space<vmem>>, %arg13: memref<128x128xbf16, #tpu.memory_space<vmem>>, %arg14: memref<1x128xf32, #tpu.memory_space<vmem>>, %arg15: memref<128x128xbf16, #tpu.memory_space<vmem>>, %arg16: memref<1x128xf32, #tpu.memory_space<vmem>>, %arg17: memref<8x8x128xf32, #tpu.memory_space<vmem>>, %arg18: memref<8x8x128xf32, #tpu.memory_space<vmem>>) attributes {dimension_semantics = [], scalar_prefetch = 0 : i64, scratch_operands = 1 : i64, tpu.core_type = #tpu.core_type<tc>} {
    %c0 = arith.constant 0 : index
    %c0_0 = arith.constant 0 : index
    %c0_1 = arith.constant 0 : index
    %0 = vector.load %arg0[%c0, %c0_0, %c0_1] : memref<8x8x128xf32, #tpu.memory_space<vmem>>, vector<8x8x128xf32>
    %1 = vector.shape_cast %0 : vector<8x8x128xf32> to vector<64x128xf32>
    %2 = tpu.iota {dimensions = array<i32: 1>} : vector<8x128xi32>
    %c96_i32 = arith.constant 96 : i32
    %3 = vector.broadcast %c96_i32 : i32 to vector<8x128xi32>
    %4 = arith.cmpi slt, %2, %3 : vector<8x128xi32>
    %c0_2 = arith.constant 0 : index
    %c0_3 = arith.constant 0 : index
    %5 = vector.load %arg1[%c0_2, %c0_3] : memref<128x128xbf16, #tpu.memory_space<vmem>>, vector<128x128xbf16>
    %c0_4 = arith.constant 0 : index
    %c0_5 = arith.constant 0 : index
    %6 = vector.load %arg2[%c0_4, %c0_5] : memref<128x128xbf16, #tpu.memory_space<vmem>>, vector<128x128xbf16>
    %c0_6 = arith.constant 0 : index
    %c0_7 = arith.constant 0 : index
    %7 = vector.load %arg3[%c0_6, %c0_7] : memref<1x128xf32, #tpu.memory_space<vmem>>, vector<1x128xf32>
    %8 = arith.truncf %1 : vector<64x128xf32> to vector<64x128xbf16>
    %cst = arith.constant dense<0.000000e+00> : vector<64x128xf32>
    %9 = tpu.matmul %8, %5, %cst {dimension_numbers = #tpu.dot_dimension_numbers<[1], [0], [0], [1], [0, 0, 1, 1], [], []>} : vector<64x128xbf16>, vector<128x128xbf16>, vector<64x128xf32> -> vector<64x128xf32>
    %10 = vector.broadcast %7 : vector<1x128xf32> to vector<64x128xf32>
    %11 = arith.addf %9, %10 : vector<64x128xf32>
    %12 = vector.shape_cast %11 : vector<64x128xf32> to vector<8x8x128xf32>
    %c0_8 = arith.constant 0 : index
    %c0_9 = arith.constant 0 : index
    %c0_10 = arith.constant 0 : index
    %13 = vector.load %arg18[%c0_8, %c0_9, %c0_10] : memref<8x8x128xf32, #tpu.memory_space<vmem>>, vector<8x8x128xf32>
    tpu.vector_store %arg18[%c0_8, %c0_9, %c0_10], %12 {strides = array<i32>} : memref<8x8x128xf32, #tpu.memory_space<vmem>>, vector<8x8x128xf32>,
    %cst_11 = arith.constant 0.000000e+00 : f32
    %14 = vector.broadcast %cst_11 : f32 to vector<8x128xf32>
    %cst_12 = arith.constant 0.000000e+00 : f32
    %15 = vector.broadcast %cst_12 : f32 to vector<8x128xf32>
    %c0_13 = arith.constant 0 : index
    %c0_14 = arith.constant 0 : index
    %c0_15 = arith.constant 0 : index
    %16 = vector.load %arg18[%c0_13, %c0_14, %c0_15] : memref<8x8x128xf32, #tpu.memory_space<vmem>>, vector<1x8x128xf32>
    %17 = vector.shape_cast %16 : vector<1x8x128xf32> to vector<8x128xf32>
    %18 = arith.truncf %14 : vector<8x128xf32> to vector<8x128xbf16>
    %cst_16 = arith.constant dense<0.000000e+00> : vector<8x128xf32>
    %19 = tpu.matmul %18, %6, %cst_16 {dimension_numbers = #tpu.dot_dimension_numbers<[1], [0], [0], [1], [0, 0, 1, 1], [], []>} : vector<8x128xbf16>, vector<128x128xbf16>, vector<8x128xf32> -> vector<8x128xf32>
    %20 = arith.addf %17, %19 : vector<8x128xf32>
    %21 = arith.negf %20 : vector<8x128xf32>
    %22 = math.exp %21 : vector<8x128xf32>
    %cst_17 = arith.constant 1.000000e+00 : f32
    %23 = vector.broadcast %cst_17 : f32 to vector<8x128xf32>
    %24 = arith.addf %23, %22 : vector<8x128xf32>
    %25 = arith.divf %23, %24 : vector<8x128xf32>
    %26 = math.tanh %20 : vector<8x128xf32>
    %27 = arith.select %4, %25, %26 : vector<8x128xi1>, vector<8x128xf32>
    %c96_i32_18 = arith.constant 96 : i32
    %28 = tpu.dynamic_rotate %27 by %c96_i32_18 dim 1 : vector<8x128xf32>, i32 -> vector<8x128xf32>
    %c64_i32 = arith.constant 64 : i32
    %29 = tpu.dynamic_rotate %27 by %c64_i32 dim 1 : vector<8x128xf32>, i32 -> vector<8x128xf32>
    %c32_i32 = arith.constant 32 : i32
    %30 = tpu.dynamic_rotate %27 by %c32_i32 dim 1 : vector<8x128xf32>, i32 -> vector<8x128xf32>
    %31 = arith.mulf %28, %15 : vector<8x128xf32>
    %32 = arith.mulf %27, %30 : vector<8x128xf32>
    %33 = arith.addf %31, %32 : vector<8x128xf32>
    %34 = math.tanh %33 : vector<8x128xf32>
    %35 = arith.mulf %29, %34 : vector<8x128xf32>
    %c1 = arith.constant 1 : index
    %c0_19 = arith.constant 0 : index
    %c0_20 = arith.constant 0 : index
    %36 = vector.load %arg18[%c1, %c0_19, %c0_20] : memref<8x8x128xf32, #tpu.memory_space<vmem>>, vector<1x8x128xf32>
    %37 = vector.shape_cast %36 : vector<1x8x128xf32> to vector<8x128xf32>
    %38 = arith.truncf %35 : vector<8x128xf32> to vector<8x128xbf16>
    %cst_21 = arith.constant dense<0.000000e+00> : vector<8x128xf32>
    %39 = tpu.matmul %38, %6, %cst_21 {dimension_numbers = #tpu.dot_dimension_numbers<[1], [0], [0], [1], [0, 0, 1, 1], [], []>} : vector<8x128xbf16>, vector<128x128xbf16>, vector<8x128xf32> -> vector<8x128xf32>
    %40 = arith.addf %37, %39 : vector<8x128xf32>
    %41 = arith.negf %40 : vector<8x128xf32>
    %42 = math.exp %41 : vector<8x128xf32>
    %cst_22 = arith.constant 1.000000e+00 : f32
    %43 = vector.broadcast %cst_22 : f32 to vector<8x128xf32>
    %44 = arith.addf %43, %42 : vector<8x128xf32>
    %45 = arith.divf %43, %44 : vector<8x128xf32>
    %46 = math.tanh %40 : vector<8x128xf32>
    %47 = arith.select %4, %45, %46 : vector<8x128xi1>, vector<8x128xf32>
    %c96_i32_23 = arith.constant 96 : i32
    %48 = tpu.dynamic_rotate %47 by %c96_i32_23 dim 1 : vector<8x128xf32>, i32 -> vector<8x128xf32>
    %c64_i32_24 = arith.constant 64 : i32
    %49 = tpu.dynamic_rotate %47 by %c64_i32_24 dim 1 : vector<8x128xf32>, i32 -> vector<8x128xf32>
    %c32_i32_25 = arith.constant 32 : i32
    %50 = tpu.dynamic_rotate %47 by %c32_i32_25 dim 1 : vector<8x128xf32>, i32 -> vector<8x128xf32>
    %51 = arith.mulf %48, %33 : vector<8x128xf32>
    %52 = arith.mulf %47, %50 : vector<8x128xf32>
    %53 = arith.addf %51, %52 : vector<8x128xf32>
    %54 = math.tanh %53 : vector<8x128xf32>
    %55 = arith.mulf %49, %54 : vector<8x128xf32>
    %c2 = arith.constant 2 : index
    %c0_26 = arith.constant 0 : index
    %c0_27 = arith.constant 0 : index
    %56 = vector.load %arg18[%c2, %c0_26, %c0_27] : memref<8x8x128xf32, #tpu.memory_space<vmem>>, vector<1x8x128xf32>
    %57 = vector.shape_cast %56 : vector<1x8x128xf32> to vector<8x128xf32>
    %58 = arith.truncf %55 : vector<8x128xf32> to vector<8x128xbf16>
    %cst_28 = arith.constant dense<0.000000e+00> : vector<8x128xf32>
    %59 = tpu.matmul %58, %6, %cst_28 {dimension_numbers = #tpu.dot_dimension_numbers<[1], [0], [0], [1], [0, 0, 1, 1], [], []>} : vector<8x128xbf16>, vector<128x128xbf16>, vector<8x128xf32> -> vector<8x128xf32>
    %60 = arith.addf %57, %59 : vector<8x128xf32>
    %61 = arith.negf %60 : vector<8x128xf32>
    %62 = math.exp %61 : vector<8x128xf32>
    %cst_29 = arith.constant 1.000000e+00 : f32
    %63 = vector.broadcast %cst_29 : f32 to vector<8x128xf32>
    %64 = arith.addf %63, %62 : vector<8x128xf32>
    %65 = arith.divf %63, %64 : vector<8x128xf32>
    %66 = math.tanh %60 : vector<8x128xf32>
    %67 = arith.select %4, %65, %66 : vector<8x128xi1>, vector<8x128xf32>
    %c96_i32_30 = arith.constant 96 : i32
    %68 = tpu.dynamic_rotate %67 by %c96_i32_30 dim 1 : vector<8x128xf32>, i32 -> vector<8x128xf32>
    %c64_i32_31 = arith.constant 64 : i32
    %69 = tpu.dynamic_rotate %67 by %c64_i32_31 dim 1 : vector<8x128xf32>, i32 -> vector<8x128xf32>
    %c32_i32_32 = arith.constant 32 : i32
    %70 = tpu.dynamic_rotate %67 by %c32_i32_32 dim 1 : vector<8x128xf32>, i32 -> vector<8x128xf32>
    %71 = arith.mulf %68, %53 : vector<8x128xf32>
    %72 = arith.mulf %67, %70 : vector<8x128xf32>
    %73 = arith.addf %71, %72 : vector<8x128xf32>
    %74 = math.tanh %73 : vector<8x128xf32>
    %75 = arith.mulf %69, %74 : vector<8x128xf32>
    %c3 = arith.constant 3 : index
    %c0_33 = arith.constant 0 : index
    %c0_34 = arith.constant 0 : index
    %76 = vector.load %arg18[%c3, %c0_33, %c0_34] : memref<8x8x128xf32, #tpu.memory_space<vmem>>, vector<1x8x128xf32>
    %77 = vector.shape_cast %76 : vector<1x8x128xf32> to vector<8x128xf32>
    %78 = arith.truncf %75 : vector<8x128xf32> to vector<8x128xbf16>
    %cst_35 = arith.constant dense<0.000000e+00> : vector<8x128xf32>
    %79 = tpu.matmul %78, %6, %cst_35 {dimension_numbers = #tpu.dot_dimension_numbers<[1], [0], [0], [1], [0, 0, 1, 1], [], []>} : vector<8x128xbf16>, vector<128x128xbf16>, vector<8x128xf32> -> vector<8x128xf32>
    %80 = arith.addf %77, %79 : vector<8x128xf32>
    %81 = arith.negf %80 : vector<8x128xf32>
    %82 = math.exp %81 : vector<8x128xf32>
    %cst_36 = arith.constant 1.000000e+00 : f32
    %83 = vector.broadcast %cst_36 : f32 to vector<8x128xf32>
    %84 = arith.addf %83, %82 : vector<8x128xf32>
    %85 = arith.divf %83, %84 : vector<8x128xf32>
    %86 = math.tanh %80 : vector<8x128xf32>
    %87 = arith.select %4, %85, %86 : vector<8x128xi1>, vector<8x128xf32>
    %c96_i32_37 = arith.constant 96 : i32
    %88 = tpu.dynamic_rotate %87 by %c96_i32_37 dim 1 : vector<8x128xf32>, i32 -> vector<8x128xf32>
    %c64_i32_38 = arith.constant 64 : i32
    %89 = tpu.dynamic_rotate %87 by %c64_i32_38 dim 1 : vector<8x128xf32>, i32 -> vector<8x128xf32>
    %c32_i32_39 = arith.constant 32 : i32
    %90 = tpu.dynamic_rotate %87 by %c32_i32_39 dim 1 : vector<8x128xf32>, i32 -> vector<8x128xf32>
    %91 = arith.mulf %88, %73 : vector<8x128xf32>
    %92 = arith.mulf %87, %90 : vector<8x128xf32>
    %93 = arith.addf %91, %92 : vector<8x128xf32>
    %94 = math.tanh %93 : vector<8x128xf32>
    %95 = arith.mulf %89, %94 : vector<8x128xf32>
    %c4 = arith.constant 4 : index
    %c0_40 = arith.constant 0 : index
    %c0_41 = arith.constant 0 : index
    %96 = vector.load %arg18[%c4, %c0_40, %c0_41] : memref<8x8x128xf32, #tpu.memory_space<vmem>>, vector<1x8x128xf32>
    %97 = vector.shape_cast %96 : vector<1x8x128xf32> to vector<8x128xf32>
    %98 = arith.truncf %95 : vector<8x128xf32> to vector<8x128xbf16>
    %cst_42 = arith.constant dense<0.000000e+00> : vector<8x128xf32>
    %99 = tpu.matmul %98, %6, %cst_42 {dimension_numbers = #tpu.dot_dimension_numbers<[1], [0], [0], [1], [0, 0, 1, 1], [], []>} : vector<8x128xbf16>, vector<128x128xbf16>, vector<8x128xf32> -> vector<8x128xf32>
    %100 = arith.addf %97, %99 : vector<8x128xf32>
    %101 = arith.negf %100 : vector<8x128xf32>
    %102 = math.exp %101 : vector<8x128xf32>
    %cst_43 = arith.constant 1.000000e+00 : f32
    %103 = vector.broadcast %cst_43 : f32 to vector<8x128xf32>
    %104 = arith.addf %103, %102 : vector<8x128xf32>
    %105 = arith.divf %103, %104 : vector<8x128xf32>
    %106 = math.tanh %100 : vector<8x128xf32>
    %107 = arith.select %4, %105, %106 : vector<8x128xi1>, vector<8x128xf32>
    %c96_i32_44 = arith.constant 96 : i32
    %108 = tpu.dynamic_rotate %107 by %c96_i32_44 dim 1 : vector<8x128xf32>, i32 -> vector<8x128xf32>
    %c64_i32_45 = arith.constant 64 : i32
    %109 = tpu.dynamic_rotate %107 by %c64_i32_45 dim 1 : vector<8x128xf32>, i32 -> vector<8x128xf32>
    %c32_i32_46 = arith.constant 32 : i32
    %110 = tpu.dynamic_rotate %107 by %c32_i32_46 dim 1 : vector<8x128xf32>, i32 -> vector<8x128xf32>
    %111 = arith.mulf %108, %93 : vector<8x128xf32>
    %112 = arith.mulf %107, %110 : vector<8x128xf32>
    %113 = arith.addf %111, %112 : vector<8x128xf32>
    %114 = math.tanh %113 : vector<8x128xf32>
    %115 = arith.mulf %109, %114 : vector<8x128xf32>
    %c5 = arith.constant 5 : index
    %c0_47 = arith.constant 0 : index
    %c0_48 = arith.constant 0 : index
    %116 = vector.load %arg18[%c5, %c0_47, %c0_48] : memref<8x8x128xf32, #tpu.memory_space<vmem>>, vector<1x8x128xf32>
    %117 = vector.shape_cast %116 : vector<1x8x128xf32> to vector<8x128xf32>
    %118 = arith.truncf %115 : vector<8x128xf32> to vector<8x128xbf16>
    %cst_49 = arith.constant dense<0.000000e+00> : vector<8x128xf32>
    %119 = tpu.matmul %118, %6, %cst_49 {dimension_numbers = #tpu.dot_dimension_numbers<[1], [0], [0], [1], [0, 0, 1, 1], [], []>} : vector<8x128xbf16>, vector<128x128xbf16>, vector<8x128xf32> -> vector<8x128xf32>
    %120 = arith.addf %117, %119 : vector<8x128xf32>
    %121 = arith.negf %120 : vector<8x128xf32>
    %122 = math.exp %121 : vector<8x128xf32>
    %cst_50 = arith.constant 1.000000e+00 : f32
    %123 = vector.broadcast %cst_50 : f32 to vector<8x128xf32>
    %124 = arith.addf %123, %122 : vector<8x128xf32>
    %125 = arith.divf %123, %124 : vector<8x128xf32>
    %126 = math.tanh %120 : vector<8x128xf32>
    %127 = arith.select %4, %125, %126 : vector<8x128xi1>, vector<8x128xf32>
    %c96_i32_51 = arith.constant 96 : i32
    %128 = tpu.dynamic_rotate %127 by %c96_i32_51 dim 1 : vector<8x128xf32>, i32 -> vector<8x128xf32>
    %c64_i32_52 = arith.constant 64 : i32
    %129 = tpu.dynamic_rotate %127 by %c64_i32_52 dim 1 : vector<8x128xf32>, i32 -> vector<8x128xf32>
    %c32_i32_53 = arith.constant 32 : i32
    %130 = tpu.dynamic_rotate %127 by %c32_i32_53 dim 1 : vector<8x128xf32>, i32 -> vector<8x128xf32>
    %131 = arith.mulf %128, %113 : vector<8x128xf32>
    %132 = arith.mulf %127, %130 : vector<8x128xf32>
    %133 = arith.addf %131, %132 : vector<8x128xf32>
    %134 = math.tanh %133 : vector<8x128xf32>
    %135 = arith.mulf %129, %134 : vector<8x128xf32>
    %c6 = arith.constant 6 : index
    %c0_54 = arith.constant 0 : index
    %c0_55 = arith.constant 0 : index
    %136 = vector.load %arg18[%c6, %c0_54, %c0_55] : memref<8x8x128xf32, #tpu.memory_space<vmem>>, vector<1x8x128xf32>
    %137 = vector.shape_cast %136 : vector<1x8x128xf32> to vector<8x128xf32>
    %138 = arith.truncf %135 : vector<8x128xf32> to vector<8x128xbf16>
    %cst_56 = arith.constant dense<0.000000e+00> : vector<8x128xf32>
    %139 = tpu.matmul %138, %6, %cst_56 {dimension_numbers = #tpu.dot_dimension_numbers<[1], [0], [0], [1], [0, 0, 1, 1], [], []>} : vector<8x128xbf16>, vector<128x128xbf16>, vector<8x128xf32> -> vector<8x128xf32>
    %140 = arith.addf %137, %139 : vector<8x128xf32>
    %141 = arith.negf %140 : vector<8x128xf32>
    %142 = math.exp %141 : vector<8x128xf32>
    %cst_57 = arith.constant 1.000000e+00 : f32
    %143 = vector.broadcast %cst_57 : f32 to vector<8x128xf32>
    %144 = arith.addf %143, %142 : vector<8x128xf32>
    %145 = arith.divf %143, %144 : vector<8x128xf32>
    %146 = math.tanh %140 : vector<8x128xf32>
    %147 = arith.select %4, %145, %146 : vector<8x128xi1>, vector<8x128xf32>
    %c96_i32_58 = arith.constant 96 : i32
    %148 = tpu.dynamic_rotate %147 by %c96_i32_58 dim 1 : vector<8x128xf32>, i32 -> vector<8x128xf32>
    %c64_i32_59 = arith.constant 64 : i32
    %149 = tpu.dynamic_rotate %147 by %c64_i32_59 dim 1 : vector<8x128xf32>, i32 -> vector<8x128xf32>
    %c32_i32_60 = arith.constant 32 : i32
    %150 = tpu.dynamic_rotate %147 by %c32_i32_60 dim 1 : vector<8x128xf32>, i32 -> vector<8x128xf32>
    %151 = arith.mulf %148, %133 : vector<8x128xf32>
    %152 = arith.mulf %147, %150 : vector<8x128xf32>
    %153 = arith.addf %151, %152 : vector<8x128xf32>
    %154 = math.tanh %153 : vector<8x128xf32>
    %155 = arith.mulf %149, %154 : vector<8x128xf32>
    %c7 = arith.constant 7 : index
    %c0_61 = arith.constant 0 : index
    %c0_62 = arith.constant 0 : index
    %156 = vector.load %arg18[%c7, %c0_61, %c0_62] : memref<8x8x128xf32, #tpu.memory_space<vmem>>, vector<1x8x128xf32>
    %157 = vector.shape_cast %156 : vector<1x8x128xf32> to vector<8x128xf32>
    %158 = arith.truncf %155 : vector<8x128xf32> to vector<8x128xbf16>
    %cst_63 = arith.constant dense<0.000000e+00> : vector<8x128xf32>
    %159 = tpu.matmul %158, %6, %cst_63 {dimension_numbers = #tpu.dot_dimension_numbers<[1], [0], [0], [1], [0, 0, 1, 1], [], []>} : vector<8x128xbf16>, vector<128x128xbf16>, vector<8x128xf32> -> vector<8x128xf32>
    %160 = arith.addf %157, %159 : vector<8x128xf32>
    %161 = arith.negf %160 : vector<8x128xf32>
    %162 = math.exp %161 : vector<8x128xf32>
    %cst_64 = arith.constant 1.000000e+00 : f32
    %163 = vector.broadcast %cst_64 : f32 to vector<8x128xf32>
    %164 = arith.addf %163, %162 : vector<8x128xf32>
    %165 = arith.divf %163, %164 : vector<8x128xf32>
    %166 = math.tanh %160 : vector<8x128xf32>
    %167 = arith.select %4, %165, %166 : vector<8x128xi1>, vector<8x128xf32>
    %c96_i32_65 = arith.constant 96 : i32
    %168 = tpu.dynamic_rotate %167 by %c96_i32_65 dim 1 : vector<8x128xf32>, i32 -> vector<8x128xf32>
    %c64_i32_66 = arith.constant 64 : i32
    %169 = tpu.dynamic_rotate %167 by %c64_i32_66 dim 1 : vector<8x128xf32>, i32 -> vector<8x128xf32>
    %c32_i32_67 = arith.constant 32 : i32
    %170 = tpu.dynamic_rotate %167 by %c32_i32_67 dim 1 : vector<8x128xf32>, i32 -> vector<8x128xf32>
    %171 = arith.mulf %168, %153 : vector<8x128xf32>
    %172 = arith.mulf %167, %170 : vector<8x128xf32>
    %173 = arith.addf %171, %172 : vector<8x128xf32>
    %174 = math.tanh %173 : vector<8x128xf32>
    %175 = arith.mulf %169, %174 : vector<8x128xf32>
    %176 = tpu.concatenate %35, %55, %75, %95, %115, %135, %155, %175 in 0 : vector<8x128xf32>, vector<8x128xf32>, vector<8x128xf32>, vector<8x128xf32>, vector<8x128xf32>, vector<8x128xf32>, vector<8x128xf32>, vector<8x128xf32> -> vector<64x128xf32>
    %c0_68 = arith.constant 0 : index
    %c0_69 = arith.constant 0 : index
    %177 = vector.load %arg4[%c0_68, %c0_69] : memref<128x128xbf16, #tpu.memory_space<vmem>>, vector<128x128xbf16>
    %c0_70 = arith.constant 0 : index
    %c0_71 = arith.constant 0 : index
    %178 = vector.load %arg5[%c0_70, %c0_71] : memref<128x128xbf16, #tpu.memory_space<vmem>>, vector<128x128xbf16>
    %c0_72 = arith.constant 0 : index
    %c0_73 = arith.constant 0 : index
    %179 = vector.load %arg6[%c0_72, %c0_73] : memref<1x128xf32, #tpu.memory_space<vmem>>, vector<1x128xf32>
    %180 = arith.truncf %176 : vector<64x128xf32> to vector<64x128xbf16>
    %cst_74 = arith.constant dense<0.000000e+00> : vector<64x128xf32>
    %181 = tpu.matmul %180, %177, %cst_74 {dimension_numbers = #tpu.dot_dimension_numbers<[1], [0], [0], [1], [0, 0, 1, 1], [], []>} : vector<64x128xbf16>, vector<128x128xbf16>, vector<64x128xf32> -> vector<64x128xf32>
    %182 = vector.broadcast %179 : vector<1x128xf32> to vector<64x128xf32>
    %183 = arith.addf %181, %182 : vector<64x128xf32>
    %184 = vector.shape_cast %183 : vector<64x128xf32> to vector<8x8x128xf32>
    %c0_75 = arith.constant 0 : index
    %c0_76 = arith.constant 0 : index
    %c0_77 = arith.constant 0 : index
    %185 = vector.load %arg18[%c0_75, %c0_76, %c0_77] : memref<8x8x128xf32, #tpu.memory_space<vmem>>, vector<8x8x128xf32>
    tpu.vector_store %arg18[%c0_75, %c0_76, %c0_77], %184 {strides = array<i32>} : memref<8x8x128xf32, #tpu.memory_space<vmem>>, vector<8x8x128xf32>,
    %cst_78 = arith.constant 0.000000e+00 : f32
    %186 = vector.broadcast %cst_78 : f32 to vector<8x128xf32>
    %cst_79 = arith.constant 0.000000e+00 : f32
    %187 = vector.broadcast %cst_79 : f32 to vector<8x128xf32>
    %c0_80 = arith.constant 0 : index
    %c0_81 = arith.constant 0 : index
    %c0_82 = arith.constant 0 : index
    %188 = vector.load %arg18[%c0_80, %c0_81, %c0_82] : memref<8x8x128xf32, #tpu.memory_space<vmem>>, vector<1x8x128xf32>
    %189 = vector.shape_cast %188 : vector<1x8x128xf32> to vector<8x128xf32>
    %190 = arith.truncf %186 : vector<8x128xf32> to vector<8x128xbf16>
    %cst_83 = arith.constant dense<0.000000e+00> : vector<8x128xf32>
    %191 = tpu.matmul %190, %178, %cst_83 {dimension_numbers = #tpu.dot_dimension_numbers<[1], [0], [0], [1], [0, 0, 1, 1], [], []>} : vector<8x128xbf16>, vector<128x128xbf16>, vector<8x128xf32> -> vector<8x128xf32>
    %192 = arith.addf %189, %191 : vector<8x128xf32>
    %193 = arith.negf %192 : vector<8x128xf32>
    %194 = math.exp %193 : vector<8x128xf32>
    %cst_84 = arith.constant 1.000000e+00 : f32
    %195 = vector.broadcast %cst_84 : f32 to vector<8x128xf32>
    %196 = arith.addf %195, %194 : vector<8x128xf32>
    %197 = arith.divf %195, %196 : vector<8x128xf32>
    %198 = math.tanh %192 : vector<8x128xf32>
    %199 = arith.select %4, %197, %198 : vector<8x128xi1>, vector<8x128xf32>
    %c96_i32_85 = arith.constant 96 : i32
    %200 = tpu.dynamic_rotate %199 by %c96_i32_85 dim 1 : vector<8x128xf32>, i32 -> vector<8x128xf32>
    %c64_i32_86 = arith.constant 64 : i32
    %201 = tpu.dynamic_rotate %199 by %c64_i32_86 dim 1 : vector<8x128xf32>, i32 -> vector<8x128xf32>
    %c32_i32_87 = arith.constant 32 : i32
    %202 = tpu.dynamic_rotate %199 by %c32_i32_87 dim 1 : vector<8x128xf32>, i32 -> vector<8x128xf32>
    %203 = arith.mulf %200, %187 : vector<8x128xf32>
    %204 = arith.mulf %199, %202 : vector<8x128xf32>
    %205 = arith.addf %203, %204 : vector<8x128xf32>
    %206 = math.tanh %205 : vector<8x128xf32>
    %207 = arith.mulf %201, %206 : vector<8x128xf32>
    %c1_88 = arith.constant 1 : index
    %c0_89 = arith.constant 0 : index
    %c0_90 = arith.constant 0 : index
    %208 = vector.load %arg18[%c1_88, %c0_89, %c0_90] : memref<8x8x128xf32, #tpu.memory_space<vmem>>, vector<1x8x128xf32>
    %209 = vector.shape_cast %208 : vector<1x8x128xf32> to vector<8x128xf32>
    %210 = arith.truncf %207 : vector<8x128xf32> to vector<8x128xbf16>
    %cst_91 = arith.constant dense<0.000000e+00> : vector<8x128xf32>
    %211 = tpu.matmul %210, %178, %cst_91 {dimension_numbers = #tpu.dot_dimension_numbers<[1], [0], [0], [1], [0, 0, 1, 1], [], []>} : vector<8x128xbf16>, vector<128x128xbf16>, vector<8x128xf32> -> vector<8x128xf32>
    %212 = arith.addf %209, %211 : vector<8x128xf32>
    %213 = arith.negf %212 : vector<8x128xf32>
    %214 = math.exp %213 : vector<8x128xf32>
    %cst_92 = arith.constant 1.000000e+00 : f32
    %215 = vector.broadcast %cst_92 : f32 to vector<8x128xf32>
    %216 = arith.addf %215, %214 : vector<8x128xf32>
    %217 = arith.divf %215, %216 : vector<8x128xf32>
    %218 = math.tanh %212 : vector<8x128xf32>
    %219 = arith.select %4, %217, %218 : vector<8x128xi1>, vector<8x128xf32>
    %c96_i32_93 = arith.constant 96 : i32
    %220 = tpu.dynamic_rotate %219 by %c96_i32_93 dim 1 : vector<8x128xf32>, i32 -> vector<8x128xf32>
    %c64_i32_94 = arith.constant 64 : i32
    %221 = tpu.dynamic_rotate %219 by %c64_i32_94 dim 1 : vector<8x128xf32>, i32 -> vector<8x128xf32>
    %c32_i32_95 = arith.constant 32 : i32
    %222 = tpu.dynamic_rotate %219 by %c32_i32_95 dim 1 : vector<8x128xf32>, i32 -> vector<8x128xf32>
    %223 = arith.mulf %220, %205 : vector<8x128xf32>
    %224 = arith.mulf %219, %222 : vector<8x128xf32>
    %225 = arith.addf %223, %224 : vector<8x128xf32>
    %226 = math.tanh %225 : vector<8x128xf32>
    %227 = arith.mulf %221, %226 : vector<8x128xf32>
    %c2_96 = arith.constant 2 : index
    %c0_97 = arith.constant 0 : index
    %c0_98 = arith.constant 0 : index
    %228 = vector.load %arg18[%c2_96, %c0_97, %c0_98] : memref<8x8x128xf32, #tpu.memory_space<vmem>>, vector<1x8x128xf32>
    %229 = vector.shape_cast %228 : vector<1x8x128xf32> to vector<8x128xf32>
    %230 = arith.truncf %227 : vector<8x128xf32> to vector<8x128xbf16>
    %cst_99 = arith.constant dense<0.000000e+00> : vector<8x128xf32>
    %231 = tpu.matmul %230, %178, %cst_99 {dimension_numbers = #tpu.dot_dimension_numbers<[1], [0], [0], [1], [0, 0, 1, 1], [], []>} : vector<8x128xbf16>, vector<128x128xbf16>, vector<8x128xf32> -> vector<8x128xf32>
    %232 = arith.addf %229, %231 : vector<8x128xf32>
    %233 = arith.negf %232 : vector<8x128xf32>
    %234 = math.exp %233 : vector<8x128xf32>
    %cst_100 = arith.constant 1.000000e+00 : f32
    %235 = vector.broadcast %cst_100 : f32 to vector<8x128xf32>
    %236 = arith.addf %235, %234 : vector<8x128xf32>
    %237 = arith.divf %235, %236 : vector<8x128xf32>
    %238 = math.tanh %232 : vector<8x128xf32>
    %239 = arith.select %4, %237, %238 : vector<8x128xi1>, vector<8x128xf32>
    %c96_i32_101 = arith.constant 96 : i32
    %240 = tpu.dynamic_rotate %239 by %c96_i32_101 dim 1 : vector<8x128xf32>, i32 -> vector<8x128xf32>
    %c64_i32_102 = arith.constant 64 : i32
    %241 = tpu.dynamic_rotate %239 by %c64_i32_102 dim 1 : vector<8x128xf32>, i32 -> vector<8x128xf32>
    %c32_i32_103 = arith.constant 32 : i32
    %242 = tpu.dynamic_rotate %239 by %c32_i32_103 dim 1 : vector<8x128xf32>, i32 -> vector<8x128xf32>
    %243 = arith.mulf %240, %225 : vector<8x128xf32>
    %244 = arith.mulf %239, %242 : vector<8x128xf32>
    %245 = arith.addf %243, %244 : vector<8x128xf32>
    %246 = math.tanh %245 : vector<8x128xf32>
    %247 = arith.mulf %241, %246 : vector<8x128xf32>
    %c3_104 = arith.constant 3 : index
    %c0_105 = arith.constant 0 : index
    %c0_106 = arith.constant 0 : index
    %248 = vector.load %arg18[%c3_104, %c0_105, %c0_106] : memref<8x8x128xf32, #tpu.memory_space<vmem>>, vector<1x8x128xf32>
    %249 = vector.shape_cast %248 : vector<1x8x128xf32> to vector<8x128xf32>
    %250 = arith.truncf %247 : vector<8x128xf32> to vector<8x128xbf16>
    %cst_107 = arith.constant dense<0.000000e+00> : vector<8x128xf32>
    %251 = tpu.matmul %250, %178, %cst_107 {dimension_numbers = #tpu.dot_dimension_numbers<[1], [0], [0], [1], [0, 0, 1, 1], [], []>} : vector<8x128xbf16>, vector<128x128xbf16>, vector<8x128xf32> -> vector<8x128xf32>
    %252 = arith.addf %249, %251 : vector<8x128xf32>
    %253 = arith.negf %252 : vector<8x128xf32>
    %254 = math.exp %253 : vector<8x128xf32>
    %cst_108 = arith.constant 1.000000e+00 : f32
    %255 = vector.broadcast %cst_108 : f32 to vector<8x128xf32>
    %256 = arith.addf %255, %254 : vector<8x128xf32>
    %257 = arith.divf %255, %256 : vector<8x128xf32>
    %258 = math.tanh %252 : vector<8x128xf32>
    %259 = arith.select %4, %257, %258 : vector<8x128xi1>, vector<8x128xf32>
    %c96_i32_109 = arith.constant 96 : i32
    %260 = tpu.dynamic_rotate %259 by %c96_i32_109 dim 1 : vector<8x128xf32>, i32 -> vector<8x128xf32>
    %c64_i32_110 = arith.constant 64 : i32
    %261 = tpu.dynamic_rotate %259 by %c64_i32_110 dim 1 : vector<8x128xf32>, i32 -> vector<8x128xf32>
    %c32_i32_111 = arith.constant 32 : i32
    %262 = tpu.dynamic_rotate %259 by %c32_i32_111 dim 1 : vector<8x128xf32>, i32 -> vector<8x128xf32>
    %263 = arith.mulf %260, %245 : vector<8x128xf32>
    %264 = arith.mulf %259, %262 : vector<8x128xf32>
    %265 = arith.addf %263, %264 : vector<8x128xf32>
    %266 = math.tanh %265 : vector<8x128xf32>
    %267 = arith.mulf %261, %266 : vector<8x128xf32>
    %c4_112 = arith.constant 4 : index
    %c0_113 = arith.constant 0 : index
    %c0_114 = arith.constant 0 : index
    %268 = vector.load %arg18[%c4_112, %c0_113, %c0_114] : memref<8x8x128xf32, #tpu.memory_space<vmem>>, vector<1x8x128xf32>
    %269 = vector.shape_cast %268 : vector<1x8x128xf32> to vector<8x128xf32>
    %270 = arith.truncf %267 : vector<8x128xf32> to vector<8x128xbf16>
    %cst_115 = arith.constant dense<0.000000e+00> : vector<8x128xf32>
    %271 = tpu.matmul %270, %178, %cst_115 {dimension_numbers = #tpu.dot_dimension_numbers<[1], [0], [0], [1], [0, 0, 1, 1], [], []>} : vector<8x128xbf16>, vector<128x128xbf16>, vector<8x128xf32> -> vector<8x128xf32>
    %272 = arith.addf %269, %271 : vector<8x128xf32>
    %273 = arith.negf %272 : vector<8x128xf32>
    %274 = math.exp %273 : vector<8x128xf32>
    %cst_116 = arith.constant 1.000000e+00 : f32
    %275 = vector.broadcast %cst_116 : f32 to vector<8x128xf32>
    %276 = arith.addf %275, %274 : vector<8x128xf32>
    %277 = arith.divf %275, %276 : vector<8x128xf32>
    %278 = math.tanh %272 : vector<8x128xf32>
    %279 = arith.select %4, %277, %278 : vector<8x128xi1>, vector<8x128xf32>
    %c96_i32_117 = arith.constant 96 : i32
    %280 = tpu.dynamic_rotate %279 by %c96_i32_117 dim 1 : vector<8x128xf32>, i32 -> vector<8x128xf32>
    %c64_i32_118 = arith.constant 64 : i32
    %281 = tpu.dynamic_rotate %279 by %c64_i32_118 dim 1 : vector<8x128xf32>, i32 -> vector<8x128xf32>
    %c32_i32_119 = arith.constant 32 : i32
    %282 = tpu.dynamic_rotate %279 by %c32_i32_119 dim 1 : vector<8x128xf32>, i32 -> vector<8x128xf32>
    %283 = arith.mulf %280, %265 : vector<8x128xf32>
    %284 = arith.mulf %279, %282 : vector<8x128xf32>
    %285 = arith.addf %283, %284 : vector<8x128xf32>
    %286 = math.tanh %285 : vector<8x128xf32>
    %287 = arith.mulf %281, %286 : vector<8x128xf32>
    %c5_120 = arith.constant 5 : index
    %c0_121 = arith.constant 0 : index
    %c0_122 = arith.constant 0 : index
    %288 = vector.load %arg18[%c5_120, %c0_121, %c0_122] : memref<8x8x128xf32, #tpu.memory_space<vmem>>, vector<1x8x128xf32>
    %289 = vector.shape_cast %288 : vector<1x8x128xf32> to vector<8x128xf32>
    %290 = arith.truncf %287 : vector<8x128xf32> to vector<8x128xbf16>
    %cst_123 = arith.constant dense<0.000000e+00> : vector<8x128xf32>
    %291 = tpu.matmul %290, %178, %cst_123 {dimension_numbers = #tpu.dot_dimension_numbers<[1], [0], [0], [1], [0, 0, 1, 1], [], []>} : vector<8x128xbf16>, vector<128x128xbf16>, vector<8x128xf32> -> vector<8x128xf32>
    %292 = arith.addf %289, %291 : vector<8x128xf32>
    %293 = arith.negf %292 : vector<8x128xf32>
    %294 = math.exp %293 : vector<8x128xf32>
    %cst_124 = arith.constant 1.000000e+00 : f32
    %295 = vector.broadcast %cst_124 : f32 to vector<8x128xf32>
    %296 = arith.addf %295, %294 : vector<8x128xf32>
    %297 = arith.divf %295, %296 : vector<8x128xf32>
    %298 = math.tanh %292 : vector<8x128xf32>
    %299 = arith.select %4, %297, %298 : vector<8x128xi1>, vector<8x128xf32>
    %c96_i32_125 = arith.constant 96 : i32
    %300 = tpu.dynamic_rotate %299 by %c96_i32_125 dim 1 : vector<8x128xf32>, i32 -> vector<8x128xf32>
    %c64_i32_126 = arith.constant 64 : i32
    %301 = tpu.dynamic_rotate %299 by %c64_i32_126 dim 1 : vector<8x128xf32>, i32 -> vector<8x128xf32>
    %c32_i32_127 = arith.constant 32 : i32
    %302 = tpu.dynamic_rotate %299 by %c32_i32_127 dim 1 : vector<8x128xf32>, i32 -> vector<8x128xf32>
    %303 = arith.mulf %300, %285 : vector<8x128xf32>
    %304 = arith.mulf %299, %302 : vector<8x128xf32>
    %305 = arith.addf %303, %304 : vector<8x128xf32>
    %306 = math.tanh %305 : vector<8x128xf32>
    %307 = arith.mulf %301, %306 : vector<8x128xf32>
    %c6_128 = arith.constant 6 : index
    %c0_129 = arith.constant 0 : index
    %c0_130 = arith.constant 0 : index
    %308 = vector.load %arg18[%c6_128, %c0_129, %c0_130] : memref<8x8x128xf32, #tpu.memory_space<vmem>>, vector<1x8x128xf32>
    %309 = vector.shape_cast %308 : vector<1x8x128xf32> to vector<8x128xf32>
    %310 = arith.truncf %307 : vector<8x128xf32> to vector<8x128xbf16>
    %cst_131 = arith.constant dense<0.000000e+00> : vector<8x128xf32>
    %311 = tpu.matmul %310, %178, %cst_131 {dimension_numbers = #tpu.dot_dimension_numbers<[1], [0], [0], [1], [0, 0, 1, 1], [], []>} : vector<8x128xbf16>, vector<128x128xbf16>, vector<8x128xf32> -> vector<8x128xf32>
    %312 = arith.addf %309, %311 : vector<8x128xf32>
    %313 = arith.negf %312 : vector<8x128xf32>
    %314 = math.exp %313 : vector<8x128xf32>
    %cst_132 = arith.constant 1.000000e+00 : f32
    %315 = vector.broadcast %cst_132 : f32 to vector<8x128xf32>
    %316 = arith.addf %315, %314 : vector<8x128xf32>
    %317 = arith.divf %315, %316 : vector<8x128xf32>
    %318 = math.tanh %312 : vector<8x128xf32>
    %319 = arith.select %4, %317, %318 : vector<8x128xi1>, vector<8x128xf32>
    %c96_i32_133 = arith.constant 96 : i32
    %320 = tpu.dynamic_rotate %319 by %c96_i32_133 dim 1 : vector<8x128xf32>, i32 -> vector<8x128xf32>
    %c64_i32_134 = arith.constant 64 : i32
    %321 = tpu.dynamic_rotate %319 by %c64_i32_134 dim 1 : vector<8x128xf32>, i32 -> vector<8x128xf32>
    %c32_i32_135 = arith.constant 32 : i32
    %322 = tpu.dynamic_rotate %319 by %c32_i32_135 dim 1 : vector<8x128xf32>, i32 -> vector<8x128xf32>
    %323 = arith.mulf %320, %305 : vector<8x128xf32>
    %324 = arith.mulf %319, %322 : vector<8x128xf32>
    %325 = arith.addf %323, %324 : vector<8x128xf32>
    %326 = math.tanh %325 : vector<8x128xf32>
    %327 = arith.mulf %321, %326 : vector<8x128xf32>
    %c7_136 = arith.constant 7 : index
    %c0_137 = arith.constant 0 : index
    %c0_138 = arith.constant 0 : index
    %328 = vector.load %arg18[%c7_136, %c0_137, %c0_138] : memref<8x8x128xf32, #tpu.memory_space<vmem>>, vector<1x8x128xf32>
    %329 = vector.shape_cast %328 : vector<1x8x128xf32> to vector<8x128xf32>
    %330 = arith.truncf %327 : vector<8x128xf32> to vector<8x128xbf16>
    %cst_139 = arith.constant dense<0.000000e+00> : vector<8x128xf32>
    %331 = tpu.matmul %330, %178, %cst_139 {dimension_numbers = #tpu.dot_dimension_numbers<[1], [0], [0], [1], [0, 0, 1, 1], [], []>} : vector<8x128xbf16>, vector<128x128xbf16>, vector<8x128xf32> -> vector<8x128xf32>
    %332 = arith.addf %329, %331 : vector<8x128xf32>
    %333 = arith.negf %332 : vector<8x128xf32>
    %334 = math.exp %333 : vector<8x128xf32>
    %cst_140 = arith.constant 1.000000e+00 : f32
    %335 = vector.broadcast %cst_140 : f32 to vector<8x128xf32>
    %336 = arith.addf %335, %334 : vector<8x128xf32>
    %337 = arith.divf %335, %336 : vector<8x128xf32>
    %338 = math.tanh %332 : vector<8x128xf32>
    %339 = arith.select %4, %337, %338 : vector<8x128xi1>, vector<8x128xf32>
    %c96_i32_141 = arith.constant 96 : i32
    %340 = tpu.dynamic_rotate %339 by %c96_i32_141 dim 1 : vector<8x128xf32>, i32 -> vector<8x128xf32>
    %c64_i32_142 = arith.constant 64 : i32
    %341 = tpu.dynamic_rotate %339 by %c64_i32_142 dim 1 : vector<8x128xf32>, i32 -> vector<8x128xf32>
    %c32_i32_143 = arith.constant 32 : i32
    %342 = tpu.dynamic_rotate %339 by %c32_i32_143 dim 1 : vector<8x128xf32>, i32 -> vector<8x128xf32>
    %343 = arith.mulf %340, %325 : vector<8x128xf32>
    %344 = arith.mulf %339, %342 : vector<8x128xf32>
    %345 = arith.addf %343, %344 : vector<8x128xf32>
    %346 = math.tanh %345 : vector<8x128xf32>
    %347 = arith.mulf %341, %346 : vector<8x128xf32>
    %348 = tpu.concatenate %207, %227, %247, %267, %287, %307, %327, %347 in 0 : vector<8x128xf32>, vector<8x128xf32>, vector<8x128xf32>, vector<8x128xf32>, vector<8x128xf32>, vector<8x128xf32>, vector<8x128xf32>, vector<8x128xf32> -> vector<64x128xf32>
    %c0_144 = arith.constant 0 : index
    %c0_145 = arith.constant 0 : index
    %349 = vector.load %arg7[%c0_144, %c0_145] : memref<128x128xbf16, #tpu.memory_space<vmem>>, vector<128x128xbf16>
    %c0_146 = arith.constant 0 : index
    %c0_147 = arith.constant 0 : index
    %350 = vector.load %arg8[%c0_146, %c0_147] : memref<1x128xf32, #tpu.memory_space<vmem>>, vector<1x128xf32>
    %351 = arith.truncf %348 : vector<64x128xf32> to vector<64x128xbf16>
    %cst_148 = arith.constant dense<0.000000e+00> : vector<64x128xf32>
    %352 = tpu.matmul %351, %349, %cst_148 {dimension_numbers = #tpu.dot_dimension_numbers<[1], [0], [0], [1], [0, 0, 1, 1], [], []>} : vector<64x128xbf16>, vector<128x128xbf16>, vector<64x128xf32> -> vector<64x128xf32>
    %353 = vector.broadcast %350 : vector<1x128xf32> to vector<64x128xf32>
    %354 = arith.addf %352, %353 : vector<64x128xf32>
    %c0_149 = arith.constant 0 : index
    %c0_150 = arith.constant 0 : index
    %355 = vector.load %arg9[%c0_149, %c0_150] : memref<128x128xbf16, #tpu.memory_space<vmem>>, vector<128x128xbf16>
    %c0_151 = arith.constant 0 : index
    %c0_152 = arith.constant 0 : index
    %356 = vector.load %arg10[%c0_151, %c0_152] : memref<128x128xbf16, #tpu.memory_space<vmem>>, vector<128x128xbf16>
    %c0_153 = arith.constant 0 : index
    %c0_154 = arith.constant 0 : index
    %357 = vector.load %arg11[%c0_153, %c0_154] : memref<1x128xf32, #tpu.memory_space<vmem>>, vector<1x128xf32>
    %358 = arith.truncf %354 : vector<64x128xf32> to vector<64x128xbf16>
    %cst_155 = arith.constant dense<0.000000e+00> : vector<64x128xf32>
    %359 = tpu.matmul %358, %355, %cst_155 {dimension_numbers = #tpu.dot_dimension_numbers<[1], [0], [0], [1], [0, 0, 1, 1], [], []>} : vector<64x128xbf16>, vector<128x128xbf16>, vector<64x128xf32> -> vector<64x128xf32>
    %360 = vector.broadcast %357 : vector<1x128xf32> to vector<64x128xf32>
    %361 = arith.addf %359, %360 : vector<64x128xf32>
    %362 = vector.shape_cast %361 : vector<64x128xf32> to vector<8x8x128xf32>
    %c0_156 = arith.constant 0 : index
    %c0_157 = arith.constant 0 : index
    %c0_158 = arith.constant 0 : index
    %363 = vector.load %arg18[%c0_156, %c0_157, %c0_158] : memref<8x8x128xf32, #tpu.memory_space<vmem>>, vector<8x8x128xf32>
    tpu.vector_store %arg18[%c0_156, %c0_157, %c0_158], %362 {strides = array<i32>} : memref<8x8x128xf32, #tpu.memory_space<vmem>>, vector<8x8x128xf32>,
    %cst_159 = arith.constant 0.000000e+00 : f32
    %364 = vector.broadcast %cst_159 : f32 to vector<8x128xf32>
    %cst_160 = arith.constant 0.000000e+00 : f32
    %365 = vector.broadcast %cst_160 : f32 to vector<8x128xf32>
    %c0_161 = arith.constant 0 : index
    %c0_162 = arith.constant 0 : index
    %c0_163 = arith.constant 0 : index
    %366 = vector.load %arg18[%c0_161, %c0_162, %c0_163] : memref<8x8x128xf32, #tpu.memory_space<vmem>>, vector<1x8x128xf32>
    %367 = vector.shape_cast %366 : vector<1x8x128xf32> to vector<8x128xf32>
    %368 = arith.truncf %364 : vector<8x128xf32> to vector<8x128xbf16>
    %cst_164 = arith.constant dense<0.000000e+00> : vector<8x128xf32>
    %369 = tpu.matmul %368, %356, %cst_164 {dimension_numbers = #tpu.dot_dimension_numbers<[1], [0], [0], [1], [0, 0, 1, 1], [], []>} : vector<8x128xbf16>, vector<128x128xbf16>, vector<8x128xf32> -> vector<8x128xf32>
    %370 = arith.addf %367, %369 : vector<8x128xf32>
    %371 = arith.negf %370 : vector<8x128xf32>
    %372 = math.exp %371 : vector<8x128xf32>
    %cst_165 = arith.constant 1.000000e+00 : f32
    %373 = vector.broadcast %cst_165 : f32 to vector<8x128xf32>
    %374 = arith.addf %373, %372 : vector<8x128xf32>
    %375 = arith.divf %373, %374 : vector<8x128xf32>
    %376 = math.tanh %370 : vector<8x128xf32>
    %377 = arith.select %4, %375, %376 : vector<8x128xi1>, vector<8x128xf32>
    %c96_i32_166 = arith.constant 96 : i32
    %378 = tpu.dynamic_rotate %377 by %c96_i32_166 dim 1 : vector<8x128xf32>, i32 -> vector<8x128xf32>
    %c64_i32_167 = arith.constant 64 : i32
    %379 = tpu.dynamic_rotate %377 by %c64_i32_167 dim 1 : vector<8x128xf32>, i32 -> vector<8x128xf32>
    %c32_i32_168 = arith.constant 32 : i32
    %380 = tpu.dynamic_rotate %377 by %c32_i32_168 dim 1 : vector<8x128xf32>, i32 -> vector<8x128xf32>
    %381 = arith.mulf %378, %365 : vector<8x128xf32>
    %382 = arith.mulf %377, %380 : vector<8x128xf32>
    %383 = arith.addf %381, %382 : vector<8x128xf32>
    %384 = math.tanh %383 : vector<8x128xf32>
    %385 = arith.mulf %379, %384 : vector<8x128xf32>
    %c1_169 = arith.constant 1 : index
    %c0_170 = arith.constant 0 : index
    %c0_171 = arith.constant 0 : index
    %386 = vector.load %arg18[%c1_169, %c0_170, %c0_171] : memref<8x8x128xf32, #tpu.memory_space<vmem>>, vector<1x8x128xf32>
    %387 = vector.shape_cast %386 : vector<1x8x128xf32> to vector<8x128xf32>
    %388 = arith.truncf %385 : vector<8x128xf32> to vector<8x128xbf16>
    %cst_172 = arith.constant dense<0.000000e+00> : vector<8x128xf32>
    %389 = tpu.matmul %388, %356, %cst_172 {dimension_numbers = #tpu.dot_dimension_numbers<[1], [0], [0], [1], [0, 0, 1, 1], [], []>} : vector<8x128xbf16>, vector<128x128xbf16>, vector<8x128xf32> -> vector<8x128xf32>
    %390 = arith.addf %387, %389 : vector<8x128xf32>
    %391 = arith.negf %390 : vector<8x128xf32>
    %392 = math.exp %391 : vector<8x128xf32>
    %cst_173 = arith.constant 1.000000e+00 : f32
    %393 = vector.broadcast %cst_173 : f32 to vector<8x128xf32>
    %394 = arith.addf %393, %392 : vector<8x128xf32>
    %395 = arith.divf %393, %394 : vector<8x128xf32>
    %396 = math.tanh %390 : vector<8x128xf32>
    %397 = arith.select %4, %395, %396 : vector<8x128xi1>, vector<8x128xf32>
    %c96_i32_174 = arith.constant 96 : i32
    %398 = tpu.dynamic_rotate %397 by %c96_i32_174 dim 1 : vector<8x128xf32>, i32 -> vector<8x128xf32>
    %c64_i32_175 = arith.constant 64 : i32
    %399 = tpu.dynamic_rotate %397 by %c64_i32_175 dim 1 : vector<8x128xf32>, i32 -> vector<8x128xf32>
    %c32_i32_176 = arith.constant 32 : i32
    %400 = tpu.dynamic_rotate %397 by %c32_i32_176 dim 1 : vector<8x128xf32>, i32 -> vector<8x128xf32>
    %401 = arith.mulf %398, %383 : vector<8x128xf32>
    %402 = arith.mulf %397, %400 : vector<8x128xf32>
    %403 = arith.addf %401, %402 : vector<8x128xf32>
    %404 = math.tanh %403 : vector<8x128xf32>
    %405 = arith.mulf %399, %404 : vector<8x128xf32>
    %c2_177 = arith.constant 2 : index
    %c0_178 = arith.constant 0 : index
    %c0_179 = arith.constant 0 : index
    %406 = vector.load %arg18[%c2_177, %c0_178, %c0_179] : memref<8x8x128xf32, #tpu.memory_space<vmem>>, vector<1x8x128xf32>
    %407 = vector.shape_cast %406 : vector<1x8x128xf32> to vector<8x128xf32>
    %408 = arith.truncf %405 : vector<8x128xf32> to vector<8x128xbf16>
    %cst_180 = arith.constant dense<0.000000e+00> : vector<8x128xf32>
    %409 = tpu.matmul %408, %356, %cst_180 {dimension_numbers = #tpu.dot_dimension_numbers<[1], [0], [0], [1], [0, 0, 1, 1], [], []>} : vector<8x128xbf16>, vector<128x128xbf16>, vector<8x128xf32> -> vector<8x128xf32>
    %410 = arith.addf %407, %409 : vector<8x128xf32>
    %411 = arith.negf %410 : vector<8x128xf32>
    %412 = math.exp %411 : vector<8x128xf32>
    %cst_181 = arith.constant 1.000000e+00 : f32
    %413 = vector.broadcast %cst_181 : f32 to vector<8x128xf32>
    %414 = arith.addf %413, %412 : vector<8x128xf32>
    %415 = arith.divf %413, %414 : vector<8x128xf32>
    %416 = math.tanh %410 : vector<8x128xf32>
    %417 = arith.select %4, %415, %416 : vector<8x128xi1>, vector<8x128xf32>
    %c96_i32_182 = arith.constant 96 : i32
    %418 = tpu.dynamic_rotate %417 by %c96_i32_182 dim 1 : vector<8x128xf32>, i32 -> vector<8x128xf32>
    %c64_i32_183 = arith.constant 64 : i32
    %419 = tpu.dynamic_rotate %417 by %c64_i32_183 dim 1 : vector<8x128xf32>, i32 -> vector<8x128xf32>
    %c32_i32_184 = arith.constant 32 : i32
    %420 = tpu.dynamic_rotate %417 by %c32_i32_184 dim 1 : vector<8x128xf32>, i32 -> vector<8x128xf32>
    %421 = arith.mulf %418, %403 : vector<8x128xf32>
    %422 = arith.mulf %417, %420 : vector<8x128xf32>
    %423 = arith.addf %421, %422 : vector<8x128xf32>
    %424 = math.tanh %423 : vector<8x128xf32>
    %425 = arith.mulf %419, %424 : vector<8x128xf32>
    %c3_185 = arith.constant 3 : index
    %c0_186 = arith.constant 0 : index
    %c0_187 = arith.constant 0 : index
    %426 = vector.load %arg18[%c3_185, %c0_186, %c0_187] : memref<8x8x128xf32, #tpu.memory_space<vmem>>, vector<1x8x128xf32>
    %427 = vector.shape_cast %426 : vector<1x8x128xf32> to vector<8x128xf32>
    %428 = arith.truncf %425 : vector<8x128xf32> to vector<8x128xbf16>
    %cst_188 = arith.constant dense<0.000000e+00> : vector<8x128xf32>
    %429 = tpu.matmul %428, %356, %cst_188 {dimension_numbers = #tpu.dot_dimension_numbers<[1], [0], [0], [1], [0, 0, 1, 1], [], []>} : vector<8x128xbf16>, vector<128x128xbf16>, vector<8x128xf32> -> vector<8x128xf32>
    %430 = arith.addf %427, %429 : vector<8x128xf32>
    %431 = arith.negf %430 : vector<8x128xf32>
    %432 = math.exp %431 : vector<8x128xf32>
    %cst_189 = arith.constant 1.000000e+00 : f32
    %433 = vector.broadcast %cst_189 : f32 to vector<8x128xf32>
    %434 = arith.addf %433, %432 : vector<8x128xf32>
    %435 = arith.divf %433, %434 : vector<8x128xf32>
    %436 = math.tanh %430 : vector<8x128xf32>
    %437 = arith.select %4, %435, %436 : vector<8x128xi1>, vector<8x128xf32>
    %c96_i32_190 = arith.constant 96 : i32
    %438 = tpu.dynamic_rotate %437 by %c96_i32_190 dim 1 : vector<8x128xf32>, i32 -> vector<8x128xf32>
    %c64_i32_191 = arith.constant 64 : i32
    %439 = tpu.dynamic_rotate %437 by %c64_i32_191 dim 1 : vector<8x128xf32>, i32 -> vector<8x128xf32>
    %c32_i32_192 = arith.constant 32 : i32
    %440 = tpu.dynamic_rotate %437 by %c32_i32_192 dim 1 : vector<8x128xf32>, i32 -> vector<8x128xf32>
    %441 = arith.mulf %438, %423 : vector<8x128xf32>
    %442 = arith.mulf %437, %440 : vector<8x128xf32>
    %443 = arith.addf %441, %442 : vector<8x128xf32>
    %444 = math.tanh %443 : vector<8x128xf32>
    %445 = arith.mulf %439, %444 : vector<8x128xf32>
    %c4_193 = arith.constant 4 : index
    %c0_194 = arith.constant 0 : index
    %c0_195 = arith.constant 0 : index
    %446 = vector.load %arg18[%c4_193, %c0_194, %c0_195] : memref<8x8x128xf32, #tpu.memory_space<vmem>>, vector<1x8x128xf32>
    %447 = vector.shape_cast %446 : vector<1x8x128xf32> to vector<8x128xf32>
    %448 = arith.truncf %445 : vector<8x128xf32> to vector<8x128xbf16>
    %cst_196 = arith.constant dense<0.000000e+00> : vector<8x128xf32>
    %449 = tpu.matmul %448, %356, %cst_196 {dimension_numbers = #tpu.dot_dimension_numbers<[1], [0], [0], [1], [0, 0, 1, 1], [], []>} : vector<8x128xbf16>, vector<128x128xbf16>, vector<8x128xf32> -> vector<8x128xf32>
    %450 = arith.addf %447, %449 : vector<8x128xf32>
    %451 = arith.negf %450 : vector<8x128xf32>
    %452 = math.exp %451 : vector<8x128xf32>
    %cst_197 = arith.constant 1.000000e+00 : f32
    %453 = vector.broadcast %cst_197 : f32 to vector<8x128xf32>
    %454 = arith.addf %453, %452 : vector<8x128xf32>
    %455 = arith.divf %453, %454 : vector<8x128xf32>
    %456 = math.tanh %450 : vector<8x128xf32>
    %457 = arith.select %4, %455, %456 : vector<8x128xi1>, vector<8x128xf32>
    %c96_i32_198 = arith.constant 96 : i32
    %458 = tpu.dynamic_rotate %457 by %c96_i32_198 dim 1 : vector<8x128xf32>, i32 -> vector<8x128xf32>
    %c64_i32_199 = arith.constant 64 : i32
    %459 = tpu.dynamic_rotate %457 by %c64_i32_199 dim 1 : vector<8x128xf32>, i32 -> vector<8x128xf32>
    %c32_i32_200 = arith.constant 32 : i32
    %460 = tpu.dynamic_rotate %457 by %c32_i32_200 dim 1 : vector<8x128xf32>, i32 -> vector<8x128xf32>
    %461 = arith.mulf %458, %443 : vector<8x128xf32>
    %462 = arith.mulf %457, %460 : vector<8x128xf32>
    %463 = arith.addf %461, %462 : vector<8x128xf32>
    %464 = math.tanh %463 : vector<8x128xf32>
    %465 = arith.mulf %459, %464 : vector<8x128xf32>
    %c5_201 = arith.constant 5 : index
    %c0_202 = arith.constant 0 : index
    %c0_203 = arith.constant 0 : index
    %466 = vector.load %arg18[%c5_201, %c0_202, %c0_203] : memref<8x8x128xf32, #tpu.memory_space<vmem>>, vector<1x8x128xf32>
    %467 = vector.shape_cast %466 : vector<1x8x128xf32> to vector<8x128xf32>
    %468 = arith.truncf %465 : vector<8x128xf32> to vector<8x128xbf16>
    %cst_204 = arith.constant dense<0.000000e+00> : vector<8x128xf32>
    %469 = tpu.matmul %468, %356, %cst_204 {dimension_numbers = #tpu.dot_dimension_numbers<[1], [0], [0], [1], [0, 0, 1, 1], [], []>} : vector<8x128xbf16>, vector<128x128xbf16>, vector<8x128xf32> -> vector<8x128xf32>
    %470 = arith.addf %467, %469 : vector<8x128xf32>
    %471 = arith.negf %470 : vector<8x128xf32>
    %472 = math.exp %471 : vector<8x128xf32>
    %cst_205 = arith.constant 1.000000e+00 : f32
    %473 = vector.broadcast %cst_205 : f32 to vector<8x128xf32>
    %474 = arith.addf %473, %472 : vector<8x128xf32>
    %475 = arith.divf %473, %474 : vector<8x128xf32>
    %476 = math.tanh %470 : vector<8x128xf32>
    %477 = arith.select %4, %475, %476 : vector<8x128xi1>, vector<8x128xf32>
    %c96_i32_206 = arith.constant 96 : i32
    %478 = tpu.dynamic_rotate %477 by %c96_i32_206 dim 1 : vector<8x128xf32>, i32 -> vector<8x128xf32>
    %c64_i32_207 = arith.constant 64 : i32
    %479 = tpu.dynamic_rotate %477 by %c64_i32_207 dim 1 : vector<8x128xf32>, i32 -> vector<8x128xf32>
    %c32_i32_208 = arith.constant 32 : i32
    %480 = tpu.dynamic_rotate %477 by %c32_i32_208 dim 1 : vector<8x128xf32>, i32 -> vector<8x128xf32>
    %481 = arith.mulf %478, %463 : vector<8x128xf32>
    %482 = arith.mulf %477, %480 : vector<8x128xf32>
    %483 = arith.addf %481, %482 : vector<8x128xf32>
    %484 = math.tanh %483 : vector<8x128xf32>
    %485 = arith.mulf %479, %484 : vector<8x128xf32>
    %c6_209 = arith.constant 6 : index
    %c0_210 = arith.constant 0 : index
    %c0_211 = arith.constant 0 : index
    %486 = vector.load %arg18[%c6_209, %c0_210, %c0_211] : memref<8x8x128xf32, #tpu.memory_space<vmem>>, vector<1x8x128xf32>
    %487 = vector.shape_cast %486 : vector<1x8x128xf32> to vector<8x128xf32>
    %488 = arith.truncf %485 : vector<8x128xf32> to vector<8x128xbf16>
    %cst_212 = arith.constant dense<0.000000e+00> : vector<8x128xf32>
    %489 = tpu.matmul %488, %356, %cst_212 {dimension_numbers = #tpu.dot_dimension_numbers<[1], [0], [0], [1], [0, 0, 1, 1], [], []>} : vector<8x128xbf16>, vector<128x128xbf16>, vector<8x128xf32> -> vector<8x128xf32>
    %490 = arith.addf %487, %489 : vector<8x128xf32>
    %491 = arith.negf %490 : vector<8x128xf32>
    %492 = math.exp %491 : vector<8x128xf32>
    %cst_213 = arith.constant 1.000000e+00 : f32
    %493 = vector.broadcast %cst_213 : f32 to vector<8x128xf32>
    %494 = arith.addf %493, %492 : vector<8x128xf32>
    %495 = arith.divf %493, %494 : vector<8x128xf32>
    %496 = math.tanh %490 : vector<8x128xf32>
    %497 = arith.select %4, %495, %496 : vector<8x128xi1>, vector<8x128xf32>
    %c96_i32_214 = arith.constant 96 : i32
    %498 = tpu.dynamic_rotate %497 by %c96_i32_214 dim 1 : vector<8x128xf32>, i32 -> vector<8x128xf32>
    %c64_i32_215 = arith.constant 64 : i32
    %499 = tpu.dynamic_rotate %497 by %c64_i32_215 dim 1 : vector<8x128xf32>, i32 -> vector<8x128xf32>
    %c32_i32_216 = arith.constant 32 : i32
    %500 = tpu.dynamic_rotate %497 by %c32_i32_216 dim 1 : vector<8x128xf32>, i32 -> vector<8x128xf32>
    %501 = arith.mulf %498, %483 : vector<8x128xf32>
    %502 = arith.mulf %497, %500 : vector<8x128xf32>
    %503 = arith.addf %501, %502 : vector<8x128xf32>
    %504 = math.tanh %503 : vector<8x128xf32>
    %505 = arith.mulf %499, %504 : vector<8x128xf32>
    %c7_217 = arith.constant 7 : index
    %c0_218 = arith.constant 0 : index
    %c0_219 = arith.constant 0 : index
    %506 = vector.load %arg18[%c7_217, %c0_218, %c0_219] : memref<8x8x128xf32, #tpu.memory_space<vmem>>, vector<1x8x128xf32>
    %507 = vector.shape_cast %506 : vector<1x8x128xf32> to vector<8x128xf32>
    %508 = arith.truncf %505 : vector<8x128xf32> to vector<8x128xbf16>
    %cst_220 = arith.constant dense<0.000000e+00> : vector<8x128xf32>
    %509 = tpu.matmul %508, %356, %cst_220 {dimension_numbers = #tpu.dot_dimension_numbers<[1], [0], [0], [1], [0, 0, 1, 1], [], []>} : vector<8x128xbf16>, vector<128x128xbf16>, vector<8x128xf32> -> vector<8x128xf32>
    %510 = arith.addf %507, %509 : vector<8x128xf32>
    %511 = arith.negf %510 : vector<8x128xf32>
    %512 = math.exp %511 : vector<8x128xf32>
    %cst_221 = arith.constant 1.000000e+00 : f32
    %513 = vector.broadcast %cst_221 : f32 to vector<8x128xf32>
    %514 = arith.addf %513, %512 : vector<8x128xf32>
    %515 = arith.divf %513, %514 : vector<8x128xf32>
    %516 = math.tanh %510 : vector<8x128xf32>
    %517 = arith.select %4, %515, %516 : vector<8x128xi1>, vector<8x128xf32>
    %c96_i32_222 = arith.constant 96 : i32
    %518 = tpu.dynamic_rotate %517 by %c96_i32_222 dim 1 : vector<8x128xf32>, i32 -> vector<8x128xf32>
    %c64_i32_223 = arith.constant 64 : i32
    %519 = tpu.dynamic_rotate %517 by %c64_i32_223 dim 1 : vector<8x128xf32>, i32 -> vector<8x128xf32>
    %c32_i32_224 = arith.constant 32 : i32
    %520 = tpu.dynamic_rotate %517 by %c32_i32_224 dim 1 : vector<8x128xf32>, i32 -> vector<8x128xf32>
    %521 = arith.mulf %518, %503 : vector<8x128xf32>
    %522 = arith.mulf %517, %520 : vector<8x128xf32>
    %523 = arith.addf %521, %522 : vector<8x128xf32>
    %524 = math.tanh %523 : vector<8x128xf32>
    %525 = arith.mulf %519, %524 : vector<8x128xf32>
    %526 = tpu.concatenate %385, %405, %425, %445, %465, %485, %505, %525 in 0 : vector<8x128xf32>, vector<8x128xf32>, vector<8x128xf32>, vector<8x128xf32>, vector<8x128xf32>, vector<8x128xf32>, vector<8x128xf32>, vector<8x128xf32> -> vector<64x128xf32>
    %c0_225 = arith.constant 0 : index
    %c0_226 = arith.constant 0 : index
    %527 = vector.load %arg12[%c0_225, %c0_226] : memref<128x128xbf16, #tpu.memory_space<vmem>>, vector<128x128xbf16>
    %c0_227 = arith.constant 0 : index
    %c0_228 = arith.constant 0 : index
    %528 = vector.load %arg13[%c0_227, %c0_228] : memref<128x128xbf16, #tpu.memory_space<vmem>>, vector<128x128xbf16>
    %c0_229 = arith.constant 0 : index
    %c0_230 = arith.constant 0 : index
    %529 = vector.load %arg14[%c0_229, %c0_230] : memref<1x128xf32, #tpu.memory_space<vmem>>, vector<1x128xf32>
    %530 = arith.truncf %526 : vector<64x128xf32> to vector<64x128xbf16>
    %cst_231 = arith.constant dense<0.000000e+00> : vector<64x128xf32>
    %531 = tpu.matmul %530, %527, %cst_231 {dimension_numbers = #tpu.dot_dimension_numbers<[1], [0], [0], [1], [0, 0, 1, 1], [], []>} : vector<64x128xbf16>, vector<128x128xbf16>, vector<64x128xf32> -> vector<64x128xf32>
    %532 = vector.broadcast %529 : vector<1x128xf32> to vector<64x128xf32>
    %533 = arith.addf %531, %532 : vector<64x128xf32>
    %534 = vector.shape_cast %533 : vector<64x128xf32> to vector<8x8x128xf32>
    %c0_232 = arith.constant 0 : index
    %c0_233 = arith.constant 0 : index
    %c0_234 = arith.constant 0 : index
    %535 = vector.load %arg18[%c0_232, %c0_233, %c0_234] : memref<8x8x128xf32, #tpu.memory_space<vmem>>, vector<8x8x128xf32>
    tpu.vector_store %arg18[%c0_232, %c0_233, %c0_234], %534 {strides = array<i32>} : memref<8x8x128xf32, #tpu.memory_space<vmem>>, vector<8x8x128xf32>,
    %cst_235 = arith.constant 0.000000e+00 : f32
    %536 = vector.broadcast %cst_235 : f32 to vector<8x128xf32>
    %cst_236 = arith.constant 0.000000e+00 : f32
    %537 = vector.broadcast %cst_236 : f32 to vector<8x128xf32>
    %c0_237 = arith.constant 0 : index
    %c0_238 = arith.constant 0 : index
    %c0_239 = arith.constant 0 : index
    %538 = vector.load %arg18[%c0_237, %c0_238, %c0_239] : memref<8x8x128xf32, #tpu.memory_space<vmem>>, vector<1x8x128xf32>
    %539 = vector.shape_cast %538 : vector<1x8x128xf32> to vector<8x128xf32>
    %540 = arith.truncf %536 : vector<8x128xf32> to vector<8x128xbf16>
    %cst_240 = arith.constant dense<0.000000e+00> : vector<8x128xf32>
    %541 = tpu.matmul %540, %528, %cst_240 {dimension_numbers = #tpu.dot_dimension_numbers<[1], [0], [0], [1], [0, 0, 1, 1], [], []>} : vector<8x128xbf16>, vector<128x128xbf16>, vector<8x128xf32> -> vector<8x128xf32>
    %542 = arith.addf %539, %541 : vector<8x128xf32>
    %543 = arith.negf %542 : vector<8x128xf32>
    %544 = math.exp %543 : vector<8x128xf32>
    %cst_241 = arith.constant 1.000000e+00 : f32
    %545 = vector.broadcast %cst_241 : f32 to vector<8x128xf32>
    %546 = arith.addf %545, %544 : vector<8x128xf32>
    %547 = arith.divf %545, %546 : vector<8x128xf32>
    %548 = math.tanh %542 : vector<8x128xf32>
    %549 = arith.select %4, %547, %548 : vector<8x128xi1>, vector<8x128xf32>
    %c96_i32_242 = arith.constant 96 : i32
    %550 = tpu.dynamic_rotate %549 by %c96_i32_242 dim 1 : vector<8x128xf32>, i32 -> vector<8x128xf32>
    %c64_i32_243 = arith.constant 64 : i32
    %551 = tpu.dynamic_rotate %549 by %c64_i32_243 dim 1 : vector<8x128xf32>, i32 -> vector<8x128xf32>
    %c32_i32_244 = arith.constant 32 : i32
    %552 = tpu.dynamic_rotate %549 by %c32_i32_244 dim 1 : vector<8x128xf32>, i32 -> vector<8x128xf32>
    %553 = arith.mulf %550, %537 : vector<8x128xf32>
    %554 = arith.mulf %549, %552 : vector<8x128xf32>
    %555 = arith.addf %553, %554 : vector<8x128xf32>
    %556 = math.tanh %555 : vector<8x128xf32>
    %557 = arith.mulf %551, %556 : vector<8x128xf32>
    %c1_245 = arith.constant 1 : index
    %c0_246 = arith.constant 0 : index
    %c0_247 = arith.constant 0 : index
    %558 = vector.load %arg18[%c1_245, %c0_246, %c0_247] : memref<8x8x128xf32, #tpu.memory_space<vmem>>, vector<1x8x128xf32>
    %559 = vector.shape_cast %558 : vector<1x8x128xf32> to vector<8x128xf32>
    %560 = arith.truncf %557 : vector<8x128xf32> to vector<8x128xbf16>
    %cst_248 = arith.constant dense<0.000000e+00> : vector<8x128xf32>
    %561 = tpu.matmul %560, %528, %cst_248 {dimension_numbers = #tpu.dot_dimension_numbers<[1], [0], [0], [1], [0, 0, 1, 1], [], []>} : vector<8x128xbf16>, vector<128x128xbf16>, vector<8x128xf32> -> vector<8x128xf32>
    %562 = arith.addf %559, %561 : vector<8x128xf32>
    %563 = arith.negf %562 : vector<8x128xf32>
    %564 = math.exp %563 : vector<8x128xf32>
    %cst_249 = arith.constant 1.000000e+00 : f32
    %565 = vector.broadcast %cst_249 : f32 to vector<8x128xf32>
    %566 = arith.addf %565, %564 : vector<8x128xf32>
    %567 = arith.divf %565, %566 : vector<8x128xf32>
    %568 = math.tanh %562 : vector<8x128xf32>
    %569 = arith.select %4, %567, %568 : vector<8x128xi1>, vector<8x128xf32>
    %c96_i32_250 = arith.constant 96 : i32
    %570 = tpu.dynamic_rotate %569 by %c96_i32_250 dim 1 : vector<8x128xf32>, i32 -> vector<8x128xf32>
    %c64_i32_251 = arith.constant 64 : i32
    %571 = tpu.dynamic_rotate %569 by %c64_i32_251 dim 1 : vector<8x128xf32>, i32 -> vector<8x128xf32>
    %c32_i32_252 = arith.constant 32 : i32
    %572 = tpu.dynamic_rotate %569 by %c32_i32_252 dim 1 : vector<8x128xf32>, i32 -> vector<8x128xf32>
    %573 = arith.mulf %570, %555 : vector<8x128xf32>
    %574 = arith.mulf %569, %572 : vector<8x128xf32>
    %575 = arith.addf %573, %574 : vector<8x128xf32>
    %576 = math.tanh %575 : vector<8x128xf32>
    %577 = arith.mulf %571, %576 : vector<8x128xf32>
    %c2_253 = arith.constant 2 : index
    %c0_254 = arith.constant 0 : index
    %c0_255 = arith.constant 0 : index
    %578 = vector.load %arg18[%c2_253, %c0_254, %c0_255] : memref<8x8x128xf32, #tpu.memory_space<vmem>>, vector<1x8x128xf32>
    %579 = vector.shape_cast %578 : vector<1x8x128xf32> to vector<8x128xf32>
    %580 = arith.truncf %577 : vector<8x128xf32> to vector<8x128xbf16>
    %cst_256 = arith.constant dense<0.000000e+00> : vector<8x128xf32>
    %581 = tpu.matmul %580, %528, %cst_256 {dimension_numbers = #tpu.dot_dimension_numbers<[1], [0], [0], [1], [0, 0, 1, 1], [], []>} : vector<8x128xbf16>, vector<128x128xbf16>, vector<8x128xf32> -> vector<8x128xf32>
    %582 = arith.addf %579, %581 : vector<8x128xf32>
    %583 = arith.negf %582 : vector<8x128xf32>
    %584 = math.exp %583 : vector<8x128xf32>
    %cst_257 = arith.constant 1.000000e+00 : f32
    %585 = vector.broadcast %cst_257 : f32 to vector<8x128xf32>
    %586 = arith.addf %585, %584 : vector<8x128xf32>
    %587 = arith.divf %585, %586 : vector<8x128xf32>
    %588 = math.tanh %582 : vector<8x128xf32>
    %589 = arith.select %4, %587, %588 : vector<8x128xi1>, vector<8x128xf32>
    %c96_i32_258 = arith.constant 96 : i32
    %590 = tpu.dynamic_rotate %589 by %c96_i32_258 dim 1 : vector<8x128xf32>, i32 -> vector<8x128xf32>
    %c64_i32_259 = arith.constant 64 : i32
    %591 = tpu.dynamic_rotate %589 by %c64_i32_259 dim 1 : vector<8x128xf32>, i32 -> vector<8x128xf32>
    %c32_i32_260 = arith.constant 32 : i32
    %592 = tpu.dynamic_rotate %589 by %c32_i32_260 dim 1 : vector<8x128xf32>, i32 -> vector<8x128xf32>
    %593 = arith.mulf %590, %575 : vector<8x128xf32>
    %594 = arith.mulf %589, %592 : vector<8x128xf32>
    %595 = arith.addf %593, %594 : vector<8x128xf32>
    %596 = math.tanh %595 : vector<8x128xf32>
    %597 = arith.mulf %591, %596 : vector<8x128xf32>
    %c3_261 = arith.constant 3 : index
    %c0_262 = arith.constant 0 : index
    %c0_263 = arith.constant 0 : index
    %598 = vector.load %arg18[%c3_261, %c0_262, %c0_263] : memref<8x8x128xf32, #tpu.memory_space<vmem>>, vector<1x8x128xf32>
    %599 = vector.shape_cast %598 : vector<1x8x128xf32> to vector<8x128xf32>
    %600 = arith.truncf %597 : vector<8x128xf32> to vector<8x128xbf16>
    %cst_264 = arith.constant dense<0.000000e+00> : vector<8x128xf32>
    %601 = tpu.matmul %600, %528, %cst_264 {dimension_numbers = #tpu.dot_dimension_numbers<[1], [0], [0], [1], [0, 0, 1, 1], [], []>} : vector<8x128xbf16>, vector<128x128xbf16>, vector<8x128xf32> -> vector<8x128xf32>
    %602 = arith.addf %599, %601 : vector<8x128xf32>
    %603 = arith.negf %602 : vector<8x128xf32>
    %604 = math.exp %603 : vector<8x128xf32>
    %cst_265 = arith.constant 1.000000e+00 : f32
    %605 = vector.broadcast %cst_265 : f32 to vector<8x128xf32>
    %606 = arith.addf %605, %604 : vector<8x128xf32>
    %607 = arith.divf %605, %606 : vector<8x128xf32>
    %608 = math.tanh %602 : vector<8x128xf32>
    %609 = arith.select %4, %607, %608 : vector<8x128xi1>, vector<8x128xf32>
    %c96_i32_266 = arith.constant 96 : i32
    %610 = tpu.dynamic_rotate %609 by %c96_i32_266 dim 1 : vector<8x128xf32>, i32 -> vector<8x128xf32>
    %c64_i32_267 = arith.constant 64 : i32
    %611 = tpu.dynamic_rotate %609 by %c64_i32_267 dim 1 : vector<8x128xf32>, i32 -> vector<8x128xf32>
    %c32_i32_268 = arith.constant 32 : i32
    %612 = tpu.dynamic_rotate %609 by %c32_i32_268 dim 1 : vector<8x128xf32>, i32 -> vector<8x128xf32>
    %613 = arith.mulf %610, %595 : vector<8x128xf32>
    %614 = arith.mulf %609, %612 : vector<8x128xf32>
    %615 = arith.addf %613, %614 : vector<8x128xf32>
    %616 = math.tanh %615 : vector<8x128xf32>
    %617 = arith.mulf %611, %616 : vector<8x128xf32>
    %c4_269 = arith.constant 4 : index
    %c0_270 = arith.constant 0 : index
    %c0_271 = arith.constant 0 : index
    %618 = vector.load %arg18[%c4_269, %c0_270, %c0_271] : memref<8x8x128xf32, #tpu.memory_space<vmem>>, vector<1x8x128xf32>
    %619 = vector.shape_cast %618 : vector<1x8x128xf32> to vector<8x128xf32>
    %620 = arith.truncf %617 : vector<8x128xf32> to vector<8x128xbf16>
    %cst_272 = arith.constant dense<0.000000e+00> : vector<8x128xf32>
    %621 = tpu.matmul %620, %528, %cst_272 {dimension_numbers = #tpu.dot_dimension_numbers<[1], [0], [0], [1], [0, 0, 1, 1], [], []>} : vector<8x128xbf16>, vector<128x128xbf16>, vector<8x128xf32> -> vector<8x128xf32>
    %622 = arith.addf %619, %621 : vector<8x128xf32>
    %623 = arith.negf %622 : vector<8x128xf32>
    %624 = math.exp %623 : vector<8x128xf32>
    %cst_273 = arith.constant 1.000000e+00 : f32
    %625 = vector.broadcast %cst_273 : f32 to vector<8x128xf32>
    %626 = arith.addf %625, %624 : vector<8x128xf32>
    %627 = arith.divf %625, %626 : vector<8x128xf32>
    %628 = math.tanh %622 : vector<8x128xf32>
    %629 = arith.select %4, %627, %628 : vector<8x128xi1>, vector<8x128xf32>
    %c96_i32_274 = arith.constant 96 : i32
    %630 = tpu.dynamic_rotate %629 by %c96_i32_274 dim 1 : vector<8x128xf32>, i32 -> vector<8x128xf32>
    %c64_i32_275 = arith.constant 64 : i32
    %631 = tpu.dynamic_rotate %629 by %c64_i32_275 dim 1 : vector<8x128xf32>, i32 -> vector<8x128xf32>
    %c32_i32_276 = arith.constant 32 : i32
    %632 = tpu.dynamic_rotate %629 by %c32_i32_276 dim 1 : vector<8x128xf32>, i32 -> vector<8x128xf32>
    %633 = arith.mulf %630, %615 : vector<8x128xf32>
    %634 = arith.mulf %629, %632 : vector<8x128xf32>
    %635 = arith.addf %633, %634 : vector<8x128xf32>
    %636 = math.tanh %635 : vector<8x128xf32>
    %637 = arith.mulf %631, %636 : vector<8x128xf32>
    %c5_277 = arith.constant 5 : index
    %c0_278 = arith.constant 0 : index
    %c0_279 = arith.constant 0 : index
    %638 = vector.load %arg18[%c5_277, %c0_278, %c0_279] : memref<8x8x128xf32, #tpu.memory_space<vmem>>, vector<1x8x128xf32>
    %639 = vector.shape_cast %638 : vector<1x8x128xf32> to vector<8x128xf32>
    %640 = arith.truncf %637 : vector<8x128xf32> to vector<8x128xbf16>
    %cst_280 = arith.constant dense<0.000000e+00> : vector<8x128xf32>
    %641 = tpu.matmul %640, %528, %cst_280 {dimension_numbers = #tpu.dot_dimension_numbers<[1], [0], [0], [1], [0, 0, 1, 1], [], []>} : vector<8x128xbf16>, vector<128x128xbf16>, vector<8x128xf32> -> vector<8x128xf32>
    %642 = arith.addf %639, %641 : vector<8x128xf32>
    %643 = arith.negf %642 : vector<8x128xf32>
    %644 = math.exp %643 : vector<8x128xf32>
    %cst_281 = arith.constant 1.000000e+00 : f32
    %645 = vector.broadcast %cst_281 : f32 to vector<8x128xf32>
    %646 = arith.addf %645, %644 : vector<8x128xf32>
    %647 = arith.divf %645, %646 : vector<8x128xf32>
    %648 = math.tanh %642 : vector<8x128xf32>
    %649 = arith.select %4, %647, %648 : vector<8x128xi1>, vector<8x128xf32>
    %c96_i32_282 = arith.constant 96 : i32
    %650 = tpu.dynamic_rotate %649 by %c96_i32_282 dim 1 : vector<8x128xf32>, i32 -> vector<8x128xf32>
    %c64_i32_283 = arith.constant 64 : i32
    %651 = tpu.dynamic_rotate %649 by %c64_i32_283 dim 1 : vector<8x128xf32>, i32 -> vector<8x128xf32>
    %c32_i32_284 = arith.constant 32 : i32
    %652 = tpu.dynamic_rotate %649 by %c32_i32_284 dim 1 : vector<8x128xf32>, i32 -> vector<8x128xf32>
    %653 = arith.mulf %650, %635 : vector<8x128xf32>
    %654 = arith.mulf %649, %652 : vector<8x128xf32>
    %655 = arith.addf %653, %654 : vector<8x128xf32>
    %656 = math.tanh %655 : vector<8x128xf32>
    %657 = arith.mulf %651, %656 : vector<8x128xf32>
    %c6_285 = arith.constant 6 : index
    %c0_286 = arith.constant 0 : index
    %c0_287 = arith.constant 0 : index
    %658 = vector.load %arg18[%c6_285, %c0_286, %c0_287] : memref<8x8x128xf32, #tpu.memory_space<vmem>>, vector<1x8x128xf32>
    %659 = vector.shape_cast %658 : vector<1x8x128xf32> to vector<8x128xf32>
    %660 = arith.truncf %657 : vector<8x128xf32> to vector<8x128xbf16>
    %cst_288 = arith.constant dense<0.000000e+00> : vector<8x128xf32>
    %661 = tpu.matmul %660, %528, %cst_288 {dimension_numbers = #tpu.dot_dimension_numbers<[1], [0], [0], [1], [0, 0, 1, 1], [], []>} : vector<8x128xbf16>, vector<128x128xbf16>, vector<8x128xf32> -> vector<8x128xf32>
    %662 = arith.addf %659, %661 : vector<8x128xf32>
    %663 = arith.negf %662 : vector<8x128xf32>
    %664 = math.exp %663 : vector<8x128xf32>
    %cst_289 = arith.constant 1.000000e+00 : f32
    %665 = vector.broadcast %cst_289 : f32 to vector<8x128xf32>
    %666 = arith.addf %665, %664 : vector<8x128xf32>
    %667 = arith.divf %665, %666 : vector<8x128xf32>
    %668 = math.tanh %662 : vector<8x128xf32>
    %669 = arith.select %4, %667, %668 : vector<8x128xi1>, vector<8x128xf32>
    %c96_i32_290 = arith.constant 96 : i32
    %670 = tpu.dynamic_rotate %669 by %c96_i32_290 dim 1 : vector<8x128xf32>, i32 -> vector<8x128xf32>
    %c64_i32_291 = arith.constant 64 : i32
    %671 = tpu.dynamic_rotate %669 by %c64_i32_291 dim 1 : vector<8x128xf32>, i32 -> vector<8x128xf32>
    %c32_i32_292 = arith.constant 32 : i32
    %672 = tpu.dynamic_rotate %669 by %c32_i32_292 dim 1 : vector<8x128xf32>, i32 -> vector<8x128xf32>
    %673 = arith.mulf %670, %655 : vector<8x128xf32>
    %674 = arith.mulf %669, %672 : vector<8x128xf32>
    %675 = arith.addf %673, %674 : vector<8x128xf32>
    %676 = math.tanh %675 : vector<8x128xf32>
    %677 = arith.mulf %671, %676 : vector<8x128xf32>
    %c7_293 = arith.constant 7 : index
    %c0_294 = arith.constant 0 : index
    %c0_295 = arith.constant 0 : index
    %678 = vector.load %arg18[%c7_293, %c0_294, %c0_295] : memref<8x8x128xf32, #tpu.memory_space<vmem>>, vector<1x8x128xf32>
    %679 = vector.shape_cast %678 : vector<1x8x128xf32> to vector<8x128xf32>
    %680 = arith.truncf %677 : vector<8x128xf32> to vector<8x128xbf16>
    %cst_296 = arith.constant dense<0.000000e+00> : vector<8x128xf32>
    %681 = tpu.matmul %680, %528, %cst_296 {dimension_numbers = #tpu.dot_dimension_numbers<[1], [0], [0], [1], [0, 0, 1, 1], [], []>} : vector<8x128xbf16>, vector<128x128xbf16>, vector<8x128xf32> -> vector<8x128xf32>
    %682 = arith.addf %679, %681 : vector<8x128xf32>
    %683 = arith.negf %682 : vector<8x128xf32>
    %684 = math.exp %683 : vector<8x128xf32>
    %cst_297 = arith.constant 1.000000e+00 : f32
    %685 = vector.broadcast %cst_297 : f32 to vector<8x128xf32>
    %686 = arith.addf %685, %684 : vector<8x128xf32>
    %687 = arith.divf %685, %686 : vector<8x128xf32>
    %688 = math.tanh %682 : vector<8x128xf32>
    %689 = arith.select %4, %687, %688 : vector<8x128xi1>, vector<8x128xf32>
    %c96_i32_298 = arith.constant 96 : i32
    %690 = tpu.dynamic_rotate %689 by %c96_i32_298 dim 1 : vector<8x128xf32>, i32 -> vector<8x128xf32>
    %c64_i32_299 = arith.constant 64 : i32
    %691 = tpu.dynamic_rotate %689 by %c64_i32_299 dim 1 : vector<8x128xf32>, i32 -> vector<8x128xf32>
    %c32_i32_300 = arith.constant 32 : i32
    %692 = tpu.dynamic_rotate %689 by %c32_i32_300 dim 1 : vector<8x128xf32>, i32 -> vector<8x128xf32>
    %693 = arith.mulf %690, %675 : vector<8x128xf32>
    %694 = arith.mulf %689, %692 : vector<8x128xf32>
    %695 = arith.addf %693, %694 : vector<8x128xf32>
    %696 = math.tanh %695 : vector<8x128xf32>
    %697 = arith.mulf %691, %696 : vector<8x128xf32>
    %698 = tpu.concatenate %557, %577, %597, %617, %637, %657, %677, %697 in 0 : vector<8x128xf32>, vector<8x128xf32>, vector<8x128xf32>, vector<8x128xf32>, vector<8x128xf32>, vector<8x128xf32>, vector<8x128xf32>, vector<8x128xf32> -> vector<64x128xf32>
    %c0_301 = arith.constant 0 : index
    %c0_302 = arith.constant 0 : index
    %699 = vector.load %arg15[%c0_301, %c0_302] : memref<128x128xbf16, #tpu.memory_space<vmem>>, vector<128x128xbf16>
    %c0_303 = arith.constant 0 : index
    %c0_304 = arith.constant 0 : index
    %700 = vector.load %arg16[%c0_303, %c0_304] : memref<1x128xf32, #tpu.memory_space<vmem>>, vector<1x128xf32>
    %701 = arith.truncf %698 : vector<64x128xf32> to vector<64x128xbf16>
    %cst_305 = arith.constant dense<0.000000e+00> : vector<64x128xf32>
    %702 = tpu.matmul %701, %699, %cst_305 {dimension_numbers = #tpu.dot_dimension_numbers<[1], [0], [0], [1], [0, 0, 1, 1], [], []>} : vector<64x128xbf16>, vector<128x128xbf16>, vector<64x128xf32> -> vector<64x128xf32>
    %703 = vector.broadcast %700 : vector<1x128xf32> to vector<64x128xf32>
    %704 = arith.addf %702, %703 : vector<64x128xf32>
    %705 = vector.shape_cast %704 : vector<64x128xf32> to vector<8x8x128xf32>
    %c0_306 = arith.constant 0 : index
    %c0_307 = arith.constant 0 : index
    %c0_308 = arith.constant 0 : index
    %706 = vector.load %arg17[%c0_306, %c0_307, %c0_308] : memref<8x8x128xf32, #tpu.memory_space<vmem>>, vector<8x8x128xf32>
    tpu.vector_store %arg17[%c0_306, %c0_307, %c0_308], %705 {strides = array<i32>} : memref<8x8x128xf32, #tpu.memory_space<vmem>>, vector<8x8x128xf32>,
    return
  }
}

</mosaic_0001>

<bundles_post_ra>
// kernel: chain_lstm_forward.1
= control target key start
LH: loop header
LB: loop body
LE: loop exit
PB: predicated region body
PF: predicated region fallthrough
CT: control target
= control target key end

     0   :  { %s6577_s0 = inlined_call_operand.vmem [shape: f32[8,8,128], index: 0, kind: input, shape index: {}]   ;;  %s6578_s1 = inlined_call_operand.hbm [shape: bf16[128,128], index: 1, kind: input, shape index: {}]   ;;  %s6579_s2 = inlined_call_operand.hbm [shape: bf16[128,128], index: 2, kind: input, shape index: {}]   ;;  %s6580_s3 = inlined_call_operand.hbm [shape: f32[1,128], index: 3, kind: input, shape index: {}]   ;;  %s6581_s4 = inlined_call_operand.hbm [shape: bf16[128,128], index: 4, kind: input, shape index: {}]   ;;  %s6582_s5 = inlined_call_operand.hbm [shape: bf16[128,128], index: 5, kind: input, shape index: {}]   ;;  %s6583_s6 = inlined_call_operand.hbm [shape: f32[1,128], index: 6, kind: input, shape index: {}]   ;;  %s6584_s7 = inlined_call_operand.hbm [shape: bf16[128,128], index: 7, kind: input, shape index: {}]   ;;  %s6585_s8 = inlined_call_operand.hbm [shape: f32[1,128], index: 8, kind: input, shape index: {}]   ;;  %s6586_s9 = inlined_call_operand.hbm [shape: bf16[128,128], index: 9, kind: input, shape index: {}]   ;;  %s6587_s10 = inlined_call_operand.hbm [shape: bf16[128,128], index: 10, kind: input, shape index: {}]   ;;  %s6588_s11 = inlined_call_operand.hbm [shape: f32[1,128], index: 11, kind: input, shape index: {}]   ;;  %s6589_s12 = inlined_call_operand.hbm [shape: bf16[128,128], index: 12, kind: input, shape index: {}]   ;;  %s6590_s13 = inlined_call_operand.vmem [shape: bf16[128,128], index: 13, kind: input, shape index: {}]   ;;  %s6591_s14 = inlined_call_operand.vmem [shape: f32[1,128], index: 14, kind: input, shape index: {}]   ;;  %s6592_s15 = inlined_call_operand.vmem [shape: bf16[128,128], index: 15, kind: input, shape index: {}]   ;;  %s6593_s16 = inlined_call_operand.vmem [shape: f32[1,128], index: 16, kind: input, shape index: {}]   ;;  %s6594_s17 = inlined_call_operand.vmem [shape: f32[8,8,128], index: 17, kind: output, shape index: {}]  }
   0x1   :  { %6596 = sst [smem:[#allocation29_spill]] %s6577_s0 }
   0x2   :  { %6597 = sst [smem:[#allocation30_spill]] %s6578_s1 }
   0x3   :  { %22 = vsyncpa [#allocation4], 0 }
   0x4   :  { %23 = vsyncpa [#allocation6], 0 }
   0x5   :  { %24 = vsyncpa [#allocation9], 0 }
   0x6   :  { %25 = vsyncpa [#allocation12], 0 }
   0x7   :  { %26 = vsyncpa [#allocation15], 0 }
   0x8   :  { %27 = vsyncpa [#allocation18], 0 }
   0x9   :  { %28 = vsyncpa [#allocation21], 0  ;;  %s5228_s24 = smov [#allocation5]   ;;  %s5229_s26 = smov [#allocation8]  }
   0xa   :  { %s48_s25 = sshll.u32 %s5228_s24, 4  ;;  %s70_s27 = sshll.u32 %s5229_s26, 4  ;;  %s49_s25 = int_to_ptr.vmem [resolvable:$true] %s48_s25  ;;  %s71_s27 = int_to_ptr.vmem [resolvable:$true] %s70_s27 }
   0xb   :  { %s4982_s28 = scalar_lea.vmem %s49_s25, 1024  ;;  %p4987_p1 = scmp.lt.s32.totalorder %s49_s25, %s49_s25 }
   0xc   :  { %p4983_p0 = scmp.ne.s32.totalorder %s49_s25, %s4982_s28  ;;  %p4988_p2 = scmp.lt.s32.totalorder %s4982_s28, %s4982_s28 }
   0xe   :  { %p4989_p3 = por %p4988_p2, %p4987_p1 }
  0x10   :  { %p4990_p4 = pnand %p4989_p3, %p4983_p0 }
  0x12   :  { %4993 = shalt.err (!%p4990_p4)
}
  0x13   :  { %s5230_s29 = smov 64   ;;  %s5231_s0 = smov 4  }
  0x14   :  { %54 = dma.hbm_to_vmem [thread:$0]  %s6579_s2, 1024, %s49_s25, [#allocation6], %s5230_s29, %s5230_s29, %s5231_s0  }
  0x15   :  { %s5002_s19 = scalar_lea.vmem %s71_s27, 1024  ;;  %p5007_p6 = scmp.lt.s32.totalorder %s71_s27, %s71_s27 }
  0x16   :  { %p5003_p5 = scmp.ne.s32.totalorder %s71_s27, %s5002_s19  ;;  %p5008_p7 = scmp.lt.s32.totalorder %s5002_s19, %s5002_s19 }
  0x18   :  { %p5009_p8 = por %p5008_p7, %p5007_p6 }
  0x1a   :  { %p5010_p9 = pnand %p5009_p8, %p5003_p5 }
  0x1c   :  { %5013 = shalt.err (!%p5010_p9)
}
  0x1d   :  { %76 = dma.hbm_to_vmem [thread:$0]  %s6581_s4, 1024, %s71_s27, [#allocation9], %s5230_s29, %s5230_s29, %s5231_s0  }
  0x1e   :  { %s5232_s21 = smov [#allocation11]   ;;  %s5233_s23 = smov [#allocation14]  }
  0x1f   :  { %s95_s22 = sshll.u32 %s5232_s21, 4  ;;  %s117_s24 = sshll.u32 %s5233_s23, 4  ;;  %s96_s22 = int_to_ptr.vmem [resolvable:$true] %s95_s22  ;;  %s118_s24 = int_to_ptr.vmem [resolvable:$true] %s117_s24 }
  0x20   :  { %s5022_s2 = scalar_lea.vmem %s96_s22, 16  ;;  %s5026_s25 = scalar_lea.vmem %s96_s22, 32 }
  0x21   :  { %p5023_p10 = scmp.ne.s32.totalorder %s96_s22, %s5022_s2  ;;  %p5027_p11 = scmp.lt.s32.totalorder %s96_s22, %s96_s22 }
  0x22   :  { %p5028_p12 = scmp.lt.s32.totalorder %s5026_s25, %s5022_s2 }
  0x24   :  { %p5029_p13 = por %p5028_p12, %p5027_p11 }
  0x26   :  { %p5030_p0 = pnand %p5029_p13, %p5023_p10 }
  0x28   :  { %5033 = shalt.err (!%p5030_p0)
}
  0x29   :  { %98 = dma.hbm_to_vmem [thread:$0]  %s6583_s6, 16, %s96_s22, [#allocation12]  }
  0x2a   :  { %s5042_s30 = scalar_lea.vmem %s118_s24, 16  ;;  %s5046_s4 = scalar_lea.vmem %s118_s24, 32 }
  0x2b   :  { %p5043_p1 = scmp.ne.s32.totalorder %s118_s24, %s5042_s30  ;;  %p5047_p2 = scmp.lt.s32.totalorder %s118_s24, %s118_s24 }
  0x2c   :  { %p5048_p3 = scmp.lt.s32.totalorder %s5046_s4, %s5042_s30 }
  0x2e   :  { %p5049_p4 = por %p5048_p3, %p5047_p2 }
  0x30   :  { %p5050_p5 = pnand %p5049_p4, %p5043_p1 }
  0x32   :  { %5053 = shalt.err (!%p5050_p5)
}
  0x33   :  { %120 = dma.hbm_to_vmem [thread:$0]  %s6585_s8, 16, %s118_s24, [#allocation15]  }
  0x34   :  { %s5234_s19 = smov [#allocation17]   ;;  %s5235_s20 = smov [#allocation3]  }
  0x35   :  { %s138_s1 = sshll.u32 %s5234_s19, 4  ;;  %s36_s21 = sshll.u32 %s5235_s20, 4  ;;  %s139_s1 = int_to_ptr.vmem [resolvable:$true] %s138_s1  ;;  %s37_s21 = int_to_ptr.vmem [resolvable:$true] %s36_s21 }
  0x36   :  { %s5062_s23 = scalar_lea.vmem %s139_s1, 1024  ;;  %p5067_p7 = scmp.lt.s32.totalorder %s139_s1, %s139_s1 }
  0x37   :  { %p5063_p6 = scmp.ne.s32.totalorder %s139_s1, %s5062_s23  ;;  %p5068_p8 = scmp.lt.s32.totalorder %s5062_s23, %s5062_s23 }
  0x39   :  { %p5069_p9 = por %p5068_p8, %p5067_p7 }
  0x3b   :  { %p5070_p10 = pnand %p5069_p9, %p5063_p6 }
  0x3d   :  { %5073 = shalt.err (!%p5070_p10)
}
  0x3e   :  { %144 = dma.hbm_to_vmem [thread:$0]  %s6587_s10, 1024, %s139_s1, [#allocation18], %s5230_s29, %s5230_s29, %s5231_s0  }
  0x3f   :  { %s5082_s8 = scalar_lea.vmem %s37_s21, 1024  ;;  %p5087_p12 = scmp.lt.s32.totalorder %s37_s21, %s37_s21 }
  0x40   :  { %p5083_p11 = scmp.ne.s32.totalorder %s37_s21, %s5082_s8  ;;  %p5088_p13 = scmp.lt.s32.totalorder %s5082_s8, %s5082_s8 }
  0x42   :  { %p5089_p0 = por %p5088_p13, %p5087_p12 }
  0x44   :  { %p5090_p1 = pnand %p5089_p0, %p5083_p11 }
  0x46   :  { %5093 = shalt.err (!%p5090_p1)
}
  0x47   :  { %s6598_s25 = sld [smem:[#allocation30_spill]]  ;;  %s5236_s26 = smov [#allocation7]  }
  0x48   :  { %s61_s28 = sshll.u32 %s5236_s26, 4  ;;  %s5237_s30 = smov [#allocation10]   ;;  %s62_s28 = int_to_ptr.vmem [resolvable:$true] %s61_s28 }
  0x49   :  { %s82_s4 = sshll.u32 %s5237_s30, 4  ;;  %s5102_s10 = scalar_lea.vmem %s62_s28, 16  ;;  %s83_s4 = int_to_ptr.vmem [resolvable:$true] %s82_s4 }
  0x4a   :  { %p5103_p2 = scmp.ne.s32.totalorder %s62_s28, %s5102_s10  ;;  %s5106_s27 = scalar_lea.vmem %s62_s28, 32 }
  0x4b   :  { %p5107_p3 = scmp.lt.s32.totalorder %s62_s28, %s62_s28  ;;  %p5108_p4 = scmp.lt.s32.totalorder %s5106_s27, %s5102_s10 }
  0x4d   :  { %42 = dma.hbm_to_vmem [thread:$0]  %s6598_s25, 1024, %s37_s21, [#allocation4], %s5230_s29, %s5230_s29, %s5231_s0  }
  0x4e   :  { %p5109_p5 = por %p5108_p4, %p5107_p3 }
  0x50   :  { %p5110_p6 = pnand %p5109_p5, %p5103_p2 }
  0x52   :  { %5113 = shalt.err (!%p5110_p6)
}
  0x53   :  { %64 = dma.hbm_to_vmem [thread:$0]  %s6580_s3, 16, %s62_s28, [#allocation6]  }
  0x54   :  { %s5122_s1 = scalar_lea.vmem %s83_s4, 1024  ;;  %p5127_p8 = scmp.lt.s32.totalorder %s83_s4, %s83_s4 }
  0x55   :  { %p5123_p7 = scmp.ne.s32.totalorder %s83_s4, %s5122_s1  ;;  %p5128_p9 = scmp.lt.s32.totalorder %s5122_s1, %s5122_s1 }
  0x57   :  { %p5129_p10 = por %p5128_p9, %p5127_p8 }
  0x59   :  { %p5130_p11 = pnand %p5129_p10, %p5123_p7 }
  0x5b   :  { %5133 = shalt.err (!%p5130_p11)
}
  0x5c   :  { %88 = dma.hbm_to_vmem [thread:$0]  %s6582_s5, 1024, %s83_s4, [#allocation9], %s5230_s29, %s5230_s29, %s5231_s0  }
  0x5d   :  { %s5238_s23 = smov [#allocation13]   ;;  %s5239_s22 = smov [#allocation16]  }
  0x5e   :  { %s104_s6 = sshll.u32 %s5238_s23, 4  ;;  %s126_s8 = sshll.u32 %s5239_s22, 4  ;;  %s105_s6 = int_to_ptr.vmem [resolvable:$true] %s104_s6  ;;  %s127_s8 = int_to_ptr.vmem [resolvable:$true] %s126_s8 }
  0x5f   :  { %s5142_s3 = scalar_lea.vmem %s105_s6, 1024  ;;  %p5147_p13 = scmp.lt.s32.totalorder %s105_s6, %s105_s6 }
  0x60   :  { %p5143_p12 = scmp.ne.s32.totalorder %s105_s6, %s5142_s3  ;;  %p5148_p0 = scmp.lt.s32.totalorder %s5142_s3, %s5142_s3 }
  0x62   :  { %p5149_p1 = por %p5148_p0, %p5147_p13 }
  0x64   :  { %p5150_p2 = pnand %p5149_p1, %p5143_p12 }
  0x66   :  { %5153 = shalt.err (!%p5150_p2)
}
  0x67   :  { %110 = dma.hbm_to_vmem [thread:$0]  %s6584_s7, 1024, %s105_s6, [#allocation12], %s5230_s29, %s5230_s29, %s5231_s0  }
  0x68   :  { %s5162_s5 = scalar_lea.vmem %s127_s8, 1024  ;;  %p5167_p4 = scmp.lt.s32.totalorder %s127_s8, %s127_s8 }
  0x69   :  { %p5163_p3 = scmp.ne.s32.totalorder %s127_s8, %s5162_s5  ;;  %p5168_p5 = scmp.lt.s32.totalorder %s5162_s5, %s5162_s5 }
  0x6b   :  { %p5169_p6 = por %p5168_p5, %p5167_p4 }
  0x6d   :  { %p5170_p7 = pnand %p5169_p6, %p5163_p3 }
  0x6f   :  { %5173 = shalt.err (!%p5170_p7)
}
  0x70   :  { %132 = dma.hbm_to_vmem [thread:$0]  %s6586_s9, 1024, %s127_s8, [#allocation15], %s5230_s29, %s5230_s29, %s5231_s0  }
  0x71   :  { %s5240_s28 = smov [#allocation19]   ;;  %s5241_s4 = smov [#allocation20]  }
  0x72   :  { %s151_s30 = sshll.u32 %s5240_s28, 4  ;;  %s160_s10 = sshll.u32 %s5241_s4, 4  ;;  %s152_s30 = int_to_ptr.vmem [resolvable:$true] %s151_s30  ;;  %s161_s10 = int_to_ptr.vmem [resolvable:$true] %s160_s10 }
  0x73   :  { %s5182_s7 = scalar_lea.vmem %s152_s30, 16  ;;  %s5186_s27 = scalar_lea.vmem %s152_s30, 32 }
  0x74   :  { %p5183_p8 = scmp.ne.s32.totalorder %s152_s30, %s5182_s7  ;;  %p5187_p9 = scmp.lt.s32.totalorder %s152_s30, %s152_s30 }
  0x75   :  { %p5188_p10 = scmp.lt.s32.totalorder %s5186_s27, %s5182_s7 }
  0x77   :  { %p5189_p11 = por %p5188_p10, %p5187_p9 }
  0x79   :  { %p5190_p12 = pnand %p5189_p11, %p5183_p8 }
  0x7b   :  { %5193 = shalt.err (!%p5190_p12)
}
  0x7c   :  { %154 = dma.hbm_to_vmem [thread:$0]  %s6588_s11, 16, %s152_s30, [#allocation18]  }
  0x7d   :  { %s5202_s1 = scalar_lea.vmem %s161_s10, 1024  ;;  %p5207_p0 = scmp.lt.s32.totalorder %s161_s10, %s161_s10 }
  0x7e   :  { %p5203_p13 = scmp.ne.s32.totalorder %s161_s10, %s5202_s1  ;;  %p5208_p1 = scmp.lt.s32.totalorder %s5202_s1, %s5202_s1 }
  0x80   :  { %p5209_p2 = por %p5208_p1, %p5207_p0 }
  0x82   :  { %p5210_p3 = pnand %p5209_p2, %p5203_p13 }
  0x84   :  { %5213 = shalt.err (!%p5210_p3)
}
  0x85   :  { %166 = dma.hbm_to_vmem [thread:$0]  %s6589_s12, 1024, %s161_s10, [#allocation21], %s5230_s29, %s5230_s29, %s5231_s0  }
  0x86   :  { %5214 = dma.done.wait [#allocation4], 1024  }
  0x87   :  { %5215 = vsyncadd [#allocation4], 4294966272 }
  0x88   :  { %5216 = dma.done.wait [#allocation6], 1040  }
  0x89   :  { %5217 = vsyncadd [#allocation6], 4294966256 }
  0x8a   :  { %5218 = dma.done.wait [#allocation9], 2048  }
  0x8b   :  { %5219 = vsyncadd [#allocation9], 4294965248 }
  0x8c   :  { %5220 = dma.done.wait [#allocation12], 1040  }
  0x8d   :  { %5221 = vsyncadd [#allocation12], 4294966256 }
  0x8e   :  { %5222 = dma.done.wait [#allocation15], 1040  }
  0x8f   :  { %5223 = vsyncadd [#allocation15], 4294966256 }
  0x90   :  { %5224 = dma.done.wait [#allocation18], 1040  }
  0x91   :  { %5225 = vsyncadd [#allocation18], 4294966256 }
  0x92   :  { %5226 = dma.done.wait [#allocation21], 1024  }
  0x93   :  { %5227 = vsyncadd [#allocation21], 4294966272  ;;  %v5242_v0 = vmov 0.0   ;;  %vm5243_vm0 = vmmov 0   ;;  %v4638_v1 = vld [vmem:[#allocation3 + $0x38] sm:$0xff]   ;;  %v4640_v3 = vld [vmem:[#allocation3 + $0x30] sm:$0xff]   ;;  %v220_v36 = vlaneseq }
  0x94   :  { %3859 = vmatprep.subr.bf16.mxu1 %v5242_v0  ;;  %3875 = vmatprep.mubr.msk.bf16.mxu1 %vm5243_vm0, %v5242_v0  ;;  %v5400_v2 = vld [vmem:[#allocation5 + $0x38] sm:$0xff]   ;;  %v5403_v4 = vld [vmem:[#allocation5 + $0x30] sm:$0xff]   ;;  %v4642_v5 = vld [vmem:[#allocation3 + $0x28] sm:$0xff]   ;;  %s6599_s0 = sld [smem:[#allocation29_spill]]  ;;  %v5244_v23 = vmov 0   ;;  %s5245_s10 = smov 96  }
  0x95   :  { %3835 = vmatprep.subr.bf16.mxu0 %v4638_v1  ;;  %3860 = vmatpush3.bf16.msra.mxu1 %v5400_v2  ;;  %v5407_v6 = vld [vmem:[#allocation5 + $0x28] sm:$0xff]   ;;  %v4644_v7 = vld [vmem:[#allocation3 + $0x20] sm:$0xff]   ;;  %v4646_v9 = vld [vmem:[#allocation3 + $0x18] sm:$0xff]   ;;  %v5485_v37 = vand.u32 127, %v220_v36  ;;  %s5246_s7 = smov 32  }
  0x96   :  { %3836 = vmatpush3.bf16.msra.mxu0 %v4638_v1  ;;  %3861 = vmatprep.subr.bf16.mxu1 %v5242_v0  ;;  %v5411_v8 = vld [vmem:[#allocation5 + $0x20] sm:$0xff]   ;;  %v5415_v10 = vld [vmem:[#allocation5 + $0x18] sm:$0xff]   ;;  %v4648_v11 = vld [vmem:[#allocation3 + $0x10] sm:$0xff]  }
  0x97   :  { %3837 = vmatprep.subr.bf16.mxu0 %v4640_v3  ;;  %v5424_v14 = vld [vmem:[#allocation5 + $0x10] sm:$0xff]   ;;  %v4650_v16 = vld [vmem:[#allocation3 + $0x8] sm:$0xff]   ;;  %v4652_v18 = vld [vmem:[#allocation3] sm:$0xff]   ;;  %vm222_vm1 = vcmp.lt.s32.totalorder %v5485_v37, 96 }
  0x98   :  { %v5428_v17 = vld [vmem:[#allocation5 + $0x8] sm:$0xff]   ;;  %v5432_v19 = vld [vmem:[#allocation5] sm:$0xff]  }
  0x99   :  { %3862 = vmatpush3.bf16.msra.mxu1 %v5403_v4  ;;  %v5482_v26 = vld [vmem:[#allocation7] ss:$0 sm:$0xff] }
  0x9a   :  { %3838 = vmatpush3.bf16.msra.mxu0 %v4640_v3  ;;  %3863 = vmatprep.subr.bf16.mxu1 %v5242_v0  ;;  %v212_v12 = vld [vmem:[%s6599_s0] sm:$0xff]  ;;  %v213_v13 = vld [vmem:[%s6599_s0 + $0x8] sm:$0xff]  ;;  %v214_v20 = vld [vmem:[%s6599_s0 + $0x10] sm:$0xff] }
  0x9b   :  { %3839 = vmatprep.subr.bf16.mxu0 %v4642_v5  ;;  %v256_v15 = vpack.c.bf16 %v213_v13, %v212_v12  ;;  %v215_v21 = vld [vmem:[%s6599_s0 + $0x18] sm:$0xff]  ;;  %v216_v38 = vld [vmem:[%s6599_s0 + $0x20] sm:$0xff]  ;;  %v217_v39 = vld [vmem:[%s6599_s0 + $0x28] sm:$0xff] }
  0x9c   :  { %v257_v22 = vpack.c.bf16 %v215_v21, %v214_v20  ;;  %v218_v40 = vld [vmem:[%s6599_s0 + $0x30] sm:$0xff]  ;;  %v258_v41 = vpack.c.bf16 %v217_v39, %v216_v38  ;;  %v219_v42 = vld [vmem:[%s6599_s0 + $0x38] sm:$0xff] }
  0x9d   :  { %3864 = vmatpush3.bf16.msra.mxu1 %v5407_v6  ;;  %3851 = vmatprep.mubr.bf16.mxu0 %v256_v15  ;;  %v259_v44 = vpack.c.bf16 %v219_v42, %v218_v40 }
  0x9e   :  { %3840 = vmatpush3.bf16.msra.mxu0 %v4642_v5  ;;  %3865 = vmatprep.subr.bf16.mxu1 %v5242_v0 }
  0x9f   :  { %3841 = vmatprep.subr.bf16.mxu0 %v4644_v7 }
  0xa1   :  { %3866 = vmatpush3.bf16.msra.mxu1 %v5411_v8 }
  0xa2   :  { %3842 = vmatpush3.bf16.msra.mxu0 %v4644_v7  ;;  %3867 = vmatprep.subr.bf16.mxu1 %v5242_v0 }
  0xa3   :  { %3843 = vmatprep.subr.bf16.mxu0 %v4646_v9 }
  0xa5   :  { %3868 = vmatpush3.bf16.msra.mxu1 %v5415_v10 }
  0xa6   :  { %3844 = vmatpush3.bf16.msra.mxu0 %v4646_v9  ;;  %3869 = vmatprep.subr.bf16.mxu1 %v5242_v0 }
  0xa7   :  { %3845 = vmatprep.subr.bf16.mxu0 %v4648_v11 }
  0xa9   :  { %3870 = vmatpush3.bf16.msra.mxu1 %v5424_v14 }
  0xaa   :  { %3846 = vmatpush3.bf16.msra.mxu0 %v4648_v11  ;;  %3871 = vmatprep.subr.bf16.mxu1 %v5242_v0 }
  0xab   :  { %3847 = vmatprep.subr.bf16.mxu0 %v4650_v16 }
  0xad   :  { %3872 = vmatpush3.bf16.msra.mxu1 %v5428_v17 }
  0xae   :  { %3848 = vmatpush3.bf16.msra.mxu0 %v4650_v16  ;;  %3873 = vmatprep.subr.bf16.mxu1 %v5242_v0 }
  0xaf   :  { %3849 = vmatprep.subr.bf16.mxu0 %v4652_v18 }
  0xb1   :  { %3874 = vmatpush3.bf16.msra.mxu1 %v5432_v19 }
  0xb2   :  { %3850 = vmatpush3.bf16.msra.mxu0 %v4652_v18  ;;  %3899 = vmatprep.subr.bf16.mxu1 %v5242_v0 }
  0xb3   :  { %3879 = vmatprep.subr.bf16.mxu0 %v5242_v0 }
  0xb4   :  { %3876 = vmatmul.mubr.bf16.vlgmr.msra.gmra.mxu1 %v5244_v23 }
  0xb5   :  { %3852 = vmatmul.mubr.bf16.vlgmr.msra.gmra.mxu0 %v257_v22  ;;  %3900 = vmatpush3.bf16.msra.mxu1 %v5400_v2 }
  0xb6   :  { %3880 = vmatpush3.bf16.msra.mxu0 %v5400_v2  ;;  %3901 = vmatprep.subr.bf16.mxu1 %v5242_v0 }
  0xb7   :  { %3881 = vmatprep.subr.bf16.mxu0 %v5242_v0  ;;  %3915 = vmatprep.mubr.msk.bf16.mxu1 %vm5243_vm0, %v5242_v0 }
  0xb8   :  { %3855 = vmatprep.mubr.bf16.mxu0 %v258_v41 }
  0xb9   :  { %3902 = vmatpush3.bf16.msra.mxu1 %v5403_v4 }
  0xba   :  { %3882 = vmatpush3.bf16.msra.mxu0 %v5403_v4  ;;  %3903 = vmatprep.subr.bf16.mxu1 %v5242_v0 }
  0xbb   :  { %3883 = vmatprep.subr.bf16.mxu0 %v5242_v0 }
  0xbd   :  { %3904 = vmatpush3.bf16.msra.mxu1 %v5407_v6  ;;  %3856 = vmatmul.mubr.bf16.gmra.mxu0 %v259_v44 }
  0xbe   :  { %3884 = vmatpush3.bf16.msra.mxu0 %v5407_v6  ;;  %3905 = vmatprep.subr.bf16.mxu1 %v5242_v0 }
  0xbf   :  { %3885 = vmatprep.subr.bf16.mxu0 %v5242_v0  ;;  %3895 = vmatprep.mubr.msk.bf16.mxu0 %vm5243_vm0, %v5242_v0 }
  0xc1   :  { %3906 = vmatpush3.bf16.msra.mxu1 %v5411_v8 }
  0xc2   :  { %3886 = vmatpush3.bf16.msra.mxu0 %v5411_v8  ;;  %3907 = vmatprep.subr.bf16.mxu1 %v5242_v0 }
  0xc3   :  { %3887 = vmatprep.subr.bf16.mxu0 %v5242_v0 }
  0xc5   :  { %3908 = vmatpush3.bf16.msra.mxu1 %v5415_v10 }
  0xc6   :  { %3888 = vmatpush3.bf16.msra.mxu0 %v5415_v10  ;;  %3909 = vmatprep.subr.bf16.mxu1 %v5242_v0 }
  0xc7   :  { %3889 = vmatprep.subr.bf16.mxu0 %v5242_v0 }
  0xc9   :  { %3910 = vmatpush3.bf16.msra.mxu1 %v5424_v14 }
  0xca   :  { %3890 = vmatpush3.bf16.msra.mxu0 %v5424_v14  ;;  %3911 = vmatprep.subr.bf16.mxu1 %v5242_v0 }
  0xcb   :  { %3891 = vmatprep.subr.bf16.mxu0 %v5242_v0 }
  0xcd   :  { %3912 = vmatpush3.bf16.msra.mxu1 %v5428_v17 }
  0xce   :  { %3892 = vmatpush3.bf16.msra.mxu0 %v5428_v17  ;;  %3913 = vmatprep.subr.bf16.mxu1 %v5242_v0 }
  0xcf   :  { %3893 = vmatprep.subr.bf16.mxu0 %v5242_v0 }
  0xd1   :  { %3914 = vmatpush3.bf16.msra.mxu1 %v5432_v19 }
  0xd2   :  { %3894 = vmatpush3.bf16.msra.mxu0 %v5432_v19  ;;  %3939 = vmatprep.subr.bf16.mxu1 %v5242_v0 }
  0xd3   :  { %3919 = vmatprep.subr.bf16.mxu0 %v5242_v0 }
 0x174   :  { %v470_v24 = vpop.f32.mrf.mxu1 }
 0x175   :  { %v5480_v25 = vpop.f32.mrf.mxu0 }
 0x176   :  { %v3877_v27 = vpop.f32.mrf.mxu1 }
 0x177   :  { %v348_v28 = vpop.f32.mrf.mxu0 }
 0x178   :  { %v349_v29 = vadd.f32 %v5482_v26, %v348_v28  ;;  %v473_v30 = vpop.f32.mrf.mxu1 }
 0x179   :  { %v5529_v56 = vpop.f32.mrf.mxu0 }
 0x17a   :  { %v476_v31 = vadd.f32 %v470_v24, %v349_v29  ;;  %v3878_v32 = vpop.f32.mrf.mxu1 }
 0x17b   :  { %v351_v57 = vpop.f32.mrf.mxu0 }
 0x17c   :  { %v3374_v33 = vmul.f32 -1.442695, %v476_v31  ;;  %v352_v62 = vadd.f32 %v5482_v26, %v351_v57 }
 0x17d   :  { %v5531_v58 = vpop.f32.mrf.mxu0 }
 0x17e   :  { %4718 = vpow2.f32 %v3374_v33 }
 0x17f   :  { %4720 = vtanh.f32 %v476_v31  ;;  %v5533_v59 = vpop.f32.mrf.mxu0  ;;  %v357_v31 = vadd.f32 %v5480_v25, %v5482_v26 }
 0x181   :  { %v5535_v60 = vpop.f32.mrf.mxu0 }
 0x183   :  { %v5537_v61 = vpop.f32.mrf.mxu0 }
 0x18b   :  { %v4719_v34 = vpop.eup %4718 }
 0x18c   :  { %v480_v35 = vadd.f32 1.0, %v4719_v34  ;;  %v4721_v43 = vpop.eup %4720 }
 0x18e   :  { %4722 = vrcp.f32 %v480_v35 }
 0x19b   :  { %v4723_v45 = vpop.eup %4722 }
 0x19c   :  { %v484_v46 = vsel %vm222_vm1, %v4723_v45, %v4721_v43 }
 0x19d   :  { %487 = vrot.lane.b32.xlu1 %v484_v46, %s5230_s29  ;;  %485 = vrot.lane.b32.xlu0 %v484_v46, %s5245_s10 }
 0x1a1   :  { %489 = vrot.lane.b32.xlu0 %v484_v46, %s5246_s7 }
 0x20f   :  { %v486_v47 = vpop.permute.xlu0 %485  ;;  %v488_v53 = vpop.permute.xlu1 %487 }
 0x210   :  { %v491_v49 = vmul.f32 0.0, %v486_v47 }
 0x213   :  { %v490_v48 = vpop.permute.xlu0 %489 }
 0x214   :  { %v492_v50 = vmul.f32 %v490_v48, %v484_v46 }
 0x216   :  { %v493_v51 = vadd.f32 %v492_v50, %v491_v49 }
 0x218   :  { %4724 = vtanh.f32 %v493_v51 }
 0x225   :  { %v4725_v52 = vpop.eup %4724 }
 0x226   :  { %v5507_v54 = vmul.f32 %v4725_v52, %v488_v53  ;;  %v360_v52 = vadd.f32 %v5529_v56, %v5482_v26 }
 0x228   :  { %v498_v55 = vpack.c.bf16 %v5507_v54, %v5507_v54 }
 0x22a   :  { %3896 = vmatmul.mubr.bf16.vlgmr.msra.gmra.mxu0 %v498_v55 }
 0x22b   :  { %3920 = vmatpush3.bf16.msra.mxu0 %v5400_v2  ;;  %3935 = vmatprep.mubr.msk.bf16.mxu0 %vm5243_vm0, %v5242_v0 }
 0x22c   :  { %3921 = vmatprep.subr.bf16.mxu0 %v5242_v0 }
 0x22f   :  { %3922 = vmatpush3.bf16.msra.mxu0 %v5403_v4 }
 0x230   :  { %3923 = vmatprep.subr.bf16.mxu0 %v5242_v0 }
 0x233   :  { %3924 = vmatpush3.bf16.msra.mxu0 %v5407_v6 }
 0x234   :  { %3925 = vmatprep.subr.bf16.mxu0 %v5242_v0 }
 0x237   :  { %3926 = vmatpush3.bf16.msra.mxu0 %v5411_v8 }
 0x238   :  { %3927 = vmatprep.subr.bf16.mxu0 %v5242_v0 }
 0x23b   :  { %3928 = vmatpush3.bf16.msra.mxu0 %v5415_v10 }
 0x23c   :  { %3929 = vmatprep.subr.bf16.mxu0 %v5242_v0 }
 0x23f   :  { %3930 = vmatpush3.bf16.msra.mxu0 %v5424_v14 }
 0x240   :  { %3931 = vmatprep.subr.bf16.mxu0 %v5242_v0 }
 0x243   :  { %3932 = vmatpush3.bf16.msra.mxu0 %v5428_v17 }
 0x244   :  { %3933 = vmatprep.subr.bf16.mxu0 %v5242_v0 }
 0x247   :  { %3934 = vmatpush3.bf16.msra.mxu0 %v5432_v19 }
 0x248   :  { %3959 = vmatprep.subr.bf16.mxu0 %v5242_v0 }
 0x2ea   :  { %v533_v63 = vpop.f32.mrf.mxu0 }
 0x2eb   :  { %v539_v1 = vadd.f32 %v533_v63, %v352_v62 }
 0x2ec   :  { %v3897_v3 = vpop.f32.mrf.mxu0 }
 0x2ed   :  { %v3375_v5 = vmul.f32 -1.442695, %v539_v1 }
 0x2ee   :  { %v536_v7 = vpop.f32.mrf.mxu0 }
 0x2ef   :  { %4726 = vpow2.f32 %v3375_v5 }
 0x2f0   :  { %v3898_v9 = vpop.f32.mrf.mxu0  ;;  %4728 = vtanh.f32 %v539_v1 }
 0x2fc   :  { %v4727_v11 = vpop.eup %4726 }
 0x2fd   :  { %v543_v12 = vadd.f32 1.0, %v4727_v11  ;;  %v4729_v13 = vpop.eup %4728 }
 0x2ff   :  { %4730 = vrcp.f32 %v543_v12 }
 0x30c   :  { %v4731_v15 = vpop.eup %4730 }
 0x30d   :  { %v547_v16 = vsel %vm222_vm1, %v4731_v15, %v4729_v13 }
 0x30e   :  { %552 = vrot.lane.b32.xlu0 %v547_v16, %s5246_s7  ;;  %548 = vrot.lane.b32.xlu1 %v547_v16, %s5245_s10 }
 0x312   :  { %550 = vrot.lane.b32.xlu1 %v547_v16, %s5230_s29 }
 0x380   :  { %v553_v18 = vpop.permute.xlu0 %552  ;;  %v549_v20 = vpop.permute.xlu1 %548 }
 0x381   :  { %v555_v21 = vmul.f32 %v553_v18, %v547_v16  ;;  %v554_v22 = vmul.f32 %v549_v20, %v493_v51 }
 0x383   :  { %v556_v24 = vadd.f32 %v555_v21, %v554_v22 }
 0x384   :  { %v551_v28 = vpop.permute.xlu1 %550 }
 0x385   :  { %4732 = vtanh.f32 %v556_v24 }
 0x392   :  { %v4733_v27 = vpop.eup %4732 }
 0x393   :  { %v5545_v29 = vmul.f32 %v4733_v27, %v551_v28 }
 0x395   :  { %v561_v30 = vpack.c.bf16 %v5545_v29, %v5545_v29 }
 0x397   :  { %3916 = vmatmul.mubr.bf16.vlgmr.msra.gmra.mxu1 %v561_v30 }
 0x398   :  { %3940 = vmatpush3.bf16.msra.mxu1 %v5400_v2  ;;  %3955 = vmatprep.mubr.msk.bf16.mxu1 %vm5243_vm0, %v5242_v0 }
 0x399   :  { %3941 = vmatprep.subr.bf16.mxu1 %v5242_v0 }
 0x39c   :  { %3942 = vmatpush3.bf16.msra.mxu1 %v5403_v4 }
 0x39d   :  { %3943 = vmatprep.subr.bf16.mxu1 %v5242_v0 }
 0x3a0   :  { %3944 = vmatpush3.bf16.msra.mxu1 %v5407_v6 }
 0x3a1   :  { %3945 = vmatprep.subr.bf16.mxu1 %v5242_v0 }
 0x3a4   :  { %3946 = vmatpush3.bf16.msra.mxu1 %v5411_v8 }
 0x3a5   :  { %3947 = vmatprep.subr.bf16.mxu1 %v5242_v0 }
 0x3a8   :  { %3948 = vmatpush3.bf16.msra.mxu1 %v5415_v10 }
 0x3a9   :  { %3949 = vmatprep.subr.bf16.mxu1 %v5242_v0 }
 0x3ac   :  { %3950 = vmatpush3.bf16.msra.mxu1 %v5424_v14 }
 0x3ad   :  { %3951 = vmatprep.subr.bf16.mxu1 %v5242_v0 }
 0x3b0   :  { %3952 = vmatpush3.bf16.msra.mxu1 %v5428_v17 }
 0x3b1   :  { %3953 = vmatprep.subr.bf16.mxu1 %v5242_v0 }
 0x3b4   :  { %3954 = vmatpush3.bf16.msra.mxu1 %v5432_v19 }
 0x3b5   :  { %3979 = vmatprep.subr.bf16.mxu1 %v5242_v0 }
 0x457   :  { %v596_v32 = vpop.f32.mrf.mxu1 }
 0x458   :  { %v602_v33 = vadd.f32 %v596_v32, %v357_v31 }
 0x459   :  { %v3917_v34 = vpop.f32.mrf.mxu1 }
 0x45a   :  { %v3376_v35 = vmul.f32 -1.442695, %v602_v33 }
 0x45b   :  { %v599_v36 = vpop.f32.mrf.mxu1 }
 0x45c   :  { %4734 = vpow2.f32 %v3376_v35 }
 0x45d   :  { %v3918_v38 = vpop.f32.mrf.mxu1  ;;  %4736 = vtanh.f32 %v602_v33 }
 0x469   :  { %v4735_v39 = vpop.eup %4734 }
 0x46a   :  { %v606_v40 = vadd.f32 1.0, %v4735_v39  ;;  %v4737_v41 = vpop.eup %4736 }
 0x46c   :  { %4738 = vrcp.f32 %v606_v40 }
 0x479   :  { %v4739_v42 = vpop.eup %4738 }
 0x47a   :  { %v610_v43 = vsel %vm222_vm1, %v4739_v42, %v4737_v41 }
 0x47b   :  { %615 = vrot.lane.b32.xlu1 %v610_v43, %s5246_s7  ;;  %611 = vrot.lane.b32.xlu0 %v610_v43, %s5245_s10 }
 0x47f   :  { %613 = vrot.lane.b32.xlu0 %v610_v43, %s5230_s29 }
 0x4ed   :  { %v616_v25 = vpop.permute.xlu1 %615  ;;  %v612_v44 = vpop.permute.xlu0 %611 }
 0x4ee   :  { %v618_v45 = vmul.f32 %v616_v25, %v610_v43  ;;  %v617_v46 = vmul.f32 %v612_v44, %v556_v24  ;;  %v365_v24 = vadd.f32 %v5482_v26, %v5533_v59 }
 0x4f0   :  { %v619_v47 = vadd.f32 %v618_v45, %v617_v46 }
 0x4f1   :  { %v614_v49 = vpop.permute.xlu0 %613 }
 0x4f2   :  { %4740 = vtanh.f32 %v619_v47 }
 0x4ff   :  { %v4741_v48 = vpop.eup %4740 }
 0x500   :  { %v5574_v50 = vmul.f32 %v4741_v48, %v614_v49 }
 0x502   :  { %v624_v51 = vpack.c.bf16 %v5574_v50, %v5574_v50 }
 0x504   :  { %3936 = vmatmul.mubr.bf16.vlgmr.msra.gmra.mxu0 %v624_v51 }
 0x505   :  { %3960 = vmatpush3.bf16.msra.mxu0 %v5400_v2  ;;  %3975 = vmatprep.mubr.msk.bf16.mxu0 %vm5243_vm0, %v5242_v0 }
 0x506   :  { %3961 = vmatprep.subr.bf16.mxu0 %v5242_v0 }
 0x509   :  { %3962 = vmatpush3.bf16.msra.mxu0 %v5403_v4 }
 0x50a   :  { %3963 = vmatprep.subr.bf16.mxu0 %v5242_v0 }
 0x50d   :  { %3964 = vmatpush3.bf16.msra.mxu0 %v5407_v6 }
 0x50e   :  { %3965 = vmatprep.subr.bf16.mxu0 %v5242_v0 }
 0x511   :  { %3966 = vmatpush3.bf16.msra.mxu0 %v5411_v8 }
 0x512   :  { %3967 = vmatprep.subr.bf16.mxu0 %v5242_v0 }
 0x515   :  { %3968 = vmatpush3.bf16.msra.mxu0 %v5415_v10 }
 0x516   :  { %3969 = vmatprep.subr.bf16.mxu0 %v5242_v0 }
 0x519   :  { %3970 = vmatpush3.bf16.msra.mxu0 %v5424_v14 }
 0x51a   :  { %3971 = vmatprep.subr.bf16.mxu0 %v5242_v0 }
 0x51d   :  { %3972 = vmatpush3.bf16.msra.mxu0 %v5428_v17 }
 0x51e   :  { %3973 = vmatprep.subr.bf16.mxu0 %v5242_v0 }
 0x521   :  { %3974 = vmatpush3.bf16.msra.mxu0 %v5432_v19 }
 0x522   :  { %3999 = vmatprep.subr.bf16.mxu0 %v5242_v0 }
 0x5c4   :  { %v659_v53 = vpop.f32.mrf.mxu0 }
 0x5c5   :  { %v665_v55 = vadd.f32 %v659_v53, %v360_v52 }
 0x5c6   :  { %v3937_v57 = vpop.f32.mrf.mxu0 }
 0x5c7   :  { %v3377_v62 = vmul.f32 -1.442695, %v665_v55 }
 0x5c8   :  { %v662_v63 = vpop.f32.mrf.mxu0 }
 0x5c9   :  { %4742 = vpow2.f32 %v3377_v62 }
 0x5ca   :  { %v3938_v1 = vpop.f32.mrf.mxu0  ;;  %4744 = vtanh.f32 %v665_v55 }
 0x5d6   :  { %v4743_v3 = vpop.eup %4742 }
 0x5d7   :  { %v669_v5 = vadd.f32 1.0, %v4743_v3  ;;  %v4745_v7 = vpop.eup %4744 }
 0x5d9   :  { %4746 = vrcp.f32 %v669_v5 }
 0x5e6   :  { %v4747_v9 = vpop.eup %4746 }
 0x5e7   :  { %v673_v11 = vsel %vm222_vm1, %v4747_v9, %v4745_v7  ;;  %v4655_v7 = vld [vmem:[#allocation8 + $0x30] sm:$0xff]   ;;  %v970_v9 = vpack.c.bf16 %v5545_v29, %v5507_v54  ;;  %v4661_v54 = vld [vmem:[#allocation8] sm:$0xff]  }
 0x5e8   :  { %678 = vrot.lane.b32.xlu0 %v673_v11, %s5246_s7  ;;  %674 = vrot.lane.b32.xlu1 %v673_v11, %s5245_s10 }
 0x5ec   :  { %676 = vrot.lane.b32.xlu1 %v673_v11, %s5230_s29 }
 0x65a   :  { %v679_v56 = vpop.permute.xlu0 %678  ;;  %v675_v12 = vpop.permute.xlu1 %674 }
 0x65b   :  { %v681_v13 = vmul.f32 %v679_v56, %v673_v11  ;;  %v680_v15 = vmul.f32 %v675_v12, %v619_v47  ;;  %v4656_v11 = vld [vmem:[#allocation8 + $0x28] sm:$0xff]   ;;  %v4657_v56 = vld [vmem:[#allocation8 + $0x20] sm:$0xff]   ;;  %v4658_v12 = vld [vmem:[#allocation8 + $0x18] sm:$0xff]  }
 0x65d   :  { %v682_v16 = vadd.f32 %v681_v13, %v680_v15  ;;  %v4659_v13 = vld [vmem:[#allocation8 + $0x10] sm:$0xff]   ;;  %v4660_v15 = vld [vmem:[#allocation8 + $0x8] sm:$0xff]  }
 0x65e   :  { %v677_v20 = vpop.permute.xlu1 %676 }
 0x65f   :  { %4748 = vtanh.f32 %v682_v16 }
 0x66c   :  { %v4749_v18 = vpop.eup %4748 }
 0x66d   :  { %v5603_v21 = vmul.f32 %v4749_v18, %v677_v20  ;;  %v373_v18 = vadd.f32 %v5531_v58, %v5482_v26  ;;  %v5676_v58 = vld [vmem:[#allocation10 + $0x38] sm:$0xff]  }
 0x66f   :  { %v687_v22 = vpack.c.bf16 %v5603_v21, %v5603_v21  ;;  %v971_v29 = vpack.c.bf16 %v5603_v21, %v5574_v50 }
 0x671   :  { %3956 = vmatmul.mubr.bf16.vlgmr.msra.gmra.mxu1 %v687_v22 }
 0x672   :  { %3980 = vmatpush3.bf16.msra.mxu1 %v5400_v2  ;;  %3995 = vmatprep.mubr.msk.bf16.mxu1 %vm5243_vm0, %v5242_v0 }
 0x673   :  { %3981 = vmatprep.subr.bf16.mxu1 %v5242_v0 }
 0x676   :  { %3982 = vmatpush3.bf16.msra.mxu1 %v5403_v4 }
 0x677   :  { %3983 = vmatprep.subr.bf16.mxu1 %v5242_v0 }
 0x67a   :  { %3984 = vmatpush3.bf16.msra.mxu1 %v5407_v6 }
 0x67b   :  { %3985 = vmatprep.subr.bf16.mxu1 %v5242_v0 }
 0x67e   :  { %3986 = vmatpush3.bf16.msra.mxu1 %v5411_v8 }
 0x67f   :  { %3987 = vmatprep.subr.bf16.mxu1 %v5242_v0 }
 0x682   :  { %3988 = vmatpush3.bf16.msra.mxu1 %v5415_v10 }
 0x683   :  { %3989 = vmatprep.subr.bf16.mxu1 %v5242_v0 }
 0x686   :  { %3990 = vmatpush3.bf16.msra.mxu1 %v5424_v14 }
 0x687   :  { %3991 = vmatprep.subr.bf16.mxu1 %v5242_v0 }
 0x68a   :  { %3992 = vmatpush3.bf16.msra.mxu1 %v5428_v17 }
 0x68b   :  { %3993 = vmatprep.subr.bf16.mxu1 %v5242_v0 }
 0x68e   :  { %3994 = vmatpush3.bf16.msra.mxu1 %v5432_v19 }
 0x731   :  { %v722_v27 = vpop.f32.mrf.mxu1 }
 0x732   :  { %v728_v28 = vadd.f32 %v722_v27, %v365_v24 }
 0x733   :  { %v3957_v30 = vpop.f32.mrf.mxu1 }
 0x734   :  { %v3378_v31 = vmul.f32 -1.442695, %v728_v28 }
 0x735   :  { %v725_v32 = vpop.f32.mrf.mxu1 }
 0x736   :  { %4750 = vpow2.f32 %v3378_v31 }
 0x737   :  { %v3958_v33 = vpop.f32.mrf.mxu1  ;;  %4752 = vtanh.f32 %v728_v28 }
 0x743   :  { %v4751_v34 = vpop.eup %4750 }
 0x744   :  { %v732_v35 = vadd.f32 1.0, %v4751_v34  ;;  %v4753_v36 = vpop.eup %4752  ;;  %v5680_v34 = vld [vmem:[#allocation10 + $0x30] sm:$0xff]  }
 0x746   :  { %4754 = vrcp.f32 %v732_v35  ;;  %v5684_v35 = vld [vmem:[#allocation10 + $0x28] sm:$0xff]  }
 0x753   :  { %v4755_v38 = vpop.eup %4754 }
 0x754   :  { %v736_v39 = vsel %vm222_vm1, %v4755_v38, %v4753_v36  ;;  %v5688_v36 = vld [vmem:[#allocation10 + $0x20] sm:$0xff]   ;;  %v5692_v38 = vld [vmem:[#allocation10 + $0x18] sm:$0xff]  }
 0x755   :  { %741 = vrot.lane.b32.xlu1 %v736_v39, %s5246_s7  ;;  %737 = vrot.lane.b32.xlu0 %v736_v39, %s5245_s10 }
 0x759   :  { %739 = vrot.lane.b32.xlu0 %v736_v39, %s5230_s29 }
 0x7c7   :  { %v742_v59 = vpop.permute.xlu1 %741  ;;  %v738_v40 = vpop.permute.xlu0 %737 }
 0x7c8   :  { %v744_v41 = vmul.f32 %v742_v59, %v736_v39  ;;  %v743_v42 = vmul.f32 %v738_v40, %v682_v16  ;;  %v5696_v39 = vld [vmem:[#allocation10 + $0x10] sm:$0xff]   ;;  %v5700_v59 = vld [vmem:[#allocation10 + $0x8] sm:$0xff]   ;;  %v5704_v40 = vld [vmem:[#allocation10] sm:$0xff]  }
 0x7ca   :  { %v745_v43 = vadd.f32 %v744_v41, %v743_v42 }
 0x7cb   :  { %v740_v44 = vpop.permute.xlu0 %739 }
 0x7cc   :  { %4756 = vtanh.f32 %v745_v43 }
 0x7d9   :  { %v4757_v25 = vpop.eup %4756 }
 0x7da   :  { %v5631_v45 = vmul.f32 %v4757_v25, %v740_v44 }
 0x7dc   :  { %v750_v46 = vpack.c.bf16 %v5631_v45, %v5631_v45 }
 0x7de   :  { %3976 = vmatmul.mubr.bf16.vlgmr.msra.gmra.mxu0 %v750_v46 }
 0x7df   :  { %4000 = vmatpush3.bf16.msra.mxu0 %v5400_v2  ;;  %4015 = vmatprep.mubr.msk.bf16.mxu0 %vm5243_vm0, %v5242_v0  ;;  %v368_v2 = vadd.f32 %v5482_v26, %v5537_v61  ;;  %v4654_v61 = vld [vmem:[#allocation8 + $0x38] sm:$0xff]  }
 0x7e0   :  { %4001 = vmatprep.subr.bf16.mxu0 %v5242_v0  ;;  %4019 = vmatprep.subr.bf16.mxu1 %v4654_v61 }
 0x7e3   :  { %4002 = vmatpush3.bf16.msra.mxu0 %v5403_v4 }
 0x7e4   :  { %4003 = vmatprep.subr.bf16.mxu0 %v5242_v0 }
 0x7e7   :  { %4004 = vmatpush3.bf16.msra.mxu0 %v5407_v6 }
 0x7e8   :  { %4005 = vmatprep.subr.bf16.mxu0 %v5242_v0 }
 0x7eb   :  { %4006 = vmatpush3.bf16.msra.mxu0 %v5411_v8 }
 0x7ec   :  { %4007 = vmatprep.subr.bf16.mxu0 %v5242_v0 }
 0x7ef   :  { %4008 = vmatpush3.bf16.msra.mxu0 %v5415_v10 }
 0x7f0   :  { %4009 = vmatprep.subr.bf16.mxu0 %v5242_v0 }
 0x7f3   :  { %4010 = vmatpush3.bf16.msra.mxu0 %v5424_v14 }
 0x7f4   :  { %4011 = vmatprep.subr.bf16.mxu0 %v5242_v0 }
 0x7f7   :  { %4012 = vmatpush3.bf16.msra.mxu0 %v5428_v17 }
 0x7f8   :  { %4013 = vmatprep.subr.bf16.mxu0 %v5242_v0 }
 0x7fb   :  { %4014 = vmatpush3.bf16.msra.mxu0 %v5432_v19 }
 0x7fc   :  { %4043 = vmatprep.subr.bf16.mxu0 %v5242_v0 }
 0x89e   :  { %v785_v4 = vpop.f32.mrf.mxu0 }
 0x89f   :  { %v791_v6 = vadd.f32 %v785_v4, %v368_v2 }
 0x8a0   :  { %v3977_v8 = vpop.f32.mrf.mxu0 }
 0x8a1   :  { %v3379_v10 = vmul.f32 -1.442695, %v791_v6 }
 0x8a2   :  { %v788_v47 = vpop.f32.mrf.mxu0 }
 0x8a3   :  { %4758 = vpow2.f32 %v3379_v10 }
 0x8a4   :  { %v3978_v14 = vpop.f32.mrf.mxu0  ;;  %4760 = vtanh.f32 %v791_v6  ;;  %v376_v6 = vadd.f32 %v5535_v60, %v5482_v26 }
 0x8b0   :  { %v4759_v48 = vpop.eup %4758 }
 0x8b1   :  { %v795_v49 = vadd.f32 1.0, %v4759_v48  ;;  %v4761_v17 = vpop.eup %4760 }
 0x8b3   :  { %4762 = vrcp.f32 %v795_v49 }
 0x8c0   :  { %v4763_v51 = vpop.eup %4762 }
 0x8c1   :  { %v799_v19 = vsel %vm222_vm1, %v4763_v51, %v4761_v17 }
 0x8c2   :  { %804 = vrot.lane.b32.xlu0 %v799_v19, %s5246_s7  ;;  %800 = vrot.lane.b32.xlu1 %v799_v19, %s5245_s10 }
 0x8c6   :  { %802 = vrot.lane.b32.xlu1 %v799_v19, %s5230_s29 }
 0x934   :  { %v805_v52 = vpop.permute.xlu0 %804  ;;  %v801_v53 = vpop.permute.xlu1 %800 }
 0x935   :  { %v807_v55 = vmul.f32 %v805_v52, %v799_v19  ;;  %v806_v57 = vmul.f32 %v801_v53, %v745_v43  ;;  %v5757_v52 = vld [vmem:[#allocation11] ss:$0 sm:$0xff] }
 0x937   :  { %v5660_v62 = vadd.f32 %v807_v55, %v806_v57 }
 0x938   :  { %v803_v1 = vpop.permute.xlu1 %802 }
 0x939   :  { %4764 = vtanh.f32 %v5660_v62 }
 0x946   :  { %v4765_v63 = vpop.eup %4764 }
 0x947   :  { %v810_v3 = vmul.f32 %v4765_v63, %v803_v1 }
 0x949   :  { %v813_v5 = vpack.c.bf16 %v810_v3, %v810_v3  ;;  %v972_v16 = vpack.c.bf16 %v810_v3, %v5631_v45 }
 0x94b   :  { %3996 = vmatmul.mubr.bf16.vlgmr.msra.gmra.mxu1 %v813_v5 }
 0x94c   :  { %4020 = vmatpush3.bf16.msra.mxu1 %v4654_v61  ;;  %4035 = vmatprep.mubr.bf16.mxu1 %v970_v9 }
 0x94d   :  { %4021 = vmatprep.subr.bf16.mxu1 %v4655_v7 }
 0x950   :  { %4022 = vmatpush3.bf16.msra.mxu1 %v4655_v7 }
 0x951   :  { %4023 = vmatprep.subr.bf16.mxu1 %v4656_v11 }
 0x954   :  { %4024 = vmatpush3.bf16.msra.mxu1 %v4656_v11 }
 0x955   :  { %4025 = vmatprep.subr.bf16.mxu1 %v4657_v56 }
 0x958   :  { %4026 = vmatpush3.bf16.msra.mxu1 %v4657_v56 }
 0x959   :  { %4027 = vmatprep.subr.bf16.mxu1 %v4658_v12 }
 0x95c   :  { %4028 = vmatpush3.bf16.msra.mxu1 %v4658_v12 }
 0x95d   :  { %4029 = vmatprep.subr.bf16.mxu1 %v4659_v13 }
 0x960   :  { %4030 = vmatpush3.bf16.msra.mxu1 %v4659_v13 }
 0x961   :  { %4031 = vmatprep.subr.bf16.mxu1 %v4660_v15 }
 0x964   :  { %4032 = vmatpush3.bf16.msra.mxu1 %v4660_v15 }
 0x965   :  { %4033 = vmatprep.subr.bf16.mxu1 %v4661_v54 }
 0x968   :  { %4034 = vmatpush3.bf16.msra.mxu1 %v4661_v54 }
 0x969   :  { %4063 = vmatprep.subr.bf16.mxu1 %v5242_v0 }
 0x96b   :  { %4036 = vmatmul.mubr.bf16.vlgmr.msra.gmra.mxu1 %v971_v29 }
 0x96c   :  { %4039 = vmatprep.mubr.bf16.mxu1 %v972_v16  ;;  %4064 = vmatpush3.bf16.msra.mxu1 %v5676_v58 }
 0x96d   :  { %4065 = vmatprep.subr.bf16.mxu1 %v5242_v0 }
 0x970   :  { %4066 = vmatpush3.bf16.msra.mxu1 %v5680_v34 }
 0x971   :  { %4067 = vmatprep.subr.bf16.mxu1 %v5242_v0 }
 0x974   :  { %4068 = vmatpush3.bf16.msra.mxu1 %v5684_v35 }
 0x975   :  { %4069 = vmatprep.subr.bf16.mxu1 %v5242_v0 }
 0x978   :  { %4070 = vmatpush3.bf16.msra.mxu1 %v5688_v36 }
 0x979   :  { %4071 = vmatprep.subr.bf16.mxu1 %v5242_v0 }
 0x97c   :  { %4072 = vmatpush3.bf16.msra.mxu1 %v5692_v38 }
 0x97d   :  { %4073 = vmatprep.subr.bf16.mxu1 %v5242_v0 }
 0x980   :  { %4074 = vmatpush3.bf16.msra.mxu1 %v5696_v39 }
 0x981   :  { %4075 = vmatprep.subr.bf16.mxu1 %v5242_v0 }
 0x984   :  { %4076 = vmatpush3.bf16.msra.mxu1 %v5700_v59 }
 0x985   :  { %4077 = vmatprep.subr.bf16.mxu1 %v5242_v0 }
 0x988   :  { %4078 = vmatpush3.bf16.msra.mxu1 %v5704_v40 }
 0x989   :  { %4103 = vmatprep.subr.bf16.mxu1 %v5242_v0 }
 0xa0b   :  { %v848_v20 = vpop.f32.mrf.mxu1 }
 0xa0c   :  { %v854_v22 = vadd.f32 %v848_v20, %v373_v18 }
 0xa0d   :  { %v3997_v24 = vpop.f32.mrf.mxu1 }
 0xa0e   :  { %v3380_v27 = vmul.f32 -1.442695, %v854_v22 }
 0xa0f   :  { %v851_v28 = vpop.f32.mrf.mxu1 }
 0xa10   :  { %4766 = vpow2.f32 %v3380_v27 }
 0xa11   :  { %v3998_v30 = vpop.f32.mrf.mxu1  ;;  %4768 = vtanh.f32 %v854_v22 }
 0xa1d   :  { %v4767_v31 = vpop.eup %4766 }
 0xa1e   :  { %v858_v32 = vadd.f32 1.0, %v4767_v31  ;;  %v4769_v50 = vpop.eup %4768 }
 0xa20   :  { %4770 = vrcp.f32 %v858_v32 }
 0xa2b   :  { %v5755_v19 = vpop.f32.mrf.mxu1 }
 0xa2d   :  { %v4771_v21 = vpop.eup %4770  ;;  %v1062_v61 = vpop.f32.mrf.mxu1 }
 0xa2e   :  { %v862_v33 = vsel %vm222_vm1, %v4771_v21, %v4769_v50  ;;  %v1063_v53 = vadd.f32 %v5757_v52, %v1062_v61 }
 0xa2f   :  { %867 = vrot.lane.b32.xlu1 %v862_v33, %s5246_s7  ;;  %863 = vrot.lane.b32.xlu0 %v862_v33, %s5245_s10 }
 0xa33   :  { %865 = vrot.lane.b32.xlu0 %v862_v33, %s5230_s29 }
 0xaa1   :  { %v868_v41 = vpop.permute.xlu1 %867  ;;  %v864_v42 = vpop.permute.xlu0 %863 }
 0xaa2   :  { %v870_v43 = vmul.f32 %v868_v41, %v862_v33  ;;  %v869_v25 = vmul.f32 %v864_v42, %v5660_v62  ;;  %v5796_v42 = vpop.f32.mrf.mxu1 }
 0xaa4   :  { %v5709_v44 = vadd.f32 %v870_v43, %v869_v25  ;;  %v1065_v43 = vpop.f32.mrf.mxu1 }
 0xaa5   :  { %v866_v46 = vpop.permute.xlu0 %865 }
 0xaa6   :  { %4772 = vtanh.f32 %v5709_v44 }
 0xab3   :  { %v4773_v45 = vpop.eup %4772 }
 0xab4   :  { %v5712_v2 = vmul.f32 %v4773_v45, %v866_v46 }
 0xab6   :  { %v876_v4 = vpack.c.bf16 %v5712_v2, %v5712_v2 }
 0xab8   :  { %4016 = vmatmul.mubr.bf16.vlgmr.msra.gmra.mxu0 %v876_v4 }
 0xab9   :  { %4044 = vmatpush3.bf16.msra.mxu0 %v5676_v58  ;;  %4059 = vmatprep.mubr.msk.bf16.mxu0 %vm5243_vm0, %v5242_v0 }
 0xaba   :  { %4045 = vmatprep.subr.bf16.mxu0 %v5242_v0 }
 0xabd   :  { %4046 = vmatpush3.bf16.msra.mxu0 %v5680_v34 }
 0xabe   :  { %4047 = vmatprep.subr.bf16.mxu0 %v5242_v0 }
 0xac1   :  { %4048 = vmatpush3.bf16.msra.mxu0 %v5684_v35 }
 0xac2   :  { %4049 = vmatprep.subr.bf16.mxu0 %v5242_v0 }
 0xac5   :  { %4050 = vmatpush3.bf16.msra.mxu0 %v5688_v36 }
 0xac6   :  { %4051 = vmatprep.subr.bf16.mxu0 %v5242_v0 }
 0xac9   :  { %4052 = vmatpush3.bf16.msra.mxu0 %v5692_v38 }
 0xaca   :  { %4053 = vmatprep.subr.bf16.mxu0 %v5242_v0 }
 0xacd   :  { %4054 = vmatpush3.bf16.msra.mxu0 %v5696_v39 }
 0xace   :  { %4055 = vmatprep.subr.bf16.mxu0 %v5242_v0 }
 0xad1   :  { %4056 = vmatpush3.bf16.msra.mxu0 %v5700_v59 }
 0xad2   :  { %4057 = vmatprep.subr.bf16.mxu0 %v5242_v0 }
 0xad5   :  { %4058 = vmatpush3.bf16.msra.mxu0 %v5704_v40 }
 0xad6   :  { %4083 = vmatprep.subr.bf16.mxu0 %v5242_v0 }
 0xad8   :  { %4060 = vmatmul.mubr.bf16.vlgmr.msra.gmra.mxu0 %v5244_v23 }
 0xad9   :  { %4084 = vmatpush3.bf16.msra.mxu0 %v5676_v58  ;;  %4099 = vmatprep.mubr.msk.bf16.mxu0 %vm5243_vm0, %v5242_v0 }
 0xada   :  { %4085 = vmatprep.subr.bf16.mxu0 %v5242_v0 }
 0xadd   :  { %4086 = vmatpush3.bf16.msra.mxu0 %v5680_v34 }
 0xade   :  { %4087 = vmatprep.subr.bf16.mxu0 %v5242_v0 }
 0xae1   :  { %4088 = vmatpush3.bf16.msra.mxu0 %v5684_v35 }
 0xae2   :  { %4089 = vmatprep.subr.bf16.mxu0 %v5242_v0 }
 0xae5   :  { %4090 = vmatpush3.bf16.msra.mxu0 %v5688_v36 }
 0xae6   :  { %4091 = vmatprep.subr.bf16.mxu0 %v5242_v0 }
 0xae9   :  { %4092 = vmatpush3.bf16.msra.mxu0 %v5692_v38 }
 0xaea   :  { %4093 = vmatprep.subr.bf16.mxu0 %v5242_v0 }
 0xaed   :  { %4094 = vmatpush3.bf16.msra.mxu0 %v5696_v39 }
 0xaee   :  { %4095 = vmatprep.subr.bf16.mxu0 %v5242_v0 }
 0xaf1   :  { %4096 = vmatpush3.bf16.msra.mxu0 %v5700_v59 }
 0xaf2   :  { %4097 = vmatprep.subr.bf16.mxu0 %v5242_v0 }
 0xaf5   :  { %4098 = vmatpush3.bf16.msra.mxu0 %v5704_v40 }
 0xaf6   :  { %4123 = vmatprep.subr.bf16.mxu0 %v5242_v0 }
 0xb78   :  { %v911_v8 = vpop.f32.mrf.mxu0 }
 0xb79   :  { %v917_v10 = vadd.f32 %v911_v8, %v376_v6 }
 0xb7a   :  { %v4017_v47 = vpop.f32.mrf.mxu0 }
 0xb7b   :  { %v3381_v14 = vmul.f32 -1.442695, %v917_v10 }
 0xb7c   :  { %v914_v48 = vpop.f32.mrf.mxu0 }
 0xb7d   :  { %4774 = vpow2.f32 %v3381_v14 }
 0xb7e   :  { %v4018_v49 = vpop.f32.mrf.mxu0  ;;  %4776 = vtanh.f32 %v917_v10 }
 0xb8a   :  { %v4775_v17 = vpop.eup %4774 }
 0xb8b   :  { %v921_v51 = vadd.f32 1.0, %v4775_v17  ;;  %v4777_v26 = vpop.eup %4776 }
 0xb8d   :  { %4778 = vrcp.f32 %v921_v51 }
 0xb98   :  { %v1184_v55 = vpop.f32.mrf.mxu0 }
 0xb99   :  { %v1190_v60 = vadd.f32 %v1184_v55, %v1063_v53 }
 0xb9a   :  { %v4779_v57 = vpop.eup %4778  ;;  %v4061_v62 = vpop.f32.mrf.mxu0 }
 0xb9b   :  { %v3399_v63 = vmul.f32 -1.442695, %v1190_v60  ;;  %v925_v1 = vsel %vm222_vm1, %v4779_v57, %v4777_v26 }
 0xb9c   :  { %v1187_v3 = vpop.f32.mrf.mxu0  ;;  %930 = vrot.lane.b32.xlu0 %v925_v1, %s5246_s7  ;;  %926 = vrot.lane.b32.xlu1 %v925_v1, %s5245_s10 }
 0xb9d   :  { %4780 = vpow2.f32 %v3399_v63 }
 0xb9e   :  { %v4062_v5 = vpop.f32.mrf.mxu0  ;;  %4782 = vtanh.f32 %v1190_v60 }
 0xb9f   :  { %v1071_v5 = vadd.f32 %v5755_v19, %v5757_v52 }
 0xbaa   :  { %v4781_v7 = vpop.eup %4780 }
 0xbab   :  { %v1194_v9 = vadd.f32 1.0, %v4781_v7  ;;  %v4783_v11 = vpop.eup %4782 }
 0xbad   :  { %4784 = vrcp.f32 %v1194_v9 }
 0xbba   :  { %v4785_v56 = vpop.eup %4784 }
 0xbbb   :  { %v1198_v12 = vsel %vm222_vm1, %v4785_v56, %v4783_v11 }
 0xbbc   :  { %1203 = vrot.lane.b32.xlu0 %v1198_v12, %s5246_s7  ;;  %1199 = vrot.lane.b32.xlu1 %v1198_v12, %s5245_s10 }
 0xbc0   :  { %1201 = vrot.lane.b32.xlu0 %v1198_v12, %s5230_s29  ;;  %928 = vrot.lane.b32.xlu1 %v925_v1, %s5230_s29 }
 0xc0e   :  { %v931_v13 = vpop.permute.xlu0 %930  ;;  %v927_v15 = vpop.permute.xlu1 %926 }
 0xc0f   :  { %v933_v54 = vmul.f32 %v931_v13, %v925_v1  ;;  %v932_v29 = vmul.f32 %v927_v15, %v5709_v44 }
 0xc11   :  { %v934_v16 = vadd.f32 %v933_v54, %v932_v29 }
 0xc13   :  { %4786 = vtanh.f32 %v934_v16 }
 0xc20   :  { %v4787_v28 = vpop.eup %4786 }
 0xc2e   :  { %v1204_v18 = vpop.permute.xlu0 %1203  ;;  %v1200_v20 = vpop.permute.xlu1 %1199 }
 0xc2f   :  { %v1206_v22 = vmul.f32 %v1204_v18, %v1198_v12  ;;  %v1205_v24 = vmul.f32 0.0, %v1200_v20 }
 0xc31   :  { %v1207_v27 = vadd.f32 %v1206_v22, %v1205_v24 }
 0xc32   :  { %v929_v30 = vpop.permute.xlu1 %928  ;;  %v1202_v21 = vpop.permute.xlu0 %1201 }
 0xc33   :  { %4788 = vtanh.f32 %v1207_v27  ;;  %v936_v31 = vmul.f32 %v4787_v28, %v929_v30 }
 0xc35   :  { %v973_v32 = vpack.c.bf16 %v936_v31, %v5712_v2  ;;  %v1066_v2 = vadd.f32 %v5757_v52, %v1065_v43 }
 0xc37   :  { %4040 = vmatmul.mubr.bf16.gmra.mxu1 %v973_v32 }
 0xc38   :  { %4079 = vmatprep.mubr.msk.bf16.mxu1 %vm5243_vm0, %v5242_v0 }
 0xc40   :  { %v4789_v50 = vpop.eup %4788 }
 0xc41   :  { %v5774_v33 = vmul.f32 %v4789_v50, %v1202_v21  ;;  %v1074_v50 = vadd.f32 %v5796_v42, %v5757_v52 }
 0xc43   :  { %v1211_v41 = vpack.c.bf16 %v5774_v33, %v5774_v33 }
 0xc45   :  { %4080 = vmatmul.mubr.bf16.vlgmr.msra.gmra.mxu1 %v1211_v41 }
 0xc46   :  { %4104 = vmatpush3.bf16.msra.mxu1 %v5676_v58  ;;  %4119 = vmatprep.mubr.msk.bf16.mxu1 %vm5243_vm0, %v5242_v0 }
 0xc47   :  { %4105 = vmatprep.subr.bf16.mxu1 %v5242_v0 }
 0xc4a   :  { %4106 = vmatpush3.bf16.msra.mxu1 %v5680_v34 }
 0xc4b   :  { %4107 = vmatprep.subr.bf16.mxu1 %v5242_v0 }
 0xc4e   :  { %4108 = vmatpush3.bf16.msra.mxu1 %v5684_v35 }
 0xc4f   :  { %4109 = vmatprep.subr.bf16.mxu1 %v5242_v0 }
 0xc52   :  { %4110 = vmatpush3.bf16.msra.mxu1 %v5688_v36 }
 0xc53   :  { %4111 = vmatprep.subr.bf16.mxu1 %v5242_v0 }
 0xc56   :  { %4112 = vmatpush3.bf16.msra.mxu1 %v5692_v38 }
 0xc57   :  { %4113 = vmatprep.subr.bf16.mxu1 %v5242_v0 }
 0xc5a   :  { %4114 = vmatpush3.bf16.msra.mxu1 %v5696_v39 }
 0xc5b   :  { %4115 = vmatprep.subr.bf16.mxu1 %v5242_v0 }
 0xc5e   :  { %4116 = vmatpush3.bf16.msra.mxu1 %v5700_v59 }
 0xc5f   :  { %4117 = vmatprep.subr.bf16.mxu1 %v5242_v0 }
 0xc62   :  { %4118 = vmatpush3.bf16.msra.mxu1 %v5704_v40 }
 0xc63   :  { %4143 = vmatprep.subr.bf16.mxu1 %v5242_v0 }
 0xcf7   :  { %v5798_v25 = vpop.f32.mrf.mxu1 }
 0xcf9   :  { %v5800_v44 = vpop.f32.mrf.mxu1 }
 0xcfb   :  { %v5802_v45 = vpop.f32.mrf.mxu1 }
 0xcfd   :  { %v5804_v46 = vpop.f32.mrf.mxu1 }
 0xd05   :  { %v1246_v4 = vpop.f32.mrf.mxu1 }
 0xd06   :  { %v1252_v6 = vadd.f32 %v1246_v4, %v1066_v2 }
 0xd07   :  { %v4081_v8 = vpop.f32.mrf.mxu1 }
 0xd08   :  { %v3400_v10 = vmul.f32 -1.442695, %v1252_v6 }
 0xd09   :  { %v1249_v47 = vpop.f32.mrf.mxu1 }
 0xd0a   :  { %4790 = vpow2.f32 %v3400_v10 }
 0xd0b   :  { %v4082_v14 = vpop.f32.mrf.mxu1  ;;  %4792 = vtanh.f32 %v1252_v6 }
 0xd17   :  { %v4791_v48 = vpop.eup %4790 }
 0xd18   :  { %v1256_v49 = vadd.f32 1.0, %v4791_v48  ;;  %v4793_v17 = vpop.eup %4792 }
 0xd1a   :  { %4794 = vrcp.f32 %v1256_v49 }
 0xd27   :  { %v4795_v51 = vpop.eup %4794 }
 0xd28   :  { %v1260_v61 = vsel %vm222_vm1, %v4795_v51, %v4793_v17 }
 0xd29   :  { %1265 = vrot.lane.b32.xlu0 %v1260_v61, %s5246_s7  ;;  %1261 = vrot.lane.b32.xlu1 %v1260_v61, %s5245_s10 }
 0xd2d   :  { %1263 = vrot.lane.b32.xlu1 %v1260_v61, %s5230_s29 }
 0xd9b   :  { %v1266_v53 = vpop.permute.xlu0 %1265  ;;  %v1262_v55 = vpop.permute.xlu1 %1261 }
 0xd9c   :  { %v1268_v26 = vmul.f32 %v1266_v53, %v1260_v61  ;;  %v1267_v60 = vmul.f32 %v1262_v55, %v1207_v27 }
 0xd9e   :  { %v1269_v57 = vadd.f32 %v1268_v26, %v1267_v60 }
 0xd9f   :  { %v1264_v63 = vpop.permute.xlu1 %1263 }
 0xda0   :  { %4796 = vtanh.f32 %v1269_v57 }
 0xdad   :  { %v4797_v62 = vpop.eup %4796 }
 0xdae   :  { %v5812_v1 = vmul.f32 %v4797_v62, %v1264_v63 }
 0xdb0   :  { %v1273_v3 = vpack.c.bf16 %v5812_v1, %v5812_v1 }
 0xdb2   :  { %4100 = vmatmul.mubr.bf16.vlgmr.msra.gmra.mxu0 %v1273_v3 }
 0xdb3   :  { %4124 = vmatpush3.bf16.msra.mxu0 %v5676_v58  ;;  %4139 = vmatprep.mubr.msk.bf16.mxu0 %vm5243_vm0, %v5242_v0 }
 0xdb4   :  { %4125 = vmatprep.subr.bf16.mxu0 %v5242_v0 }
 0xdb7   :  { %4126 = vmatpush3.bf16.msra.mxu0 %v5680_v34 }
 0xdb8   :  { %4127 = vmatprep.subr.bf16.mxu0 %v5242_v0 }
 0xdbb   :  { %4128 = vmatpush3.bf16.msra.mxu0 %v5684_v35 }
 0xdbc   :  { %4129 = vmatprep.subr.bf16.mxu0 %v5242_v0 }
 0xdbf   :  { %4130 = vmatpush3.bf16.msra.mxu0 %v5688_v36 }
 0xdc0   :  { %4131 = vmatprep.subr.bf16.mxu0 %v5242_v0 }
 0xdc3   :  { %4132 = vmatpush3.bf16.msra.mxu0 %v5692_v38 }
 0xdc4   :  { %4133 = vmatprep.subr.bf16.mxu0 %v5242_v0 }
 0xdc7   :  { %4134 = vmatpush3.bf16.msra.mxu0 %v5696_v39 }
 0xdc8   :  { %4135 = vmatprep.subr.bf16.mxu0 %v5242_v0 }
 0xdcb   :  { %4136 = vmatpush3.bf16.msra.mxu0 %v5700_v59 }
 0xdcc   :  { %4137 = vmatprep.subr.bf16.mxu0 %v5242_v0 }
 0xdcf   :  { %4138 = vmatpush3.bf16.msra.mxu0 %v5704_v40 }
 0xdd0   :  { %4163 = vmatprep.subr.bf16.mxu0 %v5242_v0 }
 0xe72   :  { %v1308_v7 = vpop.f32.mrf.mxu0 }
 0xe73   :  { %v1314_v9 = vadd.f32 %v1308_v7, %v1071_v5 }
 0xe74   :  { %v4101_v11 = vpop.f32.mrf.mxu0 }
 0xe75   :  { %v3401_v56 = vmul.f32 -1.442695, %v1314_v9 }
 0xe76   :  { %v1311_v12 = vpop.f32.mrf.mxu0 }
 0xe77   :  { %4798 = vpow2.f32 %v3401_v56 }
 0xe78   :  { %v4102_v13 = vpop.f32.mrf.mxu0  ;;  %4800 = vtanh.f32 %v1314_v9 }
 0xe84   :  { %v4799_v15 = vpop.eup %4798 }
 0xe85   :  { %v1318_v54 = vadd.f32 1.0, %v4799_v15  ;;  %v4801_v29 = vpop.eup %4800 }
 0xe87   :  { %4802 = vrcp.f32 %v1318_v54 }
 0xe94   :  { %v4803_v16 = vpop.eup %4802 }
 0xe95   :  { %v1322_v18 = vsel %vm222_vm1, %v4803_v16, %v4801_v29 }
 0xe96   :  { %1327 = vrot.lane.b32.xlu1 %v1322_v18, %s5246_s7  ;;  %1323 = vrot.lane.b32.xlu0 %v1322_v18, %s5245_s10 }
 0xe9a   :  { %1325 = vrot.lane.b32.xlu0 %v1322_v18, %s5230_s29 }
 0xf08   :  { %v1328_v19 = vpop.permute.xlu1 %1327  ;;  %v1324_v20 = vpop.permute.xlu0 %1323 }
 0xf09   :  { %v1330_v22 = vmul.f32 %v1328_v19, %v1322_v18  ;;  %v1329_v24 = vmul.f32 %v1324_v20, %v1269_v57  ;;  %v1079_v57 = vadd.f32 %v5757_v52, %v5800_v44 }
 0xf0b   :  { %v1331_v27 = vadd.f32 %v1330_v22, %v1329_v24 }
 0xf0c   :  { %v1326_v30 = vpop.permute.xlu0 %1325 }
 0xf0d   :  { %4804 = vtanh.f32 %v1331_v27 }
 0xf1a   :  { %v4805_v28 = vpop.eup %4804 }
 0xf1b   :  { %v5841_v31 = vmul.f32 %v4805_v28, %v1326_v30 }
 0xf1d   :  { %v1335_v32 = vpack.c.bf16 %v5841_v31, %v5841_v31 }
 0xf1f   :  { %4120 = vmatmul.mubr.bf16.vlgmr.msra.gmra.mxu1 %v1335_v32 }
 0xf20   :  { %4144 = vmatpush3.bf16.msra.mxu1 %v5676_v58  ;;  %4159 = vmatprep.mubr.msk.bf16.mxu1 %vm5243_vm0, %v5242_v0 }
 0xf21   :  { %4145 = vmatprep.subr.bf16.mxu1 %v5242_v0 }
 0xf24   :  { %4146 = vmatpush3.bf16.msra.mxu1 %v5680_v34 }
 0xf25   :  { %4147 = vmatprep.subr.bf16.mxu1 %v5242_v0 }
 0xf28   :  { %4148 = vmatpush3.bf16.msra.mxu1 %v5684_v35 }
 0xf29   :  { %4149 = vmatprep.subr.bf16.mxu1 %v5242_v0 }
 0xf2c   :  { %4150 = vmatpush3.bf16.msra.mxu1 %v5688_v36 }
 0xf2d   :  { %4151 = vmatprep.subr.bf16.mxu1 %v5242_v0 }
 0xf30   :  { %4152 = vmatpush3.bf16.msra.mxu1 %v5692_v38 }
 0xf31   :  { %4153 = vmatprep.subr.bf16.mxu1 %v5242_v0 }
 0xf34   :  { %4154 = vmatpush3.bf16.msra.mxu1 %v5696_v39 }
 0xf35   :  { %4155 = vmatprep.subr.bf16.mxu1 %v5242_v0 }
 0xf38   :  { %4156 = vmatpush3.bf16.msra.mxu1 %v5700_v59 }
 0xf39   :  { %4157 = vmatprep.subr.bf16.mxu1 %v5242_v0 }
 0xf3c   :  { %4158 = vmatpush3.bf16.msra.mxu1 %v5704_v40 }
 0xf3d   :  { %4183 = vmatprep.subr.bf16.mxu1 %v5242_v0 }
 0xfdf   :  { %v1370_v21 = vpop.f32.mrf.mxu1 }
 0xfe0   :  { %v1376_v41 = vadd.f32 %v1370_v21, %v1074_v50 }
 0xfe1   :  { %v4121_v43 = vpop.f32.mrf.mxu1 }
 0xfe2   :  { %v3402_v2 = vmul.f32 -1.442695, %v1376_v41 }
 0xfe3   :  { %v1373_v4 = vpop.f32.mrf.mxu1 }
 0xfe4   :  { %4806 = vpow2.f32 %v3402_v2 }
 0xfe5   :  { %v4122_v6 = vpop.f32.mrf.mxu1  ;;  %4808 = vtanh.f32 %v1376_v41 }
 0xff1   :  { %v4807_v8 = vpop.eup %4806 }
 0xff2   :  { %v1380_v10 = vadd.f32 1.0, %v4807_v8  ;;  %v4809_v47 = vpop.eup %4808 }
 0xff4   :  { %4810 = vrcp.f32 %v1380_v10 }
0x1001   :  { %v4811_v14 = vpop.eup %4810 }
0x1002   :  { %v1384_v48 = vsel %vm222_vm1, %v4811_v14, %v4809_v47  ;;  %v4671_v47 = vld [vmem:[#allocation13 + $0x30] sm:$0xff]   ;;  %v1661_v14 = vpack.c.bf16 %v5812_v1, %v5774_v33  ;;  %v4677_v33 = vld [vmem:[#allocation13] sm:$0xff]  }
0x1003   :  { %1389 = vrot.lane.b32.xlu0 %v1384_v48, %s5246_s7  ;;  %1385 = vrot.lane.b32.xlu1 %v1384_v48, %s5245_s10 }
0x1007   :  { %1387 = vrot.lane.b32.xlu1 %v1384_v48, %s5230_s29 }
0x1075   :  { %v1390_v42 = vpop.permute.xlu0 %1389  ;;  %v1386_v49 = vpop.permute.xlu1 %1385 }
0x1076   :  { %v1392_v17 = vmul.f32 %v1390_v42, %v1384_v48  ;;  %v1391_v51 = vmul.f32 %v1386_v49, %v1331_v27  ;;  %v4672_v48 = vld [vmem:[#allocation13 + $0x28] sm:$0xff]   ;;  %v4673_v42 = vld [vmem:[#allocation13 + $0x20] sm:$0xff]   ;;  %v4674_v49 = vld [vmem:[#allocation13 + $0x18] sm:$0xff]  }
0x1078   :  { %v1393_v61 = vadd.f32 %v1392_v17, %v1391_v51  ;;  %v4675_v17 = vld [vmem:[#allocation13 + $0x10] sm:$0xff]   ;;  %v4676_v51 = vld [vmem:[#allocation13 + $0x8] sm:$0xff]  }
0x1079   :  { %v1388_v55 = vpop.permute.xlu1 %1387 }
0x107a   :  { %4812 = vtanh.f32 %v1393_v61 }
0x1087   :  { %v4813_v53 = vpop.eup %4812 }
0x1088   :  { %v5870_v26 = vmul.f32 %v4813_v53, %v1388_v55  ;;  %v1087_v53 = vadd.f32 %v5798_v25, %v5757_v52  ;;  %v4678_v25 = vld [vmem:[#allocation16 + $0x38] sm:$0xff]  }
0x108a   :  { %v1397_v60 = vpack.c.bf16 %v5870_v26, %v5870_v26  ;;  %v1662_v1 = vpack.c.bf16 %v5870_v26, %v5841_v31 }
0x108c   :  { %4140 = vmatmul.mubr.bf16.vlgmr.msra.gmra.mxu0 %v1397_v60 }
0x108d   :  { %4164 = vmatpush3.bf16.msra.mxu0 %v5676_v58  ;;  %4179 = vmatprep.mubr.msk.bf16.mxu0 %vm5243_vm0, %v5242_v0 }
0x108e   :  { %4165 = vmatprep.subr.bf16.mxu0 %v5242_v0 }
0x1091   :  { %4166 = vmatpush3.bf16.msra.mxu0 %v5680_v34 }
0x1092   :  { %4167 = vmatprep.subr.bf16.mxu0 %v5242_v0 }
0x1095   :  { %4168 = vmatpush3.bf16.msra.mxu0 %v5684_v35 }
0x1096   :  { %4169 = vmatprep.subr.bf16.mxu0 %v5242_v0 }
0x1099   :  { %4170 = vmatpush3.bf16.msra.mxu0 %v5688_v36 }
0x109a   :  { %4171 = vmatprep.subr.bf16.mxu0 %v5242_v0 }
0x109d   :  { %4172 = vmatpush3.bf16.msra.mxu0 %v5692_v38 }
0x109e   :  { %4173 = vmatprep.subr.bf16.mxu0 %v5242_v0 }
0x10a1   :  { %4174 = vmatpush3.bf16.msra.mxu0 %v5696_v39 }
0x10a2   :  { %4175 = vmatprep.subr.bf16.mxu0 %v5242_v0 }
0x10a5   :  { %4176 = vmatpush3.bf16.msra.mxu0 %v5700_v59 }
0x10a6   :  { %4177 = vmatprep.subr.bf16.mxu0 %v5242_v0 }
0x10a9   :  { %4178 = vmatpush3.bf16.msra.mxu0 %v5704_v40 }
0x114c   :  { %v1432_v62 = vpop.f32.mrf.mxu0 }
0x114d   :  { %v1438_v63 = vadd.f32 %v1432_v62, %v1079_v57 }
0x114e   :  { %v4141_v3 = vpop.f32.mrf.mxu0 }
0x114f   :  { %v3403_v5 = vmul.f32 -1.442695, %v1438_v63 }
0x1150   :  { %v1435_v7 = vpop.f32.mrf.mxu0 }
0x1151   :  { %4814 = vpow2.f32 %v3403_v5 }
0x1152   :  { %v4142_v9 = vpop.f32.mrf.mxu0  ;;  %4816 = vtanh.f32 %v1438_v63 }
0x115e   :  { %v4815_v11 = vpop.eup %4814 }
0x115f   :  { %v1442_v56 = vadd.f32 1.0, %v4815_v11  ;;  %v4817_v12 = vpop.eup %4816 }
0x1161   :  { %4818 = vrcp.f32 %v1442_v56 }
0x116e   :  { %v4819_v13 = vpop.eup %4818 }
0x116f   :  { %v1446_v15 = vsel %vm222_vm1, %v4819_v13, %v4817_v12 }
0x1170   :  { %1451 = vrot.lane.b32.xlu1 %v1446_v15, %s5246_s7  ;;  %1447 = vrot.lane.b32.xlu0 %v1446_v15, %s5245_s10 }
0x1174   :  { %1449 = vrot.lane.b32.xlu0 %v1446_v15, %s5230_s29 }
0x11e2   :  { %v1452_v44 = vpop.permute.xlu1 %1451  ;;  %v1448_v54 = vpop.permute.xlu0 %1447 }
0x11e3   :  { %v1454_v29 = vmul.f32 %v1452_v44, %v1446_v15  ;;  %v1453_v16 = vmul.f32 %v1448_v54, %v1393_v61 }
0x11e5   :  { %v1455_v18 = vadd.f32 %v1454_v29, %v1453_v16 }
0x11e6   :  { %v1450_v20 = vpop.permute.xlu0 %1449 }
0x11e7   :  { %4820 = vtanh.f32 %v1455_v18 }
0x11f4   :  { %v4821_v19 = vpop.eup %4820 }
0x11f5   :  { %v5898_v22 = vmul.f32 %v4821_v19, %v1450_v20 }
0x11f7   :  { %v1459_v24 = vpack.c.bf16 %v5898_v22, %v5898_v22 }
0x11f9   :  { %4160 = vmatmul.mubr.bf16.vlgmr.msra.gmra.mxu1 %v1459_v24 }
0x11fa   :  { %4184 = vmatpush3.bf16.msra.mxu1 %v5676_v58  ;;  %4199 = vmatprep.mubr.msk.bf16.mxu1 %vm5243_vm0, %v5242_v0  ;;  %v1082_v58 = vadd.f32 %v5757_v52, %v5804_v46 }
0x11fb   :  { %4185 = vmatprep.subr.bf16.mxu1 %v5242_v0 }
0x11fe   :  { %4186 = vmatpush3.bf16.msra.mxu1 %v5680_v34 }
0x11ff   :  { %4187 = vmatprep.subr.bf16.mxu1 %v5242_v0 }
0x1202   :  { %4188 = vmatpush3.bf16.msra.mxu1 %v5684_v35 }
0x1203   :  { %4189 = vmatprep.subr.bf16.mxu1 %v5242_v0 }
0x1206   :  { %4190 = vmatpush3.bf16.msra.mxu1 %v5688_v36 }
0x1207   :  { %4191 = vmatprep.subr.bf16.mxu1 %v5242_v0 }
0x120a   :  { %4192 = vmatpush3.bf16.msra.mxu1 %v5692_v38 }
0x120b   :  { %4193 = vmatprep.subr.bf16.mxu1 %v5242_v0 }
0x120e   :  { %4194 = vmatpush3.bf16.msra.mxu1 %v5696_v39 }
0x120f   :  { %4195 = vmatprep.subr.bf16.mxu1 %v5242_v0 }
0x1212   :  { %4196 = vmatpush3.bf16.msra.mxu1 %v5700_v59 }
0x1213   :  { %4197 = vmatprep.subr.bf16.mxu1 %v5242_v0 }
0x1216   :  { %4198 = vmatpush3.bf16.msra.mxu1 %v5704_v40  ;;  %v4670_v40 = vld [vmem:[#allocation13 + $0x38] sm:$0xff]  }
0x1217   :  { %4203 = vmatprep.subr.bf16.mxu0 %v4670_v40  ;;  %4227 = vmatprep.subr.bf16.mxu1 %v4678_v25 }
0x12b9   :  { %v1494_v34 = vpop.f32.mrf.mxu1 }
0x12ba   :  { %v1500_v35 = vadd.f32 %v1494_v34, %v1082_v58 }
0x12bb   :  { %v4161_v36 = vpop.f32.mrf.mxu1 }
0x12bc   :  { %v3404_v27 = vmul.f32 -1.442695, %v1500_v35 }
0x12bd   :  { %v1497_v38 = vpop.f32.mrf.mxu1 }
0x12be   :  { %4822 = vpow2.f32 %v3404_v27  ;;  %v4680_v27 = vld [vmem:[#allocation16 + $0x28] sm:$0xff]   ;;  %v4681_v38 = vld [vmem:[#allocation16 + $0x20] sm:$0xff]  }
0x12bf   :  { %v4162_v28 = vpop.f32.mrf.mxu1  ;;  %4824 = vtanh.f32 %v1500_v35  ;;  %v4679_v35 = vld [vmem:[#allocation16 + $0x30] sm:$0xff]  }
0x12c0   :  { %v4682_v28 = vld [vmem:[#allocation16 + $0x18] sm:$0xff]  }
0x12cb   :  { %v4823_v30 = vpop.eup %4822 }
0x12cc   :  { %v1504_v39 = vadd.f32 1.0, %v4823_v30  ;;  %v4825_v32 = vpop.eup %4824  ;;  %v4683_v30 = vld [vmem:[#allocation16 + $0x10] sm:$0xff]  }
0x12ce   :  { %4826 = vrcp.f32 %v1504_v39  ;;  %v4684_v39 = vld [vmem:[#allocation16 + $0x8] sm:$0xff]  }
0x12db   :  { %v4827_v59 = vpop.eup %4826 }
0x12dc   :  { %v1508_v50 = vsel %vm222_vm1, %v4827_v59, %v4825_v32  ;;  %v4685_v32 = vld [vmem:[#allocation16] sm:$0xff]  }
0x12dd   :  { %1513 = vrot.lane.b32.xlu0 %v1508_v50, %s5246_s7  ;;  %1509 = vrot.lane.b32.xlu1 %v1508_v50, %s5245_s10 }
0x12e1   :  { %1511 = vrot.lane.b32.xlu1 %v1508_v50, %s5230_s29 }
0x134f   :  { %v1514_v46 = vpop.permute.xlu0 %1513  ;;  %v1510_v21 = vpop.permute.xlu1 %1509 }
0x1350   :  { %v1516_v41 = vmul.f32 %v1514_v46, %v1508_v50  ;;  %v1515_v43 = vmul.f32 %v1510_v21, %v1455_v18  ;;  %v5942_v18 = vld [vmem:[#allocation14] ss:$0 sm:$0xff]  ;;  %v1090_v21 = vadd.f32 %v5802_v45, %v5757_v52  ;;  %v5967_v52 = vld [vmem:[#allocation17 + $0x28] sm:$0xff]  }
0x1351   :  { %v5953_v46 = vld [vmem:[#allocation17 + $0x38] sm:$0xff]  }
0x1352   :  { %v1517_v2 = vadd.f32 %v1516_v41, %v1515_v43 }
0x1353   :  { %v1512_v6 = vpop.permute.xlu1 %1511 }
0x1354   :  { %4828 = vtanh.f32 %v1517_v2 }
0x1361   :  { %v4829_v4 = vpop.eup %4828 }
0x1362   :  { %v1519_v8 = vmul.f32 %v4829_v4, %v1512_v6 }
0x1364   :  { %v1521_v10 = vpack.c.bf16 %v1519_v8, %v1519_v8  ;;  %v1663_v61 = vpack.c.bf16 %v1519_v8, %v5898_v22 }
0x1366   :  { %4180 = vmatmul.mubr.bf16.vlgmr.msra.gmra.mxu0 %v1521_v10 }
0x1367   :  { %4204 = vmatpush3.bf16.msra.mxu0 %v4670_v40  ;;  %4219 = vmatprep.mubr.bf16.mxu0 %v1661_v14  ;;  %v5961_v14 = vld [vmem:[#allocation17 + $0x30] sm:$0xff]  }
0x1368   :  { %4205 = vmatprep.subr.bf16.mxu0 %v4671_v47 }
0x136b   :  { %4206 = vmatpush3.bf16.msra.mxu0 %v4671_v47 }
0x136c   :  { %4207 = vmatprep.subr.bf16.mxu0 %v4672_v48 }
0x136f   :  { %4208 = vmatpush3.bf16.msra.mxu0 %v4672_v48  ;;  %v5973_v48 = vld [vmem:[#allocation17 + $0x20] sm:$0xff]  }
0x1370   :  { %4209 = vmatprep.subr.bf16.mxu0 %v4673_v42 }
0x1373   :  { %4210 = vmatpush3.bf16.msra.mxu0 %v4673_v42 }
0x1374   :  { %4211 = vmatprep.subr.bf16.mxu0 %v4674_v49 }
0x1377   :  { %4212 = vmatpush3.bf16.msra.mxu0 %v4674_v49 }
0x1378   :  { %4213 = vmatprep.subr.bf16.mxu0 %v4675_v17 }
0x137b   :  { %4214 = vmatpush3.bf16.msra.mxu0 %v4675_v17  ;;  %v5982_v17 = vld [vmem:[#allocation17 + $0x18] sm:$0xff]  }
0x137c   :  { %4215 = vmatprep.subr.bf16.mxu0 %v4676_v51 }
0x137f   :  { %4216 = vmatpush3.bf16.msra.mxu0 %v4676_v51  ;;  %v5989_v51 = vld [vmem:[#allocation17 + $0x10] sm:$0xff]  }
0x1380   :  { %4217 = vmatprep.subr.bf16.mxu0 %v4677_v33 }
0x1383   :  { %4218 = vmatpush3.bf16.msra.mxu0 %v4677_v33  ;;  %v5996_v33 = vld [vmem:[#allocation17 + $0x8] sm:$0xff]  }
0x1384   :  { %4251 = vmatprep.subr.bf16.mxu0 %v5242_v0 }
0x1386   :  { %4220 = vmatmul.mubr.bf16.vlgmr.msra.gmra.mxu0 %v1662_v1  ;;  %v5999_v1 = vld [vmem:[#allocation17] sm:$0xff]  }
0x1387   :  { %4223 = vmatprep.mubr.bf16.mxu0 %v1663_v61  ;;  %4252 = vmatpush3.bf16.msra.mxu0 %v5953_v46 }
0x1388   :  { %4253 = vmatprep.subr.bf16.mxu0 %v5242_v0 }
0x138b   :  { %4254 = vmatpush3.bf16.msra.mxu0 %v5961_v14 }
0x138c   :  { %4255 = vmatprep.subr.bf16.mxu0 %v5242_v0 }
0x138f   :  { %4256 = vmatpush3.bf16.msra.mxu0 %v5967_v52 }
0x1390   :  { %4257 = vmatprep.subr.bf16.mxu0 %v5242_v0 }
0x1393   :  { %4258 = vmatpush3.bf16.msra.mxu0 %v5973_v48 }
0x1394   :  { %4259 = vmatprep.subr.bf16.mxu0 %v5242_v0 }
0x1397   :  { %4260 = vmatpush3.bf16.msra.mxu0 %v5982_v17 }
0x1398   :  { %4261 = vmatprep.subr.bf16.mxu0 %v5242_v0 }
0x139b   :  { %4262 = vmatpush3.bf16.msra.mxu0 %v5989_v51 }
0x139c   :  { %4263 = vmatprep.subr.bf16.mxu0 %v5242_v0 }
0x139f   :  { %4264 = vmatpush3.bf16.msra.mxu0 %v5996_v33 }
0x13a0   :  { %4265 = vmatprep.subr.bf16.mxu0 %v5242_v0 }
0x13a3   :  { %4266 = vmatpush3.bf16.msra.mxu0 %v5999_v1 }
0x13a4   :  { %4291 = vmatprep.subr.bf16.mxu0 %v5242_v0 }
0x1426   :  { %v1556_v55 = vpop.f32.mrf.mxu0 }
0x1427   :  { %v1562_v60 = vadd.f32 %v1556_v55, %v1087_v53 }
0x1428   :  { %v4181_v57 = vpop.f32.mrf.mxu0 }
0x1429   :  { %v3405_v62 = vmul.f32 -1.442695, %v1562_v60 }
0x142a   :  { %v1559_v63 = vpop.f32.mrf.mxu0 }
0x142b   :  { %4830 = vpow2.f32 %v3405_v62 }
0x142c   :  { %v4182_v3 = vpop.f32.mrf.mxu0  ;;  %4832 = vtanh.f32 %v1562_v60 }
0x1438   :  { %v4831_v5 = vpop.eup %4830 }
0x1439   :  { %v1566_v7 = vadd.f32 1.0, %v4831_v5  ;;  %v4833_v31 = vpop.eup %4832 }
0x143b   :  { %4834 = vrcp.f32 %v1566_v7 }
0x1446   :  { %v4221_v15 = vpop.f32.mrf.mxu0 }
0x1447   :  { %v1762_v50 = vadd.f32 %v4221_v15, %v5942_v18 }
0x1448   :  { %v4835_v26 = vpop.eup %4834  ;;  %v1753_v54 = vpop.f32.mrf.mxu0 }
0x1449   :  { %v1570_v9 = vsel %vm222_vm1, %v4835_v26, %v4833_v31  ;;  %v1754_v58 = vadd.f32 %v5942_v18, %v1753_v54 }
0x144a   :  { %1575 = vrot.lane.b32.xlu1 %v1570_v9, %s5246_s7  ;;  %1571 = vrot.lane.b32.xlu0 %v1570_v9, %s5245_s10  ;;  %v4222_v29 = vpop.f32.mrf.mxu0 }
0x144b   :  { %v1765_v59 = vadd.f32 %v4222_v29, %v5942_v18 }
0x144c   :  { %v1756_v16 = vpop.f32.mrf.mxu0 }
0x144d   :  { %v1757_v20 = vadd.f32 %v5942_v18, %v1756_v16  ;;  %v1818_v40 = vpack.c.bf16 %v1765_v59, %v1762_v50 }
0x144e   :  { %1573 = vrot.lane.b32.xlu0 %v1570_v9, %s5230_s29 }
0x144f   :  { %v1817_v36 = vpack.c.bf16 %v1757_v20, %v1754_v58 }
0x14bc   :  { %v1576_v11 = vpop.permute.xlu1 %1575  ;;  %v1572_v56 = vpop.permute.xlu0 %1571 }
0x14bd   :  { %v1578_v12 = vmul.f32 %v1576_v11, %v1570_v9  ;;  %v1577_v13 = vmul.f32 %v1572_v56, %v1517_v2  ;;  %v6033_v11 = vld [vmem:[#allocation19] ss:$0 sm:$0xff] }
0x14bf   :  { %v5939_v44 = vadd.f32 %v1578_v12, %v1577_v13 }
0x14c0   :  { %v1574_v22 = vpop.permute.xlu0 %1573 }
0x14c1   :  { %4836 = vtanh.f32 %v5939_v44 }
0x14ce   :  { %v4837_v19 = vpop.eup %4836 }
0x14cf   :  { %v5945_v24 = vmul.f32 %v4837_v19, %v1574_v22 }
0x14d1   :  { %v1583_v34 = vpack.c.bf16 %v5945_v24, %v5945_v24 }
0x14d3   :  { %4200 = vmatmul.mubr.bf16.vlgmr.msra.gmra.mxu1 %v1583_v34 }
0x14d4   :  { %4228 = vmatpush3.bf16.msra.mxu1 %v4678_v25  ;;  %4243 = vmatprep.mubr.bf16.mxu1 %v1817_v36 }
0x14d5   :  { %4229 = vmatprep.subr.bf16.mxu1 %v4679_v35 }
0x14d8   :  { %4230 = vmatpush3.bf16.msra.mxu1 %v4679_v35 }
0x14d9   :  { %4231 = vmatprep.subr.bf16.mxu1 %v4680_v27 }
0x14dc   :  { %4232 = vmatpush3.bf16.msra.mxu1 %v4680_v27 }
0x14dd   :  { %4233 = vmatprep.subr.bf16.mxu1 %v4681_v38 }
0x14e0   :  { %4234 = vmatpush3.bf16.msra.mxu1 %v4681_v38 }
0x14e1   :  { %4235 = vmatprep.subr.bf16.mxu1 %v4682_v28 }
0x14e4   :  { %4236 = vmatpush3.bf16.msra.mxu1 %v4682_v28 }
0x14e5   :  { %4237 = vmatprep.subr.bf16.mxu1 %v4683_v30 }
0x14e8   :  { %4238 = vmatpush3.bf16.msra.mxu1 %v4683_v30 }
0x14e9   :  { %4239 = vmatprep.subr.bf16.mxu1 %v4684_v39 }
0x14ec   :  { %4240 = vmatpush3.bf16.msra.mxu1 %v4684_v39 }
0x14ed   :  { %4241 = vmatprep.subr.bf16.mxu1 %v4685_v32 }
0x14f0   :  { %4242 = vmatpush3.bf16.msra.mxu1 %v4685_v32 }
0x14f1   :  { %4271 = vmatprep.subr.bf16.mxu1 %v5242_v0 }
0x14f3   :  { %4244 = vmatmul.mubr.bf16.vlgmr.msra.gmra.mxu1 %v1818_v40 }
0x14f4   :  { %4272 = vmatpush3.bf16.msra.mxu1 %v5953_v46 }
0x14f5   :  { %4273 = vmatprep.subr.bf16.mxu1 %v5242_v0 }
0x14f8   :  { %4274 = vmatpush3.bf16.msra.mxu1 %v5961_v14 }
0x14f9   :  { %4275 = vmatprep.subr.bf16.mxu1 %v5242_v0 }
0x14fc   :  { %4276 = vmatpush3.bf16.msra.mxu1 %v5967_v52 }
0x14fd   :  { %4277 = vmatprep.subr.bf16.mxu1 %v5242_v0 }
0x1500   :  { %4278 = vmatpush3.bf16.msra.mxu1 %v5973_v48 }
0x1501   :  { %4279 = vmatprep.subr.bf16.mxu1 %v5242_v0 }
0x1504   :  { %4280 = vmatpush3.bf16.msra.mxu1 %v5982_v17 }
0x1505   :  { %4281 = vmatprep.subr.bf16.mxu1 %v5242_v0 }
0x1508   :  { %4282 = vmatpush3.bf16.msra.mxu1 %v5989_v51 }
0x1509   :  { %4283 = vmatprep.subr.bf16.mxu1 %v5242_v0 }
0x150c   :  { %4284 = vmatpush3.bf16.msra.mxu1 %v5996_v33 }
0x150d   :  { %4285 = vmatprep.subr.bf16.mxu1 %v5242_v0 }
0x1510   :  { %4286 = vmatpush3.bf16.msra.mxu1 %v5999_v1 }
0x1511   :  { %4311 = vmatprep.subr.bf16.mxu1 %v5242_v0 }
0x1593   :  { %v1618_v41 = vpop.f32.mrf.mxu1 }
0x1594   :  { %v1624_v43 = vadd.f32 %v1618_v41, %v1090_v21 }
0x1595   :  { %v4201_v2 = vpop.f32.mrf.mxu1 }
0x1596   :  { %v3406_v4 = vmul.f32 -1.442695, %v1624_v43 }
0x1597   :  { %v1621_v6 = vpop.f32.mrf.mxu1 }
0x1598   :  { %4838 = vpow2.f32 %v3406_v4 }
0x1599   :  { %v4202_v8 = vpop.f32.mrf.mxu1  ;;  %4840 = vtanh.f32 %v1624_v43 }
0x15a5   :  { %v4839_v10 = vpop.eup %4838 }
0x15a6   :  { %v1628_v47 = vadd.f32 1.0, %v4839_v10  ;;  %v4841_v45 = vpop.eup %4840 }
0x15a8   :  { %4842 = vrcp.f32 %v1628_v47 }
0x15b3   :  { %v6031_v7 = vpop.f32.mrf.mxu1 }
0x15b5   :  { %v4843_v42 = vpop.eup %4842  ;;  %v1909_v9 = vpop.f32.mrf.mxu1 }
0x15b6   :  { %v1632_v49 = vsel %vm222_vm1, %v4843_v42, %v4841_v45  ;;  %v1910_v13 = vadd.f32 %v6033_v11, %v1909_v9 }
0x15b7   :  { %1637 = vrot.lane.b32.xlu0 %v1632_v49, %s5246_s7  ;;  %1633 = vrot.lane.b32.xlu1 %v1632_v49, %s5245_s10  ;;  %v6069_v43 = vpop.f32.mrf.mxu1 }
0x15b9   :  { %v1912_v2 = vpop.f32.mrf.mxu1 }
0x15ba   :  { %v1913_v47 = vadd.f32 %v6033_v11, %v1912_v2 }
0x15bb   :  { %1635 = vrot.lane.b32.xlu1 %v1632_v49, %s5230_s29 }
0x1629   :  { %v1638_v61 = vpop.permute.xlu0 %1637  ;;  %v1634_v53 = vpop.permute.xlu1 %1633 }
0x162a   :  { %v1640_v55 = vmul.f32 %v1638_v61, %v1632_v49  ;;  %v1639_v60 = vmul.f32 %v1634_v53, %v5939_v44 }
0x162c   :  { %v1641_v57 = vadd.f32 %v1640_v55, %v1639_v60 }
0x162d   :  { %v1636_v63 = vpop.permute.xlu1 %1635 }
0x162e   :  { %4844 = vtanh.f32 %v1641_v57 }
0x163b   :  { %v4845_v62 = vpop.eup %4844 }
0x163c   :  { %v1643_v3 = vmul.f32 %v4845_v62, %v1636_v63 }
0x163e   :  { %v1664_v5 = vpack.c.bf16 %v1643_v3, %v5945_v24 }
0x1640   :  { %4224 = vmatmul.mubr.bf16.gmra.mxu0 %v1664_v5 }
0x1641   :  { %4267 = vmatprep.mubr.msk.bf16.mxu0 %vm5243_vm0, %v5242_v0 }
0x1648   :  { %4268 = vmatmul.mubr.bf16.vlgmr.msra.gmra.mxu0 %v5244_v23 }
0x1649   :  { %4292 = vmatpush3.bf16.msra.mxu0 %v5953_v46  ;;  %4307 = vmatprep.mubr.msk.bf16.mxu0 %vm5243_vm0, %v5242_v0 }
0x164a   :  { %4293 = vmatprep.subr.bf16.mxu0 %v5242_v0 }
0x164d   :  { %4294 = vmatpush3.bf16.msra.mxu0 %v5961_v14 }
0x164e   :  { %4295 = vmatprep.subr.bf16.mxu0 %v5242_v0 }
0x1651   :  { %4296 = vmatpush3.bf16.msra.mxu0 %v5967_v52 }
0x1652   :  { %4297 = vmatprep.subr.bf16.mxu0 %v5242_v0 }
0x1655   :  { %4298 = vmatpush3.bf16.msra.mxu0 %v5973_v48 }
0x1656   :  { %4299 = vmatprep.subr.bf16.mxu0 %v5242_v0 }
0x1659   :  { %4300 = vmatpush3.bf16.msra.mxu0 %v5982_v17 }
0x165a   :  { %4301 = vmatprep.subr.bf16.mxu0 %v5242_v0 }
0x165d   :  { %4302 = vmatpush3.bf16.msra.mxu0 %v5989_v51 }
0x165e   :  { %4303 = vmatprep.subr.bf16.mxu0 %v5242_v0 }
0x1661   :  { %4304 = vmatpush3.bf16.msra.mxu0 %v5996_v33 }
0x1662   :  { %4305 = vmatprep.subr.bf16.mxu0 %v5242_v0 }
0x1665   :  { %4306 = vmatpush3.bf16.msra.mxu0 %v5999_v1 }
0x1666   :  { %4331 = vmatprep.subr.bf16.mxu0 %v5242_v0 }
0x1700   :  { %v4225_v31 = vpop.f32.mrf.mxu0 }
0x1701   :  { %v1778_v54 = vadd.f32 %v4225_v31, %v5942_v18 }
0x1702   :  { %v1769_v26 = vpop.f32.mrf.mxu0 }
0x1703   :  { %v1770_v15 = vadd.f32 %v5942_v18, %v1769_v26 }
0x1704   :  { %v4226_v25 = vpop.f32.mrf.mxu0 }
0x1705   :  { %v1781_v56 = vadd.f32 %v4226_v25, %v5942_v18 }
0x1706   :  { %v1772_v12 = vpop.f32.mrf.mxu0 }
0x1707   :  { %v1773_v44 = vadd.f32 %v5942_v18, %v1772_v12  ;;  %v1820_v20 = vpack.c.bf16 %v1781_v56, %v1778_v54 }
0x1708   :  { %v2031_v29 = vpop.f32.mrf.mxu0 }
0x1709   :  { %v1819_v16 = vpack.c.bf16 %v1773_v44, %v1770_v15  ;;  %v2037_v19 = vadd.f32 %v2031_v29, %v1910_v13  ;;  %v1918_v44 = vadd.f32 %v6031_v7, %v6033_v11 }
0x170a   :  { %v4269_v22 = vpop.f32.mrf.mxu0 }
0x170b   :  { %v3433_v24 = vmul.f32 -1.442695, %v2037_v19  ;;  %4247 = vmatprep.mubr.bf16.mxu1 %v1819_v16 }
0x170c   :  { %4248 = vmatmul.mubr.bf16.gmra.mxu1 %v1820_v20  ;;  %v2034_v58 = vpop.f32.mrf.mxu0 }
0x170d   :  { %4846 = vpow2.f32 %v3433_v24  ;;  %4287 = vmatprep.mubr.msk.bf16.mxu1 %vm5243_vm0, %v5242_v0 }
0x170e   :  { %v4270_v34 = vpop.f32.mrf.mxu0  ;;  %4848 = vtanh.f32 %v2037_v19 }
0x171a   :  { %v4847_v35 = vpop.eup %4846 }
0x171b   :  { %v2041_v36 = vadd.f32 1.0, %v4847_v35  ;;  %v4849_v27 = vpop.eup %4848 }
0x171d   :  { %4850 = vrcp.f32 %v2041_v36 }
0x172a   :  { %v4851_v18 = vpop.eup %4850 }
0x172b   :  { %v2045_v38 = vsel %vm222_vm1, %v4851_v18, %v4849_v27 }
0x172c   :  { %2050 = vrot.lane.b32.xlu1 %v2045_v38, %s5246_s7  ;;  %2046 = vrot.lane.b32.xlu0 %v2045_v38, %s5245_s10 }
0x1730   :  { %2048 = vrot.lane.b32.xlu0 %v2045_v38, %s5230_s29 }
0x179e   :  { %v2051_v28 = vpop.permute.xlu1 %2050  ;;  %v2047_v30 = vpop.permute.xlu0 %2046 }
0x179f   :  { %v2053_v39 = vmul.f32 %v2051_v28, %v2045_v38  ;;  %v2052_v32 = vmul.f32 0.0, %v2047_v30 }
0x17a1   :  { %v2054_v59 = vadd.f32 %v2053_v39, %v2052_v32 }
0x17a2   :  { %v2049_v40 = vpop.permute.xlu0 %2048 }
0x17a3   :  { %4852 = vtanh.f32 %v2054_v59 }
0x17b0   :  { %v4853_v50 = vpop.eup %4852 }
0x17b1   :  { %v6047_v21 = vmul.f32 %v4853_v50, %v2049_v40  ;;  %v1921_v50 = vadd.f32 %v6069_v43, %v6033_v11 }
0x17b3   :  { %v2058_v41 = vpack.c.bf16 %v6047_v21, %v6047_v21 }
0x17b5   :  { %4288 = vmatmul.mubr.bf16.vlgmr.msra.gmra.mxu1 %v2058_v41 }
0x17b6   :  { %4312 = vmatpush3.bf16.msra.mxu1 %v5953_v46  ;;  %4327 = vmatprep.mubr.msk.bf16.mxu1 %vm5243_vm0, %v5242_v0 }
0x17b7   :  { %4313 = vmatprep.subr.bf16.mxu1 %v5242_v0 }
0x17ba   :  { %4314 = vmatpush3.bf16.msra.mxu1 %v5961_v14 }
0x17bb   :  { %4315 = vmatprep.subr.bf16.mxu1 %v5242_v0 }
0x17be   :  { %4316 = vmatpush3.bf16.msra.mxu1 %v5967_v52 }
0x17bf   :  { %4317 = vmatprep.subr.bf16.mxu1 %v5242_v0 }
0x17c2   :  { %4318 = vmatpush3.bf16.msra.mxu1 %v5973_v48 }
0x17c3   :  { %4319 = vmatprep.subr.bf16.mxu1 %v5242_v0 }
0x17c6   :  { %4320 = vmatpush3.bf16.msra.mxu1 %v5982_v17 }
0x17c7   :  { %4321 = vmatprep.subr.bf16.mxu1 %v5242_v0 }
0x17ca   :  { %4322 = vmatpush3.bf16.msra.mxu1 %v5989_v51 }
0x17cb   :  { %4323 = vmatprep.subr.bf16.mxu1 %v5242_v0 }
0x17cc   :  { %v6071_v4 = vpop.f32.mrf.mxu1 }
0x17ce   :  { %4324 = vmatpush3.bf16.msra.mxu1 %v5996_v33  ;;  %v6073_v6 = vpop.f32.mrf.mxu1 }
0x17cf   :  { %4325 = vmatprep.subr.bf16.mxu1 %v5242_v0 }
0x17d0   :  { %v6075_v8 = vpop.f32.mrf.mxu1 }
0x17d2   :  { %4326 = vmatpush3.bf16.msra.mxu1 %v5999_v1  ;;  %v6077_v10 = vpop.f32.mrf.mxu1 }
0x17d3   :  { %4351 = vmatprep.subr.bf16.mxu1 %v5242_v0 }
0x1875   :  { %v2093_v45 = vpop.f32.mrf.mxu1 }
0x1876   :  { %v2099_v42 = vadd.f32 %v2093_v45, %v1913_v47 }
0x1877   :  { %v4289_v49 = vpop.f32.mrf.mxu1 }
0x1878   :  { %v3434_v61 = vmul.f32 -1.442695, %v2099_v42 }
0x1879   :  { %v2096_v53 = vpop.f32.mrf.mxu1 }
0x187a   :  { %4854 = vpow2.f32 %v3434_v61 }
0x187b   :  { %v4290_v55 = vpop.f32.mrf.mxu1  ;;  %4856 = vtanh.f32 %v2099_v42 }
0x1887   :  { %v4855_v60 = vpop.eup %4854 }
0x1888   :  { %v2103_v57 = vadd.f32 1.0, %v4855_v60  ;;  %v4857_v62 = vpop.eup %4856 }
0x188a   :  { %4858 = vrcp.f32 %v2103_v57 }
0x1897   :  { %v4859_v63 = vpop.eup %4858 }
0x1898   :  { %v2107_v3 = vsel %vm222_vm1, %v4859_v63, %v4857_v62 }
0x1899   :  { %2112 = vrot.lane.b32.xlu0 %v2107_v3, %s5246_s7  ;;  %2108 = vrot.lane.b32.xlu1 %v2107_v3, %s5245_s10 }
0x189d   :  { %2110 = vrot.lane.b32.xlu1 %v2107_v3, %s5230_s29 }
0x190b   :  { %v2113_v5 = vpop.permute.xlu0 %2112  ;;  %v2109_v31 = vpop.permute.xlu1 %2108 }
0x190c   :  { %v2115_v26 = vmul.f32 %v2113_v5, %v2107_v3  ;;  %v2114_v9 = vmul.f32 %v2109_v31, %v2054_v59 }
0x190e   :  { %v2116_v25 = vadd.f32 %v2115_v26, %v2114_v9 }
0x190f   :  { %v2111_v12 = vpop.permute.xlu1 %2110 }
0x1910   :  { %4860 = vtanh.f32 %v2116_v25 }
0x191d   :  { %v4861_v56 = vpop.eup %4860 }
0x191e   :  { %v6085_v13 = vmul.f32 %v4861_v56, %v2111_v12 }
0x1920   :  { %v2120_v15 = vpack.c.bf16 %v6085_v13, %v6085_v13 }
0x1922   :  { %4308 = vmatmul.mubr.bf16.vlgmr.msra.gmra.mxu0 %v2120_v15 }
0x1923   :  { %4332 = vmatpush3.bf16.msra.mxu0 %v5953_v46  ;;  %4347 = vmatprep.mubr.msk.bf16.mxu0 %vm5243_vm0, %v5242_v0 }
0x1924   :  { %4333 = vmatprep.subr.bf16.mxu0 %v5242_v0 }
0x1927   :  { %4334 = vmatpush3.bf16.msra.mxu0 %v5961_v14 }
0x1928   :  { %4335 = vmatprep.subr.bf16.mxu0 %v5242_v0 }
0x192b   :  { %4336 = vmatpush3.bf16.msra.mxu0 %v5967_v52 }
0x192c   :  { %4337 = vmatprep.subr.bf16.mxu0 %v5242_v0 }
0x192f   :  { %4338 = vmatpush3.bf16.msra.mxu0 %v5973_v48 }
0x1930   :  { %4339 = vmatprep.subr.bf16.mxu0 %v5242_v0 }
0x1933   :  { %4340 = vmatpush3.bf16.msra.mxu0 %v5982_v17 }
0x1934   :  { %4341 = vmatprep.subr.bf16.mxu0 %v5242_v0 }
0x1937   :  { %4342 = vmatpush3.bf16.msra.mxu0 %v5989_v51 }
0x1938   :  { %4343 = vmatprep.subr.bf16.mxu0 %v5242_v0 }
0x193b   :  { %4344 = vmatpush3.bf16.msra.mxu0 %v5996_v33 }
0x193c   :  { %4345 = vmatprep.subr.bf16.mxu0 %v5242_v0 }
0x193f   :  { %4346 = vmatpush3.bf16.msra.mxu0 %v5999_v1 }
0x1940   :  { %4371 = vmatprep.subr.bf16.mxu0 %v5242_v0 }
0x19e2   :  { %v2155_v54 = vpop.f32.mrf.mxu0 }
0x19e3   :  { %v2161_v29 = vadd.f32 %v2155_v54, %v1918_v44 }
0x19e4   :  { %v4309_v16 = vpop.f32.mrf.mxu0 }
0x19e5   :  { %v3435_v19 = vmul.f32 -1.442695, %v2161_v29 }
0x19e6   :  { %v2158_v20 = vpop.f32.mrf.mxu0 }
0x19e7   :  { %4862 = vpow2.f32 %v3435_v19 }
0x19e8   :  { %v4310_v22 = vpop.f32.mrf.mxu0  ;;  %4864 = vtanh.f32 %v2161_v29 }
0x19f4   :  { %v4863_v24 = vpop.eup %4862 }
0x19f5   :  { %v2165_v58 = vadd.f32 1.0, %v4863_v24  ;;  %v4865_v34 = vpop.eup %4864 }
0x19f7   :  { %4866 = vrcp.f32 %v2165_v58 }
0x1a04   :  { %v4867_v35 = vpop.eup %4866 }
0x1a05   :  { %v2169_v36 = vsel %vm222_vm1, %v4867_v35, %v4865_v34 }
0x1a06   :  { %2174 = vrot.lane.b32.xlu1 %v2169_v36, %s5246_s7  ;;  %2170 = vrot.lane.b32.xlu0 %v2169_v36, %s5245_s10 }
0x1a0a   :  { %2172 = vrot.lane.b32.xlu0 %v2169_v36, %s5230_s29 }
0x1a78   :  { %v2175_v7 = vpop.permute.xlu1 %2174  ;;  %v2171_v27 = vpop.permute.xlu0 %2170 }
0x1a79   :  { %v2177_v18 = vmul.f32 %v2175_v7, %v2169_v36  ;;  %v2176_v38 = vmul.f32 %v2171_v27, %v2116_v25  ;;  %v1926_v25 = vadd.f32 %v6033_v11, %v6073_v6 }
0x1a7b   :  { %v2178_v28 = vadd.f32 %v2177_v18, %v2176_v38 }
0x1a7c   :  { %v2173_v39 = vpop.permute.xlu0 %2172 }
0x1a7d   :  { %4868 = vtanh.f32 %v2178_v28 }
0x1a8a   :  { %v4869_v30 = vpop.eup %4868 }
0x1a8b   :  { %v6114_v32 = vmul.f32 %v4869_v30, %v2173_v39 }
0x1a8d   :  { %v2182_v59 = vpack.c.bf16 %v6114_v32, %v6114_v32 }
0x1a8f   :  { %4328 = vmatmul.mubr.bf16.vlgmr.msra.gmra.mxu1 %v2182_v59 }
0x1a90   :  { %4352 = vmatpush3.bf16.msra.mxu1 %v5953_v46  ;;  %4367 = vmatprep.mubr.msk.bf16.mxu1 %vm5243_vm0, %v5242_v0 }
0x1a91   :  { %4353 = vmatprep.subr.bf16.mxu1 %v5242_v0 }
0x1a94   :  { %4354 = vmatpush3.bf16.msra.mxu1 %v5961_v14 }
0x1a95   :  { %4355 = vmatprep.subr.bf16.mxu1 %v5242_v0 }
0x1a98   :  { %4356 = vmatpush3.bf16.msra.mxu1 %v5967_v52 }
0x1a99   :  { %4357 = vmatprep.subr.bf16.mxu1 %v5242_v0 }
0x1a9c   :  { %4358 = vmatpush3.bf16.msra.mxu1 %v5973_v48 }
0x1a9d   :  { %4359 = vmatprep.subr.bf16.mxu1 %v5242_v0 }
0x1aa0   :  { %4360 = vmatpush3.bf16.msra.mxu1 %v5982_v17 }
0x1aa1   :  { %4361 = vmatprep.subr.bf16.mxu1 %v5242_v0 }
0x1aa4   :  { %4362 = vmatpush3.bf16.msra.mxu1 %v5989_v51 }
0x1aa5   :  { %4363 = vmatprep.subr.bf16.mxu1 %v5242_v0 }
0x1aa8   :  { %4364 = vmatpush3.bf16.msra.mxu1 %v5996_v33 }
0x1aa9   :  { %4365 = vmatprep.subr.bf16.mxu1 %v5242_v0 }
0x1aac   :  { %4366 = vmatpush3.bf16.msra.mxu1 %v5999_v1 }
0x1aad   :  { %4391 = vmatprep.subr.bf16.mxu1 %v5242_v0 }
0x1b4f   :  { %v2217_v40 = vpop.f32.mrf.mxu1 }
0x1b50   :  { %v2223_v41 = vadd.f32 %v2217_v40, %v1921_v50 }
0x1b51   :  { %v4329_v2 = vpop.f32.mrf.mxu1 }
0x1b52   :  { %v3436_v47 = vmul.f32 -1.442695, %v2223_v41 }
0x1b53   :  { %v2220_v45 = vpop.f32.mrf.mxu1 }
0x1b54   :  { %4870 = vpow2.f32 %v3436_v47 }
0x1b55   :  { %v4330_v42 = vpop.f32.mrf.mxu1  ;;  %4872 = vtanh.f32 %v2223_v41 }
0x1b61   :  { %v4871_v49 = vpop.eup %4870 }
0x1b62   :  { %v2227_v61 = vadd.f32 1.0, %v4871_v49  ;;  %v4873_v53 = vpop.eup %4872 }
0x1b64   :  { %4874 = vrcp.f32 %v2227_v61 }
0x1b71   :  { %v4875_v55 = vpop.eup %4874 }
0x1b72   :  { %v2231_v60 = vsel %vm222_vm1, %v4875_v55, %v4873_v53  ;;  %v4695_v53 = vld [vmem:[#allocation20 + $0x30] sm:$0xff]   ;;  %v2524_v55 = vpack.c.bf16 %v6085_v13, %v6047_v21  ;;  %v4701_v21 = vld [vmem:[#allocation20] sm:$0xff]  }
0x1b73   :  { %2236 = vrot.lane.b32.xlu0 %v2231_v60, %s5246_s7  ;;  %2232 = vrot.lane.b32.xlu1 %v2231_v60, %s5245_s10 }
0x1b77   :  { %2234 = vrot.lane.b32.xlu1 %v2231_v60, %s5230_s29 }
0x1be5   :  { %v2237_v43 = vpop.permute.xlu0 %2236  ;;  %v2233_v57 = vpop.permute.xlu1 %2232 }
0x1be6   :  { %v2239_v62 = vmul.f32 %v2237_v43, %v2231_v60  ;;  %v2238_v63 = vmul.f32 %v2233_v57, %v2178_v28  ;;  %v4696_v60 = vld [vmem:[#allocation20 + $0x28] sm:$0xff]   ;;  %v4697_v43 = vld [vmem:[#allocation20 + $0x20] sm:$0xff]   ;;  %v4698_v57 = vld [vmem:[#allocation20 + $0x18] sm:$0xff]  }
0x1be8   :  { %v2240_v3 = vadd.f32 %v2239_v62, %v2238_v63  ;;  %v4699_v62 = vld [vmem:[#allocation20 + $0x10] sm:$0xff]   ;;  %v4700_v63 = vld [vmem:[#allocation20 + $0x8] sm:$0xff]  }
0x1be9   :  { %v2235_v31 = vpop.permute.xlu1 %2234 }
0x1bea   :  { %4876 = vtanh.f32 %v2240_v3 }
0x1bf7   :  { %v4877_v5 = vpop.eup %4876 }
0x1bf8   :  { %v6143_v26 = vmul.f32 %v4877_v5, %v2235_v31  ;;  %v1934_v5 = vadd.f32 %v6071_v4, %v6033_v11  ;;  %v6219_v4 = vld [vmem:[%s6590_s13 + $0x38] sm:$0xff]  }
0x1bfa   :  { %v2244_v9 = vpack.c.bf16 %v6143_v26, %v6143_v26  ;;  %v2525_v13 = vpack.c.bf16 %v6143_v26, %v6114_v32 }
0x1bfc   :  { %4348 = vmatmul.mubr.bf16.vlgmr.msra.gmra.mxu0 %v2244_v9 }
0x1bfd   :  { %4372 = vmatpush3.bf16.msra.mxu0 %v5953_v46  ;;  %4387 = vmatprep.mubr.msk.bf16.mxu0 %vm5243_vm0, %v5242_v0 }
0x1bfe   :  { %4373 = vmatprep.subr.bf16.mxu0 %v5242_v0 }
0x1c01   :  { %4374 = vmatpush3.bf16.msra.mxu0 %v5961_v14 }
0x1c02   :  { %4375 = vmatprep.subr.bf16.mxu0 %v5242_v0 }
0x1c05   :  { %4376 = vmatpush3.bf16.msra.mxu0 %v5967_v52 }
0x1c06   :  { %4377 = vmatprep.subr.bf16.mxu0 %v5242_v0 }
0x1c09   :  { %4378 = vmatpush3.bf16.msra.mxu0 %v5973_v48 }
0x1c0a   :  { %4379 = vmatprep.subr.bf16.mxu0 %v5242_v0 }
0x1c0d   :  { %4380 = vmatpush3.bf16.msra.mxu0 %v5982_v17 }
0x1c0e   :  { %4381 = vmatprep.subr.bf16.mxu0 %v5242_v0 }
0x1c11   :  { %4382 = vmatpush3.bf16.msra.mxu0 %v5989_v51 }
0x1c12   :  { %4383 = vmatprep.subr.bf16.mxu0 %v5242_v0 }
0x1c15   :  { %4384 = vmatpush3.bf16.msra.mxu0 %v5996_v33 }
0x1c16   :  { %4385 = vmatprep.subr.bf16.mxu0 %v5242_v0 }
0x1c19   :  { %4386 = vmatpush3.bf16.msra.mxu0 %v5999_v1 }
0x1cbc   :  { %v2279_v56 = vpop.f32.mrf.mxu0 }
0x1cbd   :  { %v2285_v12 = vadd.f32 %v2279_v56, %v1926_v25 }
0x1cbe   :  { %v4349_v15 = vpop.f32.mrf.mxu0 }
0x1cbf   :  { %v3437_v44 = vmul.f32 -1.442695, %v2285_v12 }
0x1cc0   :  { %v2282_v54 = vpop.f32.mrf.mxu0 }
0x1cc1   :  { %4878 = vpow2.f32 %v3437_v44 }
0x1cc2   :  { %v4350_v29 = vpop.f32.mrf.mxu0  ;;  %4880 = vtanh.f32 %v2285_v12 }
0x1cce   :  { %v4879_v16 = vpop.eup %4878 }
0x1ccf   :  { %v2289_v19 = vadd.f32 1.0, %v4879_v16  ;;  %v4881_v20 = vpop.eup %4880  ;;  %v6226_v16 = vld [vmem:[%s6590_s13 + $0x30] sm:$0xff]  }
0x1cd1   :  { %4882 = vrcp.f32 %v2289_v19  ;;  %v6233_v19 = vld [vmem:[%s6590_s13 + $0x28] sm:$0xff]  }
0x1cde   :  { %v4883_v22 = vpop.eup %4882 }
0x1cdf   :  { %v2293_v24 = vsel %vm222_vm1, %v4883_v22, %v4881_v20  ;;  %v6240_v20 = vld [vmem:[%s6590_s13 + $0x20] sm:$0xff]   ;;  %v6247_v22 = vld [vmem:[%s6590_s13 + $0x18] sm:$0xff]  }
0x1ce0   :  { %2298 = vrot.lane.b32.xlu1 %v2293_v24, %s5246_s7  ;;  %2294 = vrot.lane.b32.xlu0 %v2293_v24, %s5245_s10 }
0x1ce4   :  { %2296 = vrot.lane.b32.xlu0 %v2293_v24, %s5230_s29 }
0x1d52   :  { %v2299_v6 = vpop.permute.xlu1 %2298  ;;  %v2295_v58 = vpop.permute.xlu0 %2294 }
0x1d53   :  { %v2301_v34 = vmul.f32 %v2299_v6, %v2293_v24  ;;  %v2300_v35 = vmul.f32 %v2295_v58, %v2240_v3  ;;  %v6254_v24 = vld [vmem:[%s6590_s13 + $0x10] sm:$0xff]   ;;  %v6261_v6 = vld [vmem:[%s6590_s13 + $0x8] sm:$0xff]   ;;  %v6268_v58 = vld [vmem:[%s6590_s13] sm:$0xff]  }
0x1d55   :  { %v2302_v36 = vadd.f32 %v2301_v34, %v2300_v35 }
0x1d56   :  { %v2297_v27 = vpop.permute.xlu0 %2296 }
0x1d57   :  { %4884 = vtanh.f32 %v2302_v36 }
0x1d64   :  { %v4885_v7 = vpop.eup %4884 }
0x1d65   :  { %v6171_v18 = vmul.f32 %v4885_v7, %v2297_v27 }
0x1d67   :  { %v2306_v38 = vpack.c.bf16 %v6171_v18, %v6171_v18 }
0x1d69   :  { %4368 = vmatmul.mubr.bf16.vlgmr.msra.gmra.mxu1 %v2306_v38 }
0x1d6a   :  { %4392 = vmatpush3.bf16.msra.mxu1 %v5953_v46  ;;  %4407 = vmatprep.mubr.msk.bf16.mxu1 %vm5243_vm0, %v5242_v0  ;;  %v1929_v46 = vadd.f32 %v6033_v11, %v6077_v10  ;;  %v4694_v10 = vld [vmem:[#allocation20 + $0x38] sm:$0xff]  }
0x1d6b   :  { %4393 = vmatprep.subr.bf16.mxu1 %v5242_v0  ;;  %4411 = vmatprep.subr.bf16.mxu0 %v4694_v10 }
0x1d6e   :  { %4394 = vmatpush3.bf16.msra.mxu1 %v5961_v14 }
0x1d6f   :  { %4395 = vmatprep.subr.bf16.mxu1 %v5242_v0 }
0x1d72   :  { %4396 = vmatpush3.bf16.msra.mxu1 %v5967_v52 }
0x1d73   :  { %4397 = vmatprep.subr.bf16.mxu1 %v5242_v0 }
0x1d76   :  { %4398 = vmatpush3.bf16.msra.mxu1 %v5973_v48 }
0x1d77   :  { %4399 = vmatprep.subr.bf16.mxu1 %v5242_v0 }
0x1d7a   :  { %4400 = vmatpush3.bf16.msra.mxu1 %v5982_v17 }
0x1d7b   :  { %4401 = vmatprep.subr.bf16.mxu1 %v5242_v0 }
0x1d7e   :  { %4402 = vmatpush3.bf16.msra.mxu1 %v5989_v51 }
0x1d7f   :  { %4403 = vmatprep.subr.bf16.mxu1 %v5242_v0 }
0x1d82   :  { %4404 = vmatpush3.bf16.msra.mxu1 %v5996_v33 }
0x1d83   :  { %4405 = vmatprep.subr.bf16.mxu1 %v5242_v0 }
0x1d86   :  { %4406 = vmatpush3.bf16.msra.mxu1 %v5999_v1 }
0x1d87   :  { %4435 = vmatprep.subr.bf16.mxu1 %v5242_v0 }
0x1e29   :  { %v2341_v14 = vpop.f32.mrf.mxu1 }
0x1e2a   :  { %v2347_v52 = vadd.f32 %v2341_v14, %v1929_v46 }
0x1e2b   :  { %v4369_v48 = vpop.f32.mrf.mxu1 }
0x1e2c   :  { %v3438_v17 = vmul.f32 -1.442695, %v2347_v52 }
0x1e2d   :  { %v2344_v28 = vpop.f32.mrf.mxu1 }
0x1e2e   :  { %4886 = vpow2.f32 %v3438_v17 }
0x1e2f   :  { %v4370_v51 = vpop.f32.mrf.mxu1  ;;  %4888 = vtanh.f32 %v2347_v52 }
0x1e3b   :  { %v4887_v30 = vpop.eup %4886 }
0x1e3c   :  { %v2351_v39 = vadd.f32 1.0, %v4887_v30  ;;  %v4889_v33 = vpop.eup %4888 }
0x1e3e   :  { %4890 = vrcp.f32 %v2351_v39 }
0x1e4b   :  { %v4891_v59 = vpop.eup %4890 }
0x1e4c   :  { %v2355_v1 = vsel %vm222_vm1, %v4891_v59, %v4889_v33 }
0x1e4d   :  { %2360 = vrot.lane.b32.xlu0 %v2355_v1, %s5246_s7  ;;  %2356 = vrot.lane.b32.xlu1 %v2355_v1, %s5245_s10 }
0x1e51   :  { %2358 = vrot.lane.b32.xlu1 %v2355_v1, %s5230_s29 }
0x1ebf   :  { %v2361_v50 = vpop.permute.xlu0 %2360  ;;  %v2357_v40 = vpop.permute.xlu1 %2356 }
0x1ec0   :  { %v2363_v41 = vmul.f32 %v2361_v50, %v2355_v1  ;;  %v2362_v2 = vmul.f32 %v2357_v40, %v2302_v36 }
0x1ec2   :  { %v6200_v47 = vadd.f32 %v2363_v41, %v2362_v2 }
0x1ec3   :  { %v2359_v42 = vpop.permute.xlu1 %2358 }
0x1ec4   :  { %4892 = vtanh.f32 %v6200_v47 }
0x1ed1   :  { %v4893_v45 = vpop.eup %4892 }
0x1ed2   :  { %v2366_v49 = vmul.f32 %v4893_v45, %v2359_v42 }
0x1ed4   :  { %v2368_v61 = vpack.c.bf16 %v2366_v49, %v2366_v49  ;;  %v2526_v3 = vpack.c.bf16 %v2366_v49, %v6171_v18 }
0x1ed6   :  { %4388 = vmatmul.mubr.bf16.vlgmr.msra.gmra.mxu0 %v2368_v61 }
0x1ed7   :  { %4412 = vmatpush3.bf16.msra.mxu0 %v4694_v10  ;;  %4427 = vmatprep.mubr.bf16.mxu0 %v2524_v55  ;;  %v6324_v10 = vld [vmem:[%s6591_s14] ss:$0 sm:$0xff] }
0x1ed8   :  { %4413 = vmatprep.subr.bf16.mxu0 %v4695_v53 }
0x1edb   :  { %4414 = vmatpush3.bf16.msra.mxu0 %v4695_v53 }
0x1edc   :  { %4415 = vmatprep.subr.bf16.mxu0 %v4696_v60 }
0x1edf   :  { %4416 = vmatpush3.bf16.msra.mxu0 %v4696_v60 }
0x1ee0   :  { %4417 = vmatprep.subr.bf16.mxu0 %v4697_v43 }
0x1ee3   :  { %4418 = vmatpush3.bf16.msra.mxu0 %v4697_v43 }
0x1ee4   :  { %4419 = vmatprep.subr.bf16.mxu0 %v4698_v57 }
0x1ee7   :  { %4420 = vmatpush3.bf16.msra.mxu0 %v4698_v57 }
0x1ee8   :  { %4421 = vmatprep.subr.bf16.mxu0 %v4699_v62 }
0x1eeb   :  { %4422 = vmatpush3.bf16.msra.mxu0 %v4699_v62 }
0x1eec   :  { %4423 = vmatprep.subr.bf16.mxu0 %v4700_v63 }
0x1eef   :  { %4424 = vmatpush3.bf16.msra.mxu0 %v4700_v63 }
0x1ef0   :  { %4425 = vmatprep.subr.bf16.mxu0 %v4701_v21 }
0x1ef3   :  { %4426 = vmatpush3.bf16.msra.mxu0 %v4701_v21 }
0x1ef4   :  { %4455 = vmatprep.subr.bf16.mxu0 %v5242_v0 }
0x1ef6   :  { %4428 = vmatmul.mubr.bf16.vlgmr.msra.gmra.mxu0 %v2525_v13 }
0x1ef7   :  { %4431 = vmatprep.mubr.bf16.mxu0 %v2526_v3  ;;  %4456 = vmatpush3.bf16.msra.mxu0 %v6219_v4 }
0x1ef8   :  { %4457 = vmatprep.subr.bf16.mxu0 %v5242_v0 }
0x1efb   :  { %4458 = vmatpush3.bf16.msra.mxu0 %v6226_v16 }
0x1efc   :  { %4459 = vmatprep.subr.bf16.mxu0 %v5242_v0 }
0x1eff   :  { %4460 = vmatpush3.bf16.msra.mxu0 %v6233_v19 }
0x1f00   :  { %4461 = vmatprep.subr.bf16.mxu0 %v5242_v0 }
0x1f03   :  { %4462 = vmatpush3.bf16.msra.mxu0 %v6240_v20 }
0x1f04   :  { %4463 = vmatprep.subr.bf16.mxu0 %v5242_v0 }
0x1f07   :  { %4464 = vmatpush3.bf16.msra.mxu0 %v6247_v22 }
0x1f08   :  { %4465 = vmatprep.subr.bf16.mxu0 %v5242_v0 }
0x1f0b   :  { %4466 = vmatpush3.bf16.msra.mxu0 %v6254_v24 }
0x1f0c   :  { %4467 = vmatprep.subr.bf16.mxu0 %v5242_v0 }
0x1f0f   :  { %4468 = vmatpush3.bf16.msra.mxu0 %v6261_v6 }
0x1f10   :  { %4469 = vmatprep.subr.bf16.mxu0 %v5242_v0 }
0x1f13   :  { %4470 = vmatpush3.bf16.msra.mxu0 %v6268_v58 }
0x1f14   :  { %4495 = vmatprep.subr.bf16.mxu0 %v5242_v0 }
0x1f96   :  { %v2403_v31 = vpop.f32.mrf.mxu0 }
0x1f97   :  { %v2409_v9 = vadd.f32 %v2403_v31, %v1934_v5 }
0x1f98   :  { %v4389_v25 = vpop.f32.mrf.mxu0 }
0x1f99   :  { %v3439_v56 = vmul.f32 -1.442695, %v2409_v9 }
0x1f9a   :  { %v2406_v12 = vpop.f32.mrf.mxu0 }
0x1f9b   :  { %4894 = vpow2.f32 %v3439_v56 }
0x1f9c   :  { %v4390_v15 = vpop.f32.mrf.mxu0  ;;  %4896 = vtanh.f32 %v2409_v9 }
0x1fa8   :  { %v4895_v44 = vpop.eup %4894 }
0x1fa9   :  { %v2413_v54 = vadd.f32 1.0, %v4895_v44  ;;  %v4897_v32 = vpop.eup %4896 }
0x1fab   :  { %4898 = vrcp.f32 %v2413_v54 }
0x1fb6   :  { %v6319_v59 = vpop.f32.mrf.mxu0 }
0x1fb8   :  { %v4899_v26 = vpop.eup %4898  ;;  %v2616_v1 = vpop.f32.mrf.mxu0 }
0x1fb9   :  { %v2417_v29 = vsel %vm222_vm1, %v4899_v26, %v4897_v32 }
0x1fba   :  { %2422 = vrot.lane.b32.xlu1 %v2417_v29, %s5246_s7  ;;  %2418 = vrot.lane.b32.xlu0 %v2417_v29, %s5245_s10 }
0x1fbe   :  { %2420 = vrot.lane.b32.xlu0 %v2417_v29, %s5230_s29 }
0x202c   :  { %v2423_v34 = vpop.permute.xlu1 %2422  ;;  %v2419_v35 = vpop.permute.xlu0 %2418 }
0x202d   :  { %v2425_v36 = vmul.f32 %v2423_v34, %v2417_v29  ;;  %v2424_v7 = vmul.f32 %v2419_v35, %v6200_v47  ;;  %v6363_v34 = vpop.f32.mrf.mxu0 }
0x202f   :  { %v6273_v27 = vadd.f32 %v2425_v36, %v2424_v7  ;;  %v2619_v35 = vpop.f32.mrf.mxu0 }
0x2030   :  { %v2421_v38 = vpop.permute.xlu0 %2420 }
0x2031   :  { %4900 = vtanh.f32 %v6273_v27 }
0x203e   :  { %v4901_v18 = vpop.eup %4900 }
0x203f   :  { %v6276_v46 = vmul.f32 %v4901_v18, %v2421_v38  ;;  %v2620_v38 = vadd.f32 %v6324_v10, %v2619_v35 }
0x2041   :  { %v2430_v14 = vpack.c.bf16 %v6276_v46, %v6276_v46 }
0x2043   :  { %4408 = vmatmul.mubr.bf16.vlgmr.msra.gmra.mxu1 %v2430_v14 }
0x2044   :  { %4436 = vmatpush3.bf16.msra.mxu1 %v6219_v4  ;;  %4451 = vmatprep.mubr.msk.bf16.mxu1 %vm5243_vm0, %v5242_v0 }
0x2045   :  { %4437 = vmatprep.subr.bf16.mxu1 %v5242_v0 }
0x2048   :  { %4438 = vmatpush3.bf16.msra.mxu1 %v6226_v16 }
0x2049   :  { %4439 = vmatprep.subr.bf16.mxu1 %v5242_v0 }
0x204c   :  { %4440 = vmatpush3.bf16.msra.mxu1 %v6233_v19 }
0x204d   :  { %4441 = vmatprep.subr.bf16.mxu1 %v5242_v0 }
0x2050   :  { %4442 = vmatpush3.bf16.msra.mxu1 %v6240_v20 }
0x2051   :  { %4443 = vmatprep.subr.bf16.mxu1 %v5242_v0 }
0x2054   :  { %4444 = vmatpush3.bf16.msra.mxu1 %v6247_v22 }
0x2055   :  { %4445 = vmatprep.subr.bf16.mxu1 %v5242_v0 }
0x2058   :  { %4446 = vmatpush3.bf16.msra.mxu1 %v6254_v24 }
0x2059   :  { %4447 = vmatprep.subr.bf16.mxu1 %v5242_v0 }
0x205c   :  { %4448 = vmatpush3.bf16.msra.mxu1 %v6261_v6 }
0x205d   :  { %4449 = vmatprep.subr.bf16.mxu1 %v5242_v0 }
0x2060   :  { %4450 = vmatpush3.bf16.msra.mxu1 %v6268_v58 }
0x2061   :  { %4475 = vmatprep.subr.bf16.mxu1 %v5242_v0 }
0x2063   :  { %4452 = vmatmul.mubr.bf16.vlgmr.msra.gmra.mxu1 %v5244_v23  ;;  %v1937_v23 = vadd.f32 %v6075_v8, %v6033_v11  ;;  %v2617_v11 = vadd.f32 %v6324_v10, %v2616_v1 }
0x2064   :  { %4476 = vmatpush3.bf16.msra.mxu1 %v6219_v4  ;;  %4491 = vmatprep.mubr.msk.bf16.mxu1 %vm5243_vm0, %v5242_v0 }
0x2065   :  { %4477 = vmatprep.subr.bf16.mxu1 %v5242_v0 }
0x2068   :  { %4478 = vmatpush3.bf16.msra.mxu1 %v6226_v16 }
0x2069   :  { %4479 = vmatprep.subr.bf16.mxu1 %v5242_v0 }
0x206c   :  { %4480 = vmatpush3.bf16.msra.mxu1 %v6233_v19 }
0x206d   :  { %4481 = vmatprep.subr.bf16.mxu1 %v5242_v0 }
0x2070   :  { %4482 = vmatpush3.bf16.msra.mxu1 %v6240_v20 }
0x2071   :  { %4483 = vmatprep.subr.bf16.mxu1 %v5242_v0 }
0x2074   :  { %4484 = vmatpush3.bf16.msra.mxu1 %v6247_v22 }
0x2075   :  { %4485 = vmatprep.subr.bf16.mxu1 %v5242_v0 }
0x2078   :  { %4486 = vmatpush3.bf16.msra.mxu1 %v6254_v24 }
0x2079   :  { %4487 = vmatprep.subr.bf16.mxu1 %v5242_v0 }
0x207c   :  { %4488 = vmatpush3.bf16.msra.mxu1 %v6261_v6 }
0x207d   :  { %4489 = vmatprep.subr.bf16.mxu1 %v5242_v0 }
0x2080   :  { %4490 = vmatpush3.bf16.msra.mxu1 %v6268_v58 }
0x2081   :  { %4515 = vmatprep.subr.bf16.mxu1 %v5242_v0 }
0x2103   :  { %v2465_v52 = vpop.f32.mrf.mxu1 }
0x2104   :  { %v2471_v48 = vadd.f32 %v2465_v52, %v1937_v23 }
0x2105   :  { %v4409_v17 = vpop.f32.mrf.mxu1 }
0x2106   :  { %v3440_v28 = vmul.f32 -1.442695, %v2471_v48 }
0x2107   :  { %v2468_v51 = vpop.f32.mrf.mxu1 }
0x2108   :  { %4902 = vpow2.f32 %v3440_v28 }
0x2109   :  { %v4410_v30 = vpop.f32.mrf.mxu1  ;;  %4904 = vtanh.f32 %v2471_v48 }
0x2115   :  { %v4903_v39 = vpop.eup %4902 }
0x2116   :  { %v2475_v33 = vadd.f32 1.0, %v4903_v39  ;;  %v4905_v50 = vpop.eup %4904 }
0x2118   :  { %4906 = vrcp.f32 %v2475_v33 }
0x2123   :  { %v2738_v8 = vpop.f32.mrf.mxu1 }
0x2124   :  { %v2744_v40 = vadd.f32 %v2738_v8, %v2617_v11 }
0x2125   :  { %v4907_v41 = vpop.eup %4906  ;;  %v4453_v2 = vpop.f32.mrf.mxu1 }
0x2126   :  { %v3458_v47 = vmul.f32 -1.442695, %v2744_v40  ;;  %v2479_v45 = vsel %vm222_vm1, %v4907_v41, %v4905_v50 }
0x2127   :  { %v2741_v42 = vpop.f32.mrf.mxu1  ;;  %2484 = vrot.lane.b32.xlu0 %v2479_v45, %s5246_s7  ;;  %2480 = vrot.lane.b32.xlu1 %v2479_v45, %s5245_s10 }
0x2128   :  { %4908 = vpow2.f32 %v3458_v47  ;;  %v2625_v42 = vadd.f32 %v6319_v59, %v6324_v10 }
0x2129   :  { %v4454_v49 = vpop.f32.mrf.mxu1  ;;  %4910 = vtanh.f32 %v2744_v40 }
0x2135   :  { %v4909_v61 = vpop.eup %4908 }
0x2136   :  { %v2748_v53 = vadd.f32 1.0, %v4909_v61  ;;  %v4911_v55 = vpop.eup %4910 }
0x2138   :  { %4912 = vrcp.f32 %v2748_v53 }
0x2145   :  { %v4913_v60 = vpop.eup %4912 }
0x2146   :  { %v2752_v43 = vsel %vm222_vm1, %v4913_v60, %v4911_v55 }
0x2147   :  { %2757 = vrot.lane.b32.xlu0 %v2752_v43, %s5246_s7  ;;  %2753 = vrot.lane.b32.xlu1 %v2752_v43, %s5245_s10 }
0x214b   :  { %2755 = vrot.lane.b32.xlu0 %v2752_v43, %s5230_s29  ;;  %2482 = vrot.lane.b32.xlu1 %v2479_v45, %s5230_s29 }
0x2199   :  { %v2485_v57 = vpop.permute.xlu0 %2484  ;;  %v2481_v62 = vpop.permute.xlu1 %2480 }
0x219a   :  { %v2487_v63 = vmul.f32 %v2485_v57, %v2479_v45  ;;  %v2486_v21 = vmul.f32 %v2481_v62, %v6273_v27 }
0x219c   :  { %v2488_v13 = vadd.f32 %v2487_v63, %v2486_v21 }
0x219e   :  { %4914 = vtanh.f32 %v2488_v13 }
0x21ab   :  { %v4915_v56 = vpop.eup %4914 }
0x21b9   :  { %v2758_v3 = vpop.permute.xlu0 %2757  ;;  %v2754_v5 = vpop.permute.xlu1 %2753 }
0x21ba   :  { %v2760_v31 = vmul.f32 %v2758_v3, %v2752_v43  ;;  %v2759_v9 = vmul.f32 0.0, %v2754_v5 }
0x21bc   :  { %v2761_v25 = vadd.f32 %v2760_v31, %v2759_v9 }
0x21bd   :  { %v2483_v12 = vpop.permute.xlu1 %2482  ;;  %v2756_v32 = vpop.permute.xlu0 %2755 }
0x21be   :  { %4916 = vtanh.f32 %v2761_v25  ;;  %v2490_v15 = vmul.f32 %v4915_v56, %v2483_v12 }
0x21c0   :  { %v2527_v44 = vpack.c.bf16 %v2490_v15, %v6276_v46 }
0x21c2   :  { %4432 = vmatmul.mubr.bf16.gmra.mxu0 %v2527_v44  ;;  %v2628_v44 = vadd.f32 %v6363_v34, %v6324_v10 }
0x21c3   :  { %4471 = vmatprep.mubr.msk.bf16.mxu0 %vm5243_vm0, %v5242_v0 }
0x21cb   :  { %v4917_v54 = vpop.eup %4916 }
0x21cc   :  { %v6341_v26 = vmul.f32 %v4917_v54, %v2756_v32 }
0x21ce   :  { %v2765_v29 = vpack.c.bf16 %v6341_v26, %v6341_v26 }
0x21d0   :  { %4472 = vmatmul.mubr.bf16.vlgmr.msra.gmra.mxu0 %v2765_v29 }
0x21d1   :  { %4496 = vmatpush3.bf16.msra.mxu0 %v6219_v4  ;;  %4511 = vmatprep.mubr.msk.bf16.mxu0 %vm5243_vm0, %v5242_v0 }
0x21d2   :  { %4497 = vmatprep.subr.bf16.mxu0 %v5242_v0 }
0x21d5   :  { %4498 = vmatpush3.bf16.msra.mxu0 %v6226_v16 }
0x21d6   :  { %4499 = vmatprep.subr.bf16.mxu0 %v5242_v0 }
0x21d9   :  { %4500 = vmatpush3.bf16.msra.mxu0 %v6233_v19 }
0x21da   :  { %4501 = vmatprep.subr.bf16.mxu0 %v5242_v0 }
0x21dd   :  { %4502 = vmatpush3.bf16.msra.mxu0 %v6240_v20 }
0x21de   :  { %4503 = vmatprep.subr.bf16.mxu0 %v5242_v0 }
0x21e1   :  { %4504 = vmatpush3.bf16.msra.mxu0 %v6247_v22 }
0x21e2   :  { %4505 = vmatprep.subr.bf16.mxu0 %v5242_v0 }
0x21e5   :  { %4506 = vmatpush3.bf16.msra.mxu0 %v6254_v24 }
0x21e6   :  { %4507 = vmatprep.subr.bf16.mxu0 %v5242_v0 }
0x21e9   :  { %4508 = vmatpush3.bf16.msra.mxu0 %v6261_v6 }
0x21ea   :  { %4509 = vmatprep.subr.bf16.mxu0 %v5242_v0 }
0x21ed   :  { %4510 = vmatpush3.bf16.msra.mxu0 %v6268_v58 }
0x21ee   :  { %4535 = vmatprep.subr.bf16.mxu0 %v5242_v0 }
0x2282   :  { %v6365_v36 = vpop.f32.mrf.mxu0 }
0x2284   :  { %v6367_v7 = vpop.f32.mrf.mxu0 }
0x2286   :  { %v6369_v27 = vpop.f32.mrf.mxu0 }
0x2288   :  { %v6371_v18 = vpop.f32.mrf.mxu0 }
0x2290   :  { %v2800_v46 = vpop.f32.mrf.mxu0 }
0x2291   :  { %v2806_v14 = vadd.f32 %v2800_v46, %v2620_v38 }
0x2292   :  { %v4473_v23 = vpop.f32.mrf.mxu0 }
0x2293   :  { %v3459_v52 = vmul.f32 -1.442695, %v2806_v14 }
0x2294   :  { %v2803_v48 = vpop.f32.mrf.mxu0 }
0x2295   :  { %4918 = vpow2.f32 %v3459_v52 }
0x2296   :  { %v4474_v17 = vpop.f32.mrf.mxu0  ;;  %4920 = vtanh.f32 %v2806_v14 }
0x22a2   :  { %v4919_v28 = vpop.eup %4918 }
0x22a3   :  { %v2810_v51 = vadd.f32 1.0, %v4919_v28  ;;  %v4921_v30 = vpop.eup %4920 }
0x22a5   :  { %4922 = vrcp.f32 %v2810_v51 }
0x22b2   :  { %v4923_v39 = vpop.eup %4922 }
0x22b3   :  { %v2814_v33 = vsel %vm222_vm1, %v4923_v39, %v4921_v30 }
0x22b4   :  { %2819 = vrot.lane.b32.xlu0 %v2814_v33, %s5246_s7  ;;  %2815 = vrot.lane.b32.xlu1 %v2814_v33, %s5245_s10 }
0x22b8   :  { %2817 = vrot.lane.b32.xlu1 %v2814_v33, %s5230_s29 }
0x2326   :  { %v2820_v1 = vpop.permute.xlu0 %2819  ;;  %v2816_v11 = vpop.permute.xlu1 %2815 }
0x2327   :  { %v2822_v8 = vmul.f32 %v2820_v1, %v2814_v33  ;;  %v2821_v50 = vmul.f32 %v2816_v11, %v2761_v25 }
0x2329   :  { %v2823_v40 = vadd.f32 %v2822_v8, %v2821_v50  ;;  %v2633_v50 = vadd.f32 %v6324_v10, %v6367_v7 }
0x232a   :  { %v2818_v2 = vpop.permute.xlu1 %2817 }
0x232b   :  { %4924 = vtanh.f32 %v2823_v40 }
0x2338   :  { %v4925_v41 = vpop.eup %4924 }
0x2339   :  { %v6379_v47 = vmul.f32 %v4925_v41, %v2818_v2 }
0x233b   :  { %v2827_v45 = vpack.c.bf16 %v6379_v47, %v6379_v47 }
0x233d   :  { %4492 = vmatmul.mubr.bf16.vlgmr.msra.gmra.mxu1 %v2827_v45 }
0x233e   :  { %4516 = vmatpush3.bf16.msra.mxu1 %v6219_v4  ;;  %4531 = vmatprep.mubr.msk.bf16.mxu1 %vm5243_vm0, %v5242_v0 }
0x233f   :  { %4517 = vmatprep.subr.bf16.mxu1 %v5242_v0 }
0x2342   :  { %4518 = vmatpush3.bf16.msra.mxu1 %v6226_v16 }
0x2343   :  { %4519 = vmatprep.subr.bf16.mxu1 %v5242_v0 }
0x2346   :  { %4520 = vmatpush3.bf16.msra.mxu1 %v6233_v19 }
0x2347   :  { %4521 = vmatprep.subr.bf16.mxu1 %v5242_v0 }
0x234a   :  { %4522 = vmatpush3.bf16.msra.mxu1 %v6240_v20 }
0x234b   :  { %4523 = vmatprep.subr.bf16.mxu1 %v5242_v0 }
0x234e   :  { %4524 = vmatpush3.bf16.msra.mxu1 %v6247_v22 }
0x234f   :  { %4525 = vmatprep.subr.bf16.mxu1 %v5242_v0 }
0x2352   :  { %4526 = vmatpush3.bf16.msra.mxu1 %v6254_v24 }
0x2353   :  { %4527 = vmatprep.subr.bf16.mxu1 %v5242_v0 }
0x2356   :  { %4528 = vmatpush3.bf16.msra.mxu1 %v6261_v6 }
0x2357   :  { %4529 = vmatprep.subr.bf16.mxu1 %v5242_v0 }
0x235a   :  { %4530 = vmatpush3.bf16.msra.mxu1 %v6268_v58 }
0x235b   :  { %4555 = vmatprep.subr.bf16.mxu1 %v5242_v0 }
0x23fd   :  { %v2862_v49 = vpop.f32.mrf.mxu1 }
0x23fe   :  { %v2868_v61 = vadd.f32 %v2862_v49, %v2625_v42 }
0x23ff   :  { %v4493_v53 = vpop.f32.mrf.mxu1 }
0x2400   :  { %v3460_v55 = vmul.f32 -1.442695, %v2868_v61 }
0x2401   :  { %v2865_v60 = vpop.f32.mrf.mxu1 }
0x2402   :  { %4926 = vpow2.f32 %v3460_v55 }
0x2403   :  { %v4494_v43 = vpop.f32.mrf.mxu1  ;;  %4928 = vtanh.f32 %v2868_v61 }
0x240f   :  { %v4927_v57 = vpop.eup %4926 }
0x2410   :  { %v2872_v62 = vadd.f32 1.0, %v4927_v57  ;;  %v4929_v63 = vpop.eup %4928 }
0x2412   :  { %4930 = vrcp.f32 %v2872_v62 }
0x241f   :  { %v4931_v21 = vpop.eup %4930 }
0x2420   :  { %v2876_v13 = vsel %vm222_vm1, %v4931_v21, %v4929_v63 }
0x2421   :  { %2881 = vrot.lane.b32.xlu1 %v2876_v13, %s5246_s7  ;;  %2877 = vrot.lane.b32.xlu0 %v2876_v13, %s5245_s10 }
0x2425   :  { %2879 = vrot.lane.b32.xlu0 %v2876_v13, %s5230_s29 }
0x2493   :  { %v2882_v59 = vpop.permute.xlu1 %2881  ;;  %v2878_v3 = vpop.permute.xlu0 %2877 }
0x2494   :  { %v2884_v5 = vmul.f32 %v2882_v59, %v2876_v13  ;;  %v2883_v31 = vmul.f32 %v2878_v3, %v2823_v40 }
0x2496   :  { %v2885_v9 = vadd.f32 %v2884_v5, %v2883_v31 }
0x2497   :  { %v2880_v56 = vpop.permute.xlu0 %2879 }
0x2498   :  { %4932 = vtanh.f32 %v2885_v9 }
0x24a5   :  { %v4933_v25 = vpop.eup %4932 }
0x24a6   :  { %v6408_v12 = vmul.f32 %v4933_v25, %v2880_v56 }
0x24a8   :  { %v2889_v15 = vpack.c.bf16 %v6408_v12, %v6408_v12 }
0x24aa   :  { %4512 = vmatmul.mubr.bf16.vlgmr.msra.gmra.mxu0 %v2889_v15 }
0x24ab   :  { %4536 = vmatpush3.bf16.msra.mxu0 %v6219_v4  ;;  %4551 = vmatprep.mubr.msk.bf16.mxu0 %vm5243_vm0, %v5242_v0 }
0x24ac   :  { %4537 = vmatprep.subr.bf16.mxu0 %v5242_v0 }
0x24af   :  { %4538 = vmatpush3.bf16.msra.mxu0 %v6226_v16 }
0x24b0   :  { %4539 = vmatprep.subr.bf16.mxu0 %v5242_v0 }
0x24b3   :  { %4540 = vmatpush3.bf16.msra.mxu0 %v6233_v19 }
0x24b4   :  { %4541 = vmatprep.subr.bf16.mxu0 %v5242_v0 }
0x24b7   :  { %4542 = vmatpush3.bf16.msra.mxu0 %v6240_v20 }
0x24b8   :  { %4543 = vmatprep.subr.bf16.mxu0 %v5242_v0 }
0x24bb   :  { %4544 = vmatpush3.bf16.msra.mxu0 %v6247_v22 }
0x24bc   :  { %4545 = vmatprep.subr.bf16.mxu0 %v5242_v0 }
0x24bf   :  { %4546 = vmatpush3.bf16.msra.mxu0 %v6254_v24 }
0x24c0   :  { %4547 = vmatprep.subr.bf16.mxu0 %v5242_v0 }
0x24c3   :  { %4548 = vmatpush3.bf16.msra.mxu0 %v6261_v6 }
0x24c4   :  { %4549 = vmatprep.subr.bf16.mxu0 %v5242_v0 }
0x24c7   :  { %4550 = vmatpush3.bf16.msra.mxu0 %v6268_v58 }
0x24c8   :  { %4575 = vmatprep.subr.bf16.mxu0 %v5242_v0 }
0x256a   :  { %v2924_v54 = vpop.f32.mrf.mxu0 }
0x256b   :  { %v2930_v32 = vadd.f32 %v2924_v54, %v2628_v44 }
0x256c   :  { %v4513_v29 = vpop.f32.mrf.mxu0 }
0x256d   :  { %v3461_v35 = vmul.f32 -1.442695, %v2930_v32 }
0x256e   :  { %v2927_v38 = vpop.f32.mrf.mxu0 }
0x256f   :  { %4934 = vpow2.f32 %v3461_v35 }
0x2570   :  { %v4514_v46 = vpop.f32.mrf.mxu0  ;;  %4936 = vtanh.f32 %v2930_v32 }
0x257c   :  { %v4935_v14 = vpop.eup %4934 }
0x257d   :  { %v2934_v23 = vadd.f32 1.0, %v4935_v14  ;;  %v4937_v52 = vpop.eup %4936  ;;  %v4711_v14 = vld [vmem:[%s6592_s15 + $0x30] sm:$0xff]  }
0x257f   :  { %4938 = vrcp.f32 %v2934_v23  ;;  %v3215_v23 = vpack.c.bf16 %v6379_v47, %v6341_v26  ;;  %v4714_v26 = vld [vmem:[%s6592_s15 + $0x18] sm:$0xff]   ;;  %v4715_v47 = vld [vmem:[%s6592_s15 + $0x10] sm:$0xff]  }
0x258c   :  { %v4939_v48 = vpop.eup %4938 }
0x258d   :  { %v2938_v17 = vsel %vm222_vm1, %v4939_v48, %v4937_v52  ;;  %v4712_v52 = vld [vmem:[%s6592_s15 + $0x28] sm:$0xff]   ;;  %v4713_v48 = vld [vmem:[%s6592_s15 + $0x20] sm:$0xff]  }
0x258e   :  { %2943 = vrot.lane.b32.xlu0 %v2938_v17, %s5246_s7  ;;  %2939 = vrot.lane.b32.xlu1 %v2938_v17, %s5245_s10 }
0x2592   :  { %2941 = vrot.lane.b32.xlu1 %v2938_v17, %s5230_s29 }
0x2600   :  { %v2944_v34 = vpop.permute.xlu0 %2943  ;;  %v2940_v28 = vpop.permute.xlu1 %2939 }
0x2601   :  { %v2946_v51 = vmul.f32 %v2944_v34, %v2938_v17  ;;  %v2945_v30 = vmul.f32 %v2940_v28, %v2885_v9  ;;  %v4716_v17 = vld [vmem:[%s6592_s15 + $0x8] sm:$0xff]   ;;  %v4717_v34 = vld [vmem:[%s6592_s15] sm:$0xff]  }
0x2603   :  { %v2947_v39 = vadd.f32 %v2946_v51, %v2945_v30  ;;  %v2641_v30 = vadd.f32 %v6365_v36, %v6324_v10 }
0x2604   :  { %v2942_v1 = vpop.permute.xlu1 %2941 }
0x2605   :  { %4940 = vtanh.f32 %v2947_v39 }
0x2612   :  { %v4941_v33 = vpop.eup %4940 }
0x2613   :  { %v6437_v11 = vmul.f32 %v4941_v33, %v2942_v1 }
0x2615   :  { %v2951_v8 = vpack.c.bf16 %v6437_v11, %v6437_v11  ;;  %v3216_v28 = vpack.c.bf16 %v6437_v11, %v6408_v12  ;;  %v6530_v12 = vld [vmem:[%s6593_s16] ss:$0 sm:$0xff] }
0x2617   :  { %4532 = vmatmul.mubr.bf16.vlgmr.msra.gmra.mxu1 %v2951_v8 }
0x2618   :  { %4556 = vmatpush3.bf16.msra.mxu1 %v6219_v4  ;;  %4571 = vmatprep.mubr.msk.bf16.mxu1 %vm5243_vm0, %v5242_v0 }
0x2619   :  { %4557 = vmatprep.subr.bf16.mxu1 %v5242_v0 }
0x261c   :  { %4558 = vmatpush3.bf16.msra.mxu1 %v6226_v16 }
0x261d   :  { %4559 = vmatprep.subr.bf16.mxu1 %v5242_v0 }
0x2620   :  { %4560 = vmatpush3.bf16.msra.mxu1 %v6233_v19 }
0x2621   :  { %4561 = vmatprep.subr.bf16.mxu1 %v5242_v0 }
0x2624   :  { %4562 = vmatpush3.bf16.msra.mxu1 %v6240_v20 }
0x2625   :  { %4563 = vmatprep.subr.bf16.mxu1 %v5242_v0 }
0x2628   :  { %4564 = vmatpush3.bf16.msra.mxu1 %v6247_v22 }
0x2629   :  { %4565 = vmatprep.subr.bf16.mxu1 %v5242_v0 }
0x262c   :  { %4566 = vmatpush3.bf16.msra.mxu1 %v6254_v24 }
0x262d   :  { %4567 = vmatprep.subr.bf16.mxu1 %v5242_v0 }
0x2630   :  { %4568 = vmatpush3.bf16.msra.mxu1 %v6261_v6 }
0x2631   :  { %4569 = vmatprep.subr.bf16.mxu1 %v5242_v0 }
0x2634   :  { %4570 = vmatpush3.bf16.msra.mxu1 %v6268_v58 }
0x26d7   :  { %v2986_v40 = vpop.f32.mrf.mxu1 }
0x26d8   :  { %v2992_v41 = vadd.f32 %v2986_v40, %v2633_v50 }
0x26d9   :  { %v4533_v2 = vpop.f32.mrf.mxu1 }
0x26da   :  { %v3462_v45 = vmul.f32 -1.442695, %v2992_v41 }
0x26db   :  { %v2989_v42 = vpop.f32.mrf.mxu1 }
0x26dc   :  { %4942 = vpow2.f32 %v3462_v45 }
0x26dd   :  { %v4534_v49 = vpop.f32.mrf.mxu1  ;;  %4944 = vtanh.f32 %v2992_v41 }
0x26e9   :  { %v4943_v61 = vpop.eup %4942 }
0x26ea   :  { %v2996_v53 = vadd.f32 1.0, %v4943_v61  ;;  %v4945_v55 = vpop.eup %4944 }
0x26ec   :  { %4946 = vrcp.f32 %v2996_v53 }
0x26f9   :  { %v4947_v60 = vpop.eup %4946 }
0x26fa   :  { %v3000_v43 = vsel %vm222_vm1, %v4947_v60, %v4945_v55 }
0x26fb   :  { %3005 = vrot.lane.b32.xlu1 %v3000_v43, %s5246_s7  ;;  %3001 = vrot.lane.b32.xlu0 %v3000_v43, %s5245_s10 }
0x26ff   :  { %3003 = vrot.lane.b32.xlu0 %v3000_v43, %s5230_s29 }
0x276d   :  { %v3006_v7 = vpop.permute.xlu1 %3005  ;;  %v3002_v57 = vpop.permute.xlu0 %3001 }
0x276e   :  { %v3008_v62 = vmul.f32 %v3006_v7, %v3000_v43  ;;  %v3007_v63 = vmul.f32 %v3002_v57, %v2947_v39 }
0x2770   :  { %v3009_v21 = vadd.f32 %v3008_v62, %v3007_v63 }
0x2771   :  { %v3004_v59 = vpop.permute.xlu0 %3003 }
0x2772   :  { %4948 = vtanh.f32 %v3009_v21 }
0x277f   :  { %v4949_v13 = vpop.eup %4948 }
0x2780   :  { %v6465_v3 = vmul.f32 %v4949_v13, %v3004_v59 }
0x2782   :  { %v3013_v5 = vpack.c.bf16 %v6465_v3, %v6465_v3 }
0x2784   :  { %4552 = vmatmul.mubr.bf16.vlgmr.msra.gmra.mxu0 %v3013_v5 }
0x2785   :  { %4576 = vmatpush3.bf16.msra.mxu0 %v6219_v4  ;;  %4591 = vmatprep.mubr.msk.bf16.mxu0 %vm5243_vm0, %v5242_v0  ;;  %v2636_v4 = vadd.f32 %v6324_v10, %v6371_v18 }
0x2786   :  { %4577 = vmatprep.subr.bf16.mxu0 %v5242_v0 }
0x2789   :  { %4578 = vmatpush3.bf16.msra.mxu0 %v6226_v16 }
0x278a   :  { %4579 = vmatprep.subr.bf16.mxu0 %v5242_v0 }
0x278d   :  { %4580 = vmatpush3.bf16.msra.mxu0 %v6233_v19 }
0x278e   :  { %4581 = vmatprep.subr.bf16.mxu0 %v5242_v0 }
0x2791   :  { %4582 = vmatpush3.bf16.msra.mxu0 %v6240_v20 }
0x2792   :  { %4583 = vmatprep.subr.bf16.mxu0 %v5242_v0 }
0x2795   :  { %4584 = vmatpush3.bf16.msra.mxu0 %v6247_v22 }
0x2796   :  { %4585 = vmatprep.subr.bf16.mxu0 %v5242_v0 }
0x2799   :  { %4586 = vmatpush3.bf16.msra.mxu0 %v6254_v24 }
0x279a   :  { %4587 = vmatprep.subr.bf16.mxu0 %v5242_v0 }
0x279d   :  { %4588 = vmatpush3.bf16.msra.mxu0 %v6261_v6 }
0x279e   :  { %4589 = vmatprep.subr.bf16.mxu0 %v5242_v0 }
0x27a1   :  { %4590 = vmatpush3.bf16.msra.mxu0 %v6268_v58  ;;  %v4710_v58 = vld [vmem:[%s6592_s15 + $0x38] sm:$0xff]  }
0x27a2   :  { %4595 = vmatprep.subr.bf16.mxu1 %v4710_v58 }
0x2844   :  { %v3048_v16 = vpop.f32.mrf.mxu0 }
0x2845   :  { %v3054_v19 = vadd.f32 %v3048_v16, %v2636_v4  ;;  %v2644_v16 = vadd.f32 %v6369_v27, %v6324_v10 }
0x2846   :  { %v4553_v20 = vpop.f32.mrf.mxu0 }
0x2847   :  { %v3463_v31 = vmul.f32 -1.442695, %v3054_v19 }
0x2848   :  { %v3051_v22 = vpop.f32.mrf.mxu0 }
0x2849   :  { %4950 = vpow2.f32 %v3463_v31 }
0x284a   :  { %v4554_v9 = vpop.f32.mrf.mxu0  ;;  %4952 = vtanh.f32 %v3054_v19 }
0x2856   :  { %v4951_v25 = vpop.eup %4950 }
0x2857   :  { %v3058_v24 = vadd.f32 1.0, %v4951_v25  ;;  %v4953_v56 = vpop.eup %4952 }
0x2859   :  { %4954 = vrcp.f32 %v3058_v24 }
0x2866   :  { %v4955_v6 = vpop.eup %4954 }
0x2867   :  { %v3062_v0 = vsel %vm222_vm1, %v4955_v6, %v4953_v56 }
0x2868   :  { %3067 = vrot.lane.b32.xlu0 %v3062_v0, %s5246_s7  ;;  %3063 = vrot.lane.b32.xlu1 %v3062_v0, %s5245_s10 }
0x286c   :  { %3065 = vrot.lane.b32.xlu1 %v3062_v0, %s5230_s29 }
0x28da   :  { %v3068_v18 = vpop.permute.xlu0 %3067  ;;  %v3064_v15 = vpop.permute.xlu1 %3063 }
0x28db   :  { %v3070_v44 = vmul.f32 %v3068_v18, %v3062_v0  ;;  %v3069_v54 = vmul.f32 %v3064_v15, %v3009_v21 }
0x28dd   :  { %v6496_v32 = vadd.f32 %v3070_v44, %v3069_v54 }
0x28de   :  { %v3066_v35 = vpop.permute.xlu1 %3065 }
0x28df   :  { %4956 = vtanh.f32 %v6496_v32 }
0x28ec   :  { %v4957_v29 = vpop.eup %4956 }
0x28ed   :  { %v3073_v38 = vmul.f32 %v4957_v29, %v3066_v35 }
0x28ef   :  { %v3075_v46 = vpack.c.bf16 %v3073_v38, %v3073_v38  ;;  %v3217_v51 = vpack.c.bf16 %v3073_v38, %v6465_v3 }
0x28f1   :  { %4572 = vmatmul.mubr.bf16.vlgmr.msra.gmra.mxu1 %v3075_v46 }
0x28f2   :  { %4596 = vmatpush3.bf16.msra.mxu1 %v4710_v58  ;;  %4611 = vmatprep.mubr.bf16.mxu1 %v3215_v23 }
0x28f3   :  { %4597 = vmatprep.subr.bf16.mxu1 %v4711_v14 }
0x28f6   :  { %4598 = vmatpush3.bf16.msra.mxu1 %v4711_v14 }
0x28f7   :  { %4599 = vmatprep.subr.bf16.mxu1 %v4712_v52 }
0x28fa   :  { %4600 = vmatpush3.bf16.msra.mxu1 %v4712_v52 }
0x28fb   :  { %4601 = vmatprep.subr.bf16.mxu1 %v4713_v48 }
0x28fe   :  { %4602 = vmatpush3.bf16.msra.mxu1 %v4713_v48 }
0x28ff   :  { %4603 = vmatprep.subr.bf16.mxu1 %v4714_v26 }
0x2902   :  { %4604 = vmatpush3.bf16.msra.mxu1 %v4714_v26 }
0x2903   :  { %4605 = vmatprep.subr.bf16.mxu1 %v4715_v47 }
0x2906   :  { %4606 = vmatpush3.bf16.msra.mxu1 %v4715_v47 }
0x2907   :  { %4607 = vmatprep.subr.bf16.mxu1 %v4716_v17 }
0x290a   :  { %4608 = vmatpush3.bf16.msra.mxu1 %v4716_v17 }
0x290b   :  { %4609 = vmatprep.subr.bf16.mxu1 %v4717_v34 }
0x290e   :  { %4610 = vmatpush3.bf16.msra.mxu1 %v4717_v34 }
0x2911   :  { %4612 = vmatmul.mubr.bf16.vlgmr.msra.gmra.mxu1 %v3216_v28 }
0x2912   :  { %4615 = vmatprep.mubr.bf16.mxu1 %v3217_v51 }
0x29b1   :  { %v3110_v39 = vpop.f32.mrf.mxu1 }
0x29b2   :  { %v3116_v33 = vadd.f32 %v3110_v39, %v2641_v30 }
0x29b3   :  { %v4573_v1 = vpop.f32.mrf.mxu1 }
0x29b4   :  { %v3464_v8 = vmul.f32 -1.442695, %v3116_v33 }
0x29b5   :  { %v3113_v50 = vpop.f32.mrf.mxu1 }
0x29b6   :  { %4958 = vpow2.f32 %v3464_v8 }
0x29b7   :  { %v4574_v40 = vpop.f32.mrf.mxu1  ;;  %4960 = vtanh.f32 %v3116_v33 }
0x29c3   :  { %v4959_v41 = vpop.eup %4958 }
0x29c4   :  { %v3120_v2 = vadd.f32 1.0, %v4959_v41  ;;  %v4961_v45 = vpop.eup %4960 }
0x29c6   :  { %4962 = vrcp.f32 %v3120_v2 }
0x29d1   :  { %v4613_v11 = vpop.f32.mrf.mxu1 }
0x29d2   :  { %v3316_v36 = vadd.f32 %v4613_v11, %v6530_v12 }
0x29d3   :  { %v4963_v42 = vpop.eup %4962  ;;  %v3307_v49 = vpop.f32.mrf.mxu1 }
0x29d4   :  { %3340 = vst [vmem:[%s6594_s17 + $0x10] sm:$0xff] %v3316_v36  ;;  %v3308_v61 = vadd.f32 %v6530_v12, %v3307_v49  ;;  %v3124_v53 = vsel %vm222_vm1, %v4963_v42, %v4961_v45 }
0x29d5   :  { %v4614_v55 = vpop.f32.mrf.mxu1  ;;  %3129 = vrot.lane.b32.xlu1 %v3124_v53, %s5246_s7  ;;  %3125 = vrot.lane.b32.xlu0 %v3124_v53, %s5245_s10 }
0x29d6   :  { %3338 = vst [vmem:[%s6594_s17] sm:$0xff] %v3308_v61  ;;  %v3319_v60 = vadd.f32 %v4614_v55, %v6530_v12 }
0x29d7   :  { %v3310_v43 = vpop.f32.mrf.mxu1 }
0x29d8   :  { %3341 = vst [vmem:[%s6594_s17 + $0x18] sm:$0xff] %v3319_v60  ;;  %v3311_v7 = vadd.f32 %v6530_v12, %v3310_v43 }
0x29d9   :  { %3127 = vrot.lane.b32.xlu0 %v3124_v53, %s5230_s29 }
0x29da   :  { %3339 = vst [vmem:[%s6594_s17 + $0x8] sm:$0xff] %v3311_v7 }
0x2a47   :  { %v3130_v57 = vpop.permute.xlu1 %3129  ;;  %v3126_v62 = vpop.permute.xlu0 %3125 }
0x2a48   :  { %v3132_v63 = vmul.f32 %v3130_v57, %v3124_v53  ;;  %v3131_v21 = vmul.f32 %v3126_v62, %v6496_v32 }
0x2a4a   :  { %v3133_v13 = vadd.f32 %v3132_v63, %v3131_v21 }
0x2a4b   :  { %v3128_v3 = vpop.permute.xlu0 %3127 }
0x2a4c   :  { %4964 = vtanh.f32 %v3133_v13 }
0x2a59   :  { %v4965_v59 = vpop.eup %4964 }
0x2a5a   :  { %v3135_v5 = vmul.f32 %v4965_v59, %v3128_v3 }
0x2a5c   :  { %v3137_v4 = vpack.c.bf16 %v3135_v5, %v3135_v5 }
0x2a5e   :  { %4592 = vmatmul.mubr.bf16.vlgmr.msra.gmra.mxu0 %v3137_v4 }
0x2b1e   :  { %v3172_v19 = vpop.f32.mrf.mxu0 }
0x2b1f   :  { %v3178_v20 = vadd.f32 %v3172_v19, %v2644_v16 }
0x2b20   :  { %v4593_v31 = vpop.f32.mrf.mxu0 }
0x2b21   :  { %v3465_v22 = vmul.f32 -1.442695, %v3178_v20 }
0x2b22   :  { %v3175_v9 = vpop.f32.mrf.mxu0 }
0x2b23   :  { %4966 = vpow2.f32 %v3465_v22 }
0x2b24   :  { %v4594_v25 = vpop.f32.mrf.mxu0  ;;  %4968 = vtanh.f32 %v3178_v20 }
0x2b30   :  { %v4967_v24 = vpop.eup %4966 }
0x2b31   :  { %v3182_v56 = vadd.f32 1.0, %v4967_v24  ;;  %v4969_v6 = vpop.eup %4968 }
0x2b33   :  { %4970 = vrcp.f32 %v3182_v56 }
0x2b40   :  { %v4971_v0 = vpop.eup %4970 }
0x2b41   :  { %v3186_v58 = vsel %vm222_vm1, %v4971_v0, %v4969_v6 }
0x2b42   :  { %3191 = vrot.lane.b32.xlu0 %v3186_v58, %s5246_s7  ;;  %3187 = vrot.lane.b32.xlu1 %v3186_v58, %s5245_s10 }
0x2b46   :  { %3189 = vrot.lane.b32.xlu1 %v3186_v58, %s5230_s29 }
0x2bb4   :  { %v3192_v10 = vpop.permute.xlu0 %3191  ;;  %v3188_v27 = vpop.permute.xlu1 %3187 }
0x2bb5   :  { %v3194_v18 = vmul.f32 %v3192_v10, %v3186_v58  ;;  %v3193_v15 = vmul.f32 %v3188_v27, %v3133_v13 }
0x2bb7   :  { %v3195_v44 = vadd.f32 %v3194_v18, %v3193_v15 }
0x2bb8   :  { %v3190_v32 = vpop.permute.xlu1 %3189 }
0x2bb9   :  { %4972 = vtanh.f32 %v3195_v44 }
0x2bc6   :  { %v4973_v54 = vpop.eup %4972 }
0x2bc7   :  { %v3197_v29 = vmul.f32 %v4973_v54, %v3190_v32 }
0x2bc9   :  { %v3218_v35 = vpack.c.bf16 %v3197_v29, %v3135_v5 }
0x2bcb   :  { %4616 = vmatmul.mubr.bf16.gmra.mxu1 %v3218_v35 }
0x2c8b   :  { %v4617_v38 = vpop.f32.mrf.mxu1 }
0x2c8c   :  { %v3332_v37 = vadd.f32 %v4617_v38, %v6530_v12 }
0x2c8d   :  { %v3323_v46 = vpop.f32.mrf.mxu1 }
0x2c8e   :  { %3344 = vst [vmem:[%s6594_s17 + $0x30] sm:$0xff] %v3332_v37  ;;  %v3324_v14 = vadd.f32 %v6530_v12, %v3323_v46 }
0x2c8f   :  { %v4618_v23 = vpop.f32.mrf.mxu1 }
0x2c90   :  { %3342 = vst [vmem:[%s6594_s17 + $0x20] sm:$0xff] %v3324_v14  ;;  %v3335_v52 = vadd.f32 %v4618_v23, %v6530_v12 }
0x2c91   :  { %v3326_v48 = vpop.f32.mrf.mxu1 }
0x2c92   :  { %3345 = vst [vmem:[%s6594_s17 + $0x38] sm:$0xff] %v3335_v52  ;;  %v3327_v26 = vadd.f32 %v6530_v12, %v3326_v48 }
0x2c94   :  { %3343 = vst [vmem:[%s6594_s17 + $0x28] sm:$0xff] %v3327_v26 }
0x2c95   :  { %3350 = vsyncpa [#allocation4], 1 }
0x2c96   :  { %3351 = vsyncpa [#allocation6], 1 }
0x2c97   :  { %3352 = vsyncpa [#allocation9], 1 }
0x2c98   :  { %3353 = vsyncpa [#allocation12], 1 }
0x2c99   :  { %3354 = vsyncpa [#allocation15], 1 }
0x2c9a   :  { %3355 = vsyncpa [#allocation18], 1 }
0x2c9b   :  { %3356 = vsyncpa [#allocation21], 1 }

</bundles_post_ra>
